<compile_context>
chip_gen: v6e
topology: v6e:2x2x1
jax: 0.10.0
libtpu: 0.0.40
codegen_flags: <defaults>
</compile_context>

<pallas_src>
import functools

import jax
import jax.numpy as jnp
from jax.experimental import pallas as pl
from jax.experimental.pallas import tpu as pltpu

H1, H2, H3 = 256, 1024, 512
LANE = 128


def _silu(z):
    # z * sigmoid(z).  exp and the approximate reciprocal both run on the EUP
    # slot, keeping the VPU free for the mul/adds between matmuls.
    return z * pl.reciprocal(1.0 + jnp.exp(-z), approx=True)


def dqn_kernel(x_ref, w1_ref, b1_ref, w2_ref, b2_ref, w4_ref, b4_ref,
               w3_ref, b3_ref, o_ref):
    bf16 = w1_ref.dtype

    def dense(h, w_ref, b_ref):
        # bf16 MXU operands, f32 accumulation, f32 bias add.
        return jnp.dot(h.astype(bf16), w_ref[...],
                       preferred_element_type=jnp.float32) + b_ref[...]

    h = _silu(dense(x_ref[...], w1_ref, b1_ref))
    h = _silu(dense(h, w2_ref, b2_ref))
    h = _silu(dense(h, w4_ref, b4_ref))
    o_ref[...] = dense(h, w3_ref, b3_ref)


def _round_up(x, m):
    return (x + m - 1) // m * m


@functools.partial(jax.jit, static_argnames=("block_b",))
def dqn_forward(x, params, block_b=128):
    """x: (B, n_obs) float32.  params: bf16 (in,out) weights, f32 (1,out) biases."""
    B, n_obs = x.shape
    n_actions = params["w3"].shape[1]

    # Pad batch to a multiple of the batch tile, and pad the output width to a
    # lane-dense multiple of 128 (avoids masked vst partial stores per step).
    B_pad = _round_up(B, block_b)
    N_pad = _round_up(max(n_actions, LANE), LANE)

    x_p = jnp.pad(x, ((0, B_pad - B), (0, 0)))
    w3_p = jnp.pad(params["w3"], ((0, 0), (0, N_pad - n_actions)))
    b3_p = jnp.pad(params["b3"], ((0, 0), (0, N_pad - n_actions)))

    grid = (B_pad // block_b,)

    # Weights/biases are fetched whole with a constant index_map (resident in
    # VMEM across the whole grid).  Total footprint is well under 8 MB even
    # with default double-buffering, so no pipeline_mode override is needed.
    full = lambda shp: pl.BlockSpec(shp, lambda i: (0,) * len(shp))

    in_specs = [
        pl.BlockSpec((block_b, n_obs), lambda i: (i, 0)),        # x
        full((n_obs, H1)), full((1, H1)),                        # layer1
        full((H1, H2)),    full((1, H2)),                        # layer2
        full((H2, H3)),    full((1, H3)),                        # layer4
        full((H3, N_pad)), full((1, N_pad)),                     # layer3
    ]
    out_spec = pl.BlockSpec((block_b, N_pad), lambda i: (i, 0))

    flops = 2 * B_pad * (n_obs * H1 + H1 * H2 + H2 * H3 + H3 * N_pad)
    transcendentals = 2 * B_pad * (H1 + H2 + H3)        # exp + rcp per SiLU
    bytes_accessed = (
        B_pad * n_obs * 4 + B_pad * N_pad * 4                      # x, out
        + 2 * (n_obs * H1 + H1 * H2 + H2 * H3 + H3 * N_pad)        # bf16 W
        + 4 * (H1 + H2 + H3 + N_pad))                              # f32 b

    out = pl.pallas_call(
        dqn_kernel,
        out_shape=jax.ShapeDtypeStruct((B_pad, N_pad), jnp.float32),
        grid_spec=pltpu.PrefetchScalarGridSpec(
            num_scalar_prefetch=0,
            grid=grid,
            in_specs=in_specs,
            out_specs=out_spec,
        ),
        compiler_params=pltpu.CompilerParams(
            dimension_semantics=("parallel",),
            # Keep well below v7x's 64 MiB physical VMEM; this kernel needs
            # <10 MiB total.
            vmem_limit_bytes=32 << 20,
        ),
        cost_estimate=pl.CostEstimate(
            flops=flops,
            transcendentals=transcendentals,
            bytes_accessed=bytes_accessed),
    )(x_p, params["w1"], params["b1"], params["w2"], params["b2"],
      params["w4"], params["b4"], w3_p, b3_p)

    return out[:B, :n_actions]


def init_params(key, n_obs, n_actions):
    """Mimic PyTorch Linear default init (U[-1/sqrt(fan_in), +1/sqrt(fan_in)]).

    Weights are stored pre-transposed (in_features, out_features) in bfloat16;
    biases are (1, out_features) in float32.
    """
    dims = [(n_obs, H1), (H1, H2), (H2, H3), (H3, n_actions)]
    names = ["1", "2", "4", "3"]  # layer order used in forward
    params = {}
    for (fan_in, fan_out), name in zip(dims, names):
        key, kw, kb = jax.random.split(key, 3)
        bound = 1.0 / jnp.sqrt(fan_in)
        w = jax.random.uniform(kw, (fan_in, fan_out), jnp.float32, -bound, bound)
        b = jax.random.uniform(kb, (1, fan_out), jnp.float32, -bound, bound)
        params["w" + name] = w.astype(jnp.bfloat16)
        params["b" + name] = b
    return params


def dqn_reference(x, params):
    """Pure-JAX reference with matching bf16-matmul / f32-accumulate numerics."""
    silu = lambda z: z * jax.nn.sigmoid(z)

    def dense(h, w, b):
        return jnp.dot(h.astype(jnp.bfloat16), w,
                       preferred_element_type=jnp.float32) + b

    h = silu(dense(x, params["w1"], params["b1"]))
    h = silu(dense(h, params["w2"], params["b2"]))
    h = silu(dense(h, params["w4"], params["b4"]))
    return dense(h, params["w3"], params["b3"])


if __name__ == "__main__":
    key = jax.random.PRNGKey(0)
    n_obs, n_actions, batch = 16, 4, 8

    key, kp, kx = jax.random.split(key, 3)
    params = init_params(kp, n_obs, n_actions)
    x = jax.random.normal(kx, (batch, n_obs), jnp.float32)

    out = dqn_forward(x, params)        # default block_b=128; B=8 padded up
    out = jax.block_until_ready(out)

    ref = dqn_reference(x, params)
    assert out.shape == (batch, n_actions), out.shape
    max_err = float(jnp.max(jnp.abs(out - ref)))
    assert jnp.allclose(out, ref, atol=1e-2, rtol=1e-2), max_err

    print("KERNEL_OK")
</pallas_src>

<mosaic_0001>
module attributes {stable_mosaic.version = 11 : i64} {
  func.func @dqn_kernel(%arg0: i32, %arg1: memref<128x16xf32, #tpu.memory_space<vmem>>, %arg2: memref<16x256xbf16, #tpu.memory_space<vmem>>, %arg3: memref<1x256xf32, #tpu.memory_space<vmem>>, %arg4: memref<256x1024xbf16, #tpu.memory_space<vmem>>, %arg5: memref<1x1024xf32, #tpu.memory_space<vmem>>, %arg6: memref<1024x512xbf16, #tpu.memory_space<vmem>>, %arg7: memref<1x512xf32, #tpu.memory_space<vmem>>, %arg8: memref<512x128xbf16, #tpu.memory_space<vmem>>, %arg9: memref<1x128xf32, #tpu.memory_space<vmem>>, %arg10: memref<128x128xf32, #tpu.memory_space<vmem>>) attributes {dimension_semantics = [#tpu.dimension_semantics<parallel>], iteration_bounds = array<i64: 1>, scalar_prefetch = 0 : i64, scratch_operands = 0 : i64, tpu.core_type = #tpu.core_type<tc>, window_params = [{transform_indices = @transform_0, window_bounds = array<i64: 128, 16>}, {pipeline_mode = #tpu.pipeline_mode<synchronous>, transform_indices = @transform_1, window_bounds = array<i64: 16, 256>}, {pipeline_mode = #tpu.pipeline_mode<synchronous>, transform_indices = @transform_2, window_bounds = array<i64: 1, 256>}, {pipeline_mode = #tpu.pipeline_mode<synchronous>, transform_indices = @transform_3, window_bounds = array<i64: 256, 1024>}, {pipeline_mode = #tpu.pipeline_mode<synchronous>, transform_indices = @transform_4, window_bounds = array<i64: 1, 1024>}, {pipeline_mode = #tpu.pipeline_mode<synchronous>, transform_indices = @transform_5, window_bounds = array<i64: 1024, 512>}, {pipeline_mode = #tpu.pipeline_mode<synchronous>, transform_indices = @transform_6, window_bounds = array<i64: 1, 512>}, {pipeline_mode = #tpu.pipeline_mode<synchronous>, transform_indices = @transform_7, window_bounds = array<i64: 512, 128>}, {pipeline_mode = #tpu.pipeline_mode<synchronous>, transform_indices = @transform_8, window_bounds = array<i64: 1, 128>}, {transform_indices = @transform_9, window_bounds = array<i64: 128, 128>}]} {
    %c0 = arith.constant 0 : index
    %c0_0 = arith.constant 0 : index
    %0 = vector.load %arg1[%c0, %c0_0] : memref<128x16xf32, #tpu.memory_space<vmem>>, vector<128x16xf32>
    %1 = arith.truncf %0 : vector<128x16xf32> to vector<128x16xbf16>
    %c0_1 = arith.constant 0 : index
    %c0_2 = arith.constant 0 : index
    %2 = vector.load %arg2[%c0_1, %c0_2] : memref<16x256xbf16, #tpu.memory_space<vmem>>, vector<16x256xbf16>
    %cst = arith.constant dense<0.000000e+00> : vector<128x256xf32>
    %3 = tpu.matmul %1, %2, %cst {dimension_numbers = #tpu.dot_dimension_numbers<[1], [0], [0], [1], [0, 0, 1, 1], [], []>} : vector<128x16xbf16>, vector<16x256xbf16>, vector<128x256xf32> -> vector<128x256xf32>
    %c0_3 = arith.constant 0 : index
    %c0_4 = arith.constant 0 : index
    %4 = vector.load %arg3[%c0_3, %c0_4] : memref<1x256xf32, #tpu.memory_space<vmem>>, vector<1x256xf32>
    %5 = vector.broadcast %4 : vector<1x256xf32> to vector<128x256xf32>
    %6 = arith.addf %3, %5 : vector<128x256xf32>
    %cst_5 = arith.constant 0.000000e+00 : f32
    %7 = vector.broadcast %cst_5 : f32 to vector<128x256xf32>
    %8 = arith.subf %7, %6 : vector<128x256xf32>
    %9 = math.exp %8 : vector<128x256xf32>
    %cst_6 = arith.constant 1.000000e+00 : f32
    %10 = vector.broadcast %cst_6 : f32 to vector<128x256xf32>
    %11 = arith.addf %10, %9 : vector<128x256xf32>
    %12 = tpu.reciprocal %11 {approx = true} : vector<128x256xf32> -> vector<128x256xf32>
    %13 = arith.mulf %6, %12 : vector<128x256xf32>
    %14 = arith.truncf %13 : vector<128x256xf32> to vector<128x256xbf16>
    %c0_7 = arith.constant 0 : index
    %c0_8 = arith.constant 0 : index
    %15 = vector.load %arg4[%c0_7, %c0_8] : memref<256x1024xbf16, #tpu.memory_space<vmem>>, vector<256x1024xbf16>
    %cst_9 = arith.constant dense<0.000000e+00> : vector<128x1024xf32>
    %16 = tpu.matmul %14, %15, %cst_9 {dimension_numbers = #tpu.dot_dimension_numbers<[1], [0], [0], [1], [0, 0, 1, 1], [], []>} : vector<128x256xbf16>, vector<256x1024xbf16>, vector<128x1024xf32> -> vector<128x1024xf32>
    %c0_10 = arith.constant 0 : index
    %c0_11 = arith.constant 0 : index
    %17 = vector.load %arg5[%c0_10, %c0_11] : memref<1x1024xf32, #tpu.memory_space<vmem>>, vector<1x1024xf32>
    %18 = vector.broadcast %17 : vector<1x1024xf32> to vector<128x1024xf32>
    %19 = arith.addf %16, %18 : vector<128x1024xf32>
    %cst_12 = arith.constant 0.000000e+00 : f32
    %20 = vector.broadcast %cst_12 : f32 to vector<128x1024xf32>
    %21 = arith.subf %20, %19 : vector<128x1024xf32>
    %22 = math.exp %21 : vector<128x1024xf32>
    %cst_13 = arith.constant 1.000000e+00 : f32
    %23 = vector.broadcast %cst_13 : f32 to vector<128x1024xf32>
    %24 = arith.addf %23, %22 : vector<128x1024xf32>
    %25 = tpu.reciprocal %24 {approx = true} : vector<128x1024xf32> -> vector<128x1024xf32>
    %26 = arith.mulf %19, %25 : vector<128x1024xf32>
    %27 = arith.truncf %26 : vector<128x1024xf32> to vector<128x1024xbf16>
    %c0_14 = arith.constant 0 : index
    %c0_15 = arith.constant 0 : index
    %28 = vector.load %arg6[%c0_14, %c0_15] : memref<1024x512xbf16, #tpu.memory_space<vmem>>, vector<1024x512xbf16>
    %cst_16 = arith.constant dense<0.000000e+00> : vector<128x512xf32>
    %29 = tpu.matmul %27, %28, %cst_16 {dimension_numbers = #tpu.dot_dimension_numbers<[1], [0], [0], [1], [0, 0, 1, 1], [], []>} : vector<128x1024xbf16>, vector<1024x512xbf16>, vector<128x512xf32> -> vector<128x512xf32>
    %c0_17 = arith.constant 0 : index
    %c0_18 = arith.constant 0 : index
    %30 = vector.load %arg7[%c0_17, %c0_18] : memref<1x512xf32, #tpu.memory_space<vmem>>, vector<1x512xf32>
    %31 = vector.broadcast %30 : vector<1x512xf32> to vector<128x512xf32>
    %32 = arith.addf %29, %31 : vector<128x512xf32>
    %cst_19 = arith.constant 0.000000e+00 : f32
    %33 = vector.broadcast %cst_19 : f32 to vector<128x512xf32>
    %34 = arith.subf %33, %32 : vector<128x512xf32>
    %35 = math.exp %34 : vector<128x512xf32>
    %cst_20 = arith.constant 1.000000e+00 : f32
    %36 = vector.broadcast %cst_20 : f32 to vector<128x512xf32>
    %37 = arith.addf %36, %35 : vector<128x512xf32>
    %38 = tpu.reciprocal %37 {approx = true} : vector<128x512xf32> -> vector<128x512xf32>
    %39 = arith.mulf %32, %38 : vector<128x512xf32>
    %40 = arith.truncf %39 : vector<128x512xf32> to vector<128x512xbf16>
    %c0_21 = arith.constant 0 : index
    %c0_22 = arith.constant 0 : index
    %41 = vector.load %arg8[%c0_21, %c0_22] : memref<512x128xbf16, #tpu.memory_space<vmem>>, vector<512x128xbf16>
    %cst_23 = arith.constant dense<0.000000e+00> : vector<128x128xf32>
    %42 = tpu.matmul %40, %41, %cst_23 {dimension_numbers = #tpu.dot_dimension_numbers<[1], [0], [0], [1], [0, 0, 1, 1], [], []>} : vector<128x512xbf16>, vector<512x128xbf16>, vector<128x128xf32> -> vector<128x128xf32>
    %c0_24 = arith.constant 0 : index
    %c0_25 = arith.constant 0 : index
    %43 = vector.load %arg9[%c0_24, %c0_25] : memref<1x128xf32, #tpu.memory_space<vmem>>, vector<1x128xf32>
    %44 = vector.broadcast %43 : vector<1x128xf32> to vector<128x128xf32>
    %45 = arith.addf %42, %44 : vector<128x128xf32>
    %c0_26 = arith.constant 0 : index
    %c0_27 = arith.constant 0 : index
    %46 = vector.load %arg10[%c0_26, %c0_27] : memref<128x128xf32, #tpu.memory_space<vmem>>, vector<128x128xf32>
    tpu.vector_store %arg10[%c0_26, %c0_27], %45 {strides = array<i32>} : memref<128x128xf32, #tpu.memory_space<vmem>>, vector<128x128xf32>,
    return
  }
  func.func @transform_0(%arg0: i32) -> (i32, i32) {
    %c0_i32 = arith.constant 0 : i32
    %c0_i32_0 = arith.constant 0 : i32
    return %arg0, %c0_i32 : i32, i32
  }
  func.func @transform_1(%arg0: i32) -> (i32, i32) {
    %c0_i32 = arith.constant 0 : i32
    %c0_i32_0 = arith.constant 0 : i32
    %c0_i32_1 = arith.constant 0 : i32
    return %c0_i32, %c0_i32_0 : i32, i32
  }
  func.func @transform_2(%arg0: i32) -> (i32, i32) {
    %c0_i32 = arith.constant 0 : i32
    %c0_i32_0 = arith.constant 0 : i32
    %c0_i32_1 = arith.constant 0 : i32
    return %c0_i32, %c0_i32_0 : i32, i32
  }
  func.func @transform_3(%arg0: i32) -> (i32, i32) {
    %c0_i32 = arith.constant 0 : i32
    %c0_i32_0 = arith.constant 0 : i32
    %c0_i32_1 = arith.constant 0 : i32
    return %c0_i32, %c0_i32_0 : i32, i32
  }
  func.func @transform_4(%arg0: i32) -> (i32, i32) {
    %c0_i32 = arith.constant 0 : i32
    %c0_i32_0 = arith.constant 0 : i32
    %c0_i32_1 = arith.constant 0 : i32
    return %c0_i32, %c0_i32_0 : i32, i32
  }
  func.func @transform_5(%arg0: i32) -> (i32, i32) {
    %c0_i32 = arith.constant 0 : i32
    %c0_i32_0 = arith.constant 0 : i32
    %c0_i32_1 = arith.constant 0 : i32
    return %c0_i32, %c0_i32_0 : i32, i32
  }
  func.func @transform_6(%arg0: i32) -> (i32, i32) {
    %c0_i32 = arith.constant 0 : i32
    %c0_i32_0 = arith.constant 0 : i32
    %c0_i32_1 = arith.constant 0 : i32
    return %c0_i32, %c0_i32_0 : i32, i32
  }
  func.func @transform_7(%arg0: i32) -> (i32, i32) {
    %c0_i32 = arith.constant 0 : i32
    %c0_i32_0 = arith.constant 0 : i32
    %c0_i32_1 = arith.constant 0 : i32
    return %c0_i32, %c0_i32_0 : i32, i32
  }
  func.func @transform_8(%arg0: i32) -> (i32, i32) {
    %c0_i32 = arith.constant 0 : i32
    %c0_i32_0 = arith.constant 0 : i32
    %c0_i32_1 = arith.constant 0 : i32
    return %c0_i32, %c0_i32_0 : i32, i32
  }
  func.func @transform_9(%arg0: i32) -> (i32, i32) {
    %c0_i32 = arith.constant 0 : i32
    %c0_i32_0 = arith.constant 0 : i32
    return %arg0, %c0_i32 : i32, i32
  }
}

</mosaic_0001>

<bundles_post_ra>
// kernel: dqn_forward.1
= control target key start
LH: loop header
LB: loop body
LE: loop exit
PB: predicated region body
PF: predicated region fallthrough
CT: control target
= control target key end

     0   :  { %14 = vsyncpa [#allocation3], 0  ;;  %s10537_s0 = inlined_call_operand.vmem [shape: f32[128,16], index: 0, kind: input, shape index: {}]   ;;  %s10538_s1 = inlined_call_operand.vmem [shape: bf16[16,256], index: 1, kind: input, shape index: {}]   ;;  %s10539_s2 = inlined_call_operand.vmem [shape: f32[1,256], index: 2, kind: input, shape index: {}]   ;;  %s10540_s3 = inlined_call_operand.hbm [shape: bf16[256,1024], index: 3, kind: input, shape index: {}]   ;;  %s10541_s4 = inlined_call_operand.vmem [shape: f32[1,1024], index: 4, kind: input, shape index: {}]   ;;  %s10542_s5 = inlined_call_operand.hbm [shape: bf16[1024,512], index: 5, kind: input, shape index: {}]   ;;  %s10543_s6 = inlined_call_operand.vmem [shape: f32[1,512], index: 6, kind: input, shape index: {}]   ;;  %s10544_s7 = inlined_call_operand.vmem [shape: bf16[512,128], index: 7, kind: input, shape index: {}]   ;;  %s10545_s8 = inlined_call_operand.vmem [shape: f32[1,128], index: 8, kind: input, shape index: {}]   ;;  %s10546_s9 = inlined_call_operand.vmem [shape: f32[128,128], index: 9, kind: output, shape index: {}]  }
   0x1   :  { %15 = vsyncpa [#allocation5], 0  ;;  %s7828_s30 = smov [#allocation2]  }
   0x2   :  { %s27_s10 = sshll.u32 %s7828_s30, 4  ;;  %s28_s10 = int_to_ptr.vmem [resolvable:$true] %s27_s10 }
   0x3   :  { %s7792_s11 = scalar_lea.vmem %s28_s10, 16384  ;;  %p7797_p1 = scmp.lt.s32.totalorder %s28_s10, %s28_s10 }
   0x4   :  { %p7793_p0 = scmp.ne.s32.totalorder %s28_s10, %s7792_s11  ;;  %p7798_p2 = scmp.lt.s32.totalorder %s7792_s11, %s7792_s11 }
   0x6   :  { %p7799_p3 = por %p7798_p2, %p7797_p1 }
   0x8   :  { %p7800_p4 = pnand %p7799_p3, %p7793_p0 }
   0xa   :  { %7803 = shalt.err (!%p7800_p4)
}
   0xb   :  { %s7829_s12 = smov 512   ;;  %s7830_s13 = smov 32  }
   0xc   :  { %33 = dma.hbm_to_vmem [thread:$0]  %s10540_s3, 16384, %s28_s10, [#allocation3], %s7829_s12, %s7829_s12, %s7830_s13  }
   0xd   :  { %s7831_s16 = smov [#allocation4]  }
   0xe   :  { %s41_s17 = sshll.u32 %s7831_s16, 4  ;;  %s42_s17 = int_to_ptr.vmem [resolvable:$true] %s41_s17 }
   0xf   :  { %s7812_s18 = scalar_lea.vmem %s42_s17, 32768  ;;  %p7817_p6 = scmp.lt.s32.totalorder %s42_s17, %s42_s17 }
  0x10   :  { %p7813_p5 = scmp.ne.s32.totalorder %s42_s17, %s7812_s18  ;;  %p7818_p7 = scmp.lt.s32.totalorder %s7812_s18, %s7812_s18 }
  0x12   :  { %p7819_p8 = por %p7818_p7, %p7817_p6 }
  0x14   :  { %p7820_p9 = pnand %p7819_p8, %p7813_p5 }
  0x16   :  { %7823 = shalt.err (!%p7820_p9)
}
  0x17   :  { %s7832_s19 = smov 256   ;;  %s7833_s20 = smov 16  }
  0x18   :  { %47 = dma.hbm_to_vmem [thread:$0]  %s10542_s5, 32768, %s42_s17, [#allocation5], %s7832_s19, %s7832_s19, %s7833_s20  }
  0x19   :  { %7824 = dma.done.wait [#allocation3], 16384  }
  0x1a   :  { %7825 = vsyncadd [#allocation3], 4294950912 }
  0x1b   :  { %7826 = dma.done.wait [#allocation5], 32768  }
  0x1c   :  { %7827 = vsyncadd [#allocation5], 4294934528  ;;  %v7834_v0 = vmov 0   ;;  %v6468_v1 = vld [vmem:[%s10538_s1 + $0x4] ss:$8 sps:$4 sm:$0xff]   ;;  %vm109_vm0 = vcmask 130048  }
  0x1d   :  { %166 = vmatprep.mubr.bf16.mxu0 %v7834_v0  ;;  %v6470_v2 = vld [vmem:[%s10538_s1] ss:$8 sps:$4 sm:$0xff]   ;;  %148 = vmatprep.subr.bf16.mxu0 %v6468_v1  ;;  %v63_v6 = vld [vmem:[%s10537_s0 + $0x10] sm:$0xff]  ;;  %v64_v7 = vld [vmem:[%s10537_s0 + $0x18] sm:$0xff] }
  0x1e   :  { %v61_v3 = vld [vmem:[%s10537_s0] sm:$0xff]  ;;  %v62_v4 = vld [vmem:[%s10537_s0 + $0x8] sm:$0xff]  ;;  %149 = vmatpush1.bf16.msra.mxu0 %v6470_v2  ;;  %v78_v23 = vpack.c.bf16 %v64_v7, %v63_v6  ;;  %v67_v47 = vld [vmem:[%s10537_s0 + $0x30] sm:$0xff] }
  0x1f   :  { %v77_v5 = vpack.c.bf16 %v62_v4, %v61_v3  ;;  %v511_v8 = vld [vmem:[#allocation2 + $0x1c0] sm:$0xff]  ;;  %v512_v10 = vld [vmem:[#allocation2 + $0x1c8] sm:$0xff]  ;;  %v68_v48 = vld [vmem:[%s10537_s0 + $0x38] sm:$0xff] }
  0x20   :  { %v515_v9 = vld [vmem:[#allocation2 + $0x1e0] sm:$0xff]  ;;  %v516_v11 = vld [vmem:[#allocation2 + $0x1e8] sm:$0xff]  ;;  %v80_v49 = vpack.c.bf16 %v68_v48, %v67_v47  ;;  %v71_v53 = vld [vmem:[%s10537_s0 + $0x50] sm:$0xff] }
  0x21   :  { %5908 = vmatmul.mubr.msk.bf16.vlgmr.msra.gmra.mxu0 %vm109_vm0, %v77_v5  ;;  %v5973_v12 = vcombine.high %v511_v8, %v515_v9  ;;  %v5972_v13 = vcombine.low %v511_v8, %v515_v9  ;;  %v5974_v14 = vcombine.low %v512_v10, %v516_v11  ;;  %v5975_v15 = vcombine.high %v512_v10, %v516_v11  ;;  %v503_v16 = vld [vmem:[#allocation2 + $0x180] sm:$0xff]  ;;  %v504_v18 = vld [vmem:[#allocation2 + $0x188] sm:$0xff]  ;;  %v72_v54 = vld [vmem:[%s10537_s0 + $0x58] sm:$0xff] }
  0x22   :  { %176 = vmatprep.mubr.bf16.mxu0 %v7834_v0  ;;  %v507_v17 = vld [vmem:[#allocation2 + $0x1a0] sm:$0xff]  ;;  %v508_v20 = vld [vmem:[#allocation2 + $0x1a8] sm:$0xff]  ;;  %v82_v55 = vpack.c.bf16 %v72_v54, %v71_v53  ;;  %v75_v59 = vld [vmem:[%s10537_s0 + $0x70] sm:$0xff] }
  0x23   :  { %v5965_v19 = vcombine.high %v503_v16, %v507_v17  ;;  %v495_v21 = vld [vmem:[#allocation2 + $0x140] sm:$0xff]  ;;  %1265 = vmatprep.subr.bf16.mxu1 %v5973_v12  ;;  %1378 = vmatprep.subr.bf16.mxu0 %v5975_v15  ;;  %v5967_v24 = vcombine.high %v504_v18, %v508_v20  ;;  %v496_v25 = vld [vmem:[#allocation2 + $0x148] sm:$0xff]  ;;  %v5964_v27 = vcombine.low %v503_v16, %v507_v17  ;;  %v76_v60 = vld [vmem:[%s10537_s0 + $0x78] sm:$0xff] }
  0x24   :  { %v499_v22 = vld [vmem:[#allocation2 + $0x160] sm:$0xff]  ;;  %v500_v26 = vld [vmem:[#allocation2 + $0x168] sm:$0xff]  ;;  %1266 = vmatpush1.bf16.msra.mxu1 %v5972_v13  ;;  %1379 = vmatpush1.bf16.msra.mxu0 %v5974_v14  ;;  %v5966_v29 = vcombine.low %v504_v18, %v508_v20  ;;  %v84_v61 = vpack.c.bf16 %v76_v60, %v75_v59 }
  0x25   :  { %v487_v28 = vld [vmem:[#allocation2 + $0x100] sm:$0xff]  ;;  %1267 = vmatprep.subr.bf16.mxu1 %v5965_v19  ;;  %1380 = vmatprep.subr.bf16.mxu0 %v5967_v24  ;;  %v5957_v30 = vcombine.high %v495_v21, %v499_v22  ;;  %v488_v32 = vld [vmem:[#allocation2 + $0x108] sm:$0xff]  ;;  %v5959_v36 = vcombine.high %v496_v25, %v500_v26  ;;  %v5956_v37 = vcombine.low %v495_v21, %v499_v22 }
  0x26   :  { %v491_v31 = vld [vmem:[#allocation2 + $0x120] sm:$0xff]  ;;  %v492_v33 = vld [vmem:[#allocation2 + $0x128] sm:$0xff]  ;;  %v5958_v40 = vcombine.low %v496_v25, %v500_v26 }
  0x27   :  { %v65_v34 = vld [vmem:[%s10537_s0 + $0x20] sm:$0xff]  ;;  %v66_v35 = vld [vmem:[%s10537_s0 + $0x28] sm:$0xff]  ;;  %v5949_v41 = vcombine.high %v487_v28, %v491_v31  ;;  %v5951_v42 = vcombine.high %v488_v32, %v492_v33  ;;  %v5948_v44 = vcombine.low %v487_v28, %v491_v31  ;;  %v5950_v45 = vcombine.low %v488_v32, %v492_v33 }
  0x28   :  { %1268 = vmatpush1.bf16.msra.mxu1 %v5964_v27  ;;  %v479_v38 = vld [vmem:[#allocation2 + $0xc0] sm:$0xff]  ;;  %1381 = vmatpush1.bf16.msra.mxu0 %v5966_v29  ;;  %v79_v43 = vpack.c.bf16 %v66_v35, %v65_v34  ;;  %v70_v51 = vld [vmem:[%s10537_s0 + $0x48] sm:$0xff] }
  0x29   :  { %5909 = vmatmul.mubr.msk.bf16.gmra.mxu0 %vm109_vm0, %v78_v23  ;;  %v483_v39 = vld [vmem:[#allocation2 + $0xe0] sm:$0xff]  ;;  %1269 = vmatprep.subr.bf16.mxu1 %v5957_v30  ;;  %v74_v57 = vld [vmem:[%s10537_s0 + $0x68] sm:$0xff] }
  0x2a   :  { %186 = vmatprep.mubr.bf16.mxu0 %v7834_v0  ;;  %1382 = vmatprep.subr.bf16.mxu0 %v5959_v36  ;;  %v5941_v46 = vcombine.high %v479_v38, %v483_v39  ;;  %v69_v50 = vld [vmem:[%s10537_s0 + $0x40] sm:$0xff]  ;;  %v480_v62 = vld [vmem:[#allocation2 + $0xc8] sm:$0xff]  ;;  %v5940_v2 = vcombine.low %v479_v38, %v483_v39 }
  0x2b   :  { %v81_v52 = vpack.c.bf16 %v70_v51, %v69_v50  ;;  %v73_v56 = vld [vmem:[%s10537_s0 + $0x60] sm:$0xff]  ;;  %v484_v63 = vld [vmem:[#allocation2 + $0xe8] sm:$0xff] }
  0x2c   :  { %1270 = vmatpush1.bf16.msra.mxu1 %v5956_v37  ;;  %1383 = vmatpush1.bf16.msra.mxu0 %v5958_v40  ;;  %v83_v58 = vpack.c.bf16 %v74_v57, %v73_v56  ;;  %v5943_v1 = vcombine.high %v480_v62, %v484_v63  ;;  %v5942_v3 = vcombine.low %v480_v62, %v484_v63  ;;  %v471_v4 = vld [vmem:[#allocation2 + $0x80] sm:$0xff]  ;;  %v472_v6 = vld [vmem:[#allocation2 + $0x88] sm:$0xff] }
  0x2d   :  { %1271 = vmatprep.subr.bf16.mxu1 %v5949_v41  ;;  %1384 = vmatprep.subr.bf16.mxu0 %v5951_v42  ;;  %v475_v5 = vld [vmem:[#allocation2 + $0xa0] sm:$0xff]  ;;  %v476_v8 = vld [vmem:[#allocation2 + $0xa8] sm:$0xff] }
  0x2e   :  { %v5933_v7 = vcombine.high %v471_v4, %v475_v5  ;;  %v5932_v9 = vcombine.low %v471_v4, %v475_v5  ;;  %v5934_v10 = vcombine.low %v472_v6, %v476_v8  ;;  %v5935_v11 = vcombine.high %v472_v6, %v476_v8  ;;  %v467_v12 = vld [vmem:[#allocation2 + $0x60] sm:$0xff]  ;;  %v464_v13 = vld [vmem:[#allocation2 + $0x48] sm:$0xff] }
  0x2f   :  { %v468_v15 = vld [vmem:[#allocation2 + $0x68] sm:$0xff]  ;;  %v455_v19 = vld [vmem:[#allocation2] sm:$0xff] }
  0x30   :  { %1272 = vmatpush1.bf16.msra.mxu1 %v5948_v44  ;;  %1385 = vmatpush1.bf16.msra.mxu0 %v5950_v45  ;;  %v5926_v17 = vcombine.low %v464_v13, %v468_v15  ;;  %v5927_v18 = vcombine.high %v464_v13, %v468_v15  ;;  %v459_v20 = vld [vmem:[#allocation2 + $0x20] sm:$0xff]  ;;  %v456_v21 = vld [vmem:[#allocation2 + $0x8] sm:$0xff] }
  0x31   :  { %5910 = vmatmul.mubr.msk.bf16.gmra.mxu0 %vm109_vm0, %v79_v43  ;;  %1273 = vmatprep.subr.bf16.mxu1 %v5941_v46  ;;  %v5917_v22 = vcombine.high %v455_v19, %v459_v20  ;;  %v460_v23 = vld [vmem:[#allocation2 + $0x28] sm:$0xff]  ;;  %v5916_v24 = vcombine.low %v455_v19, %v459_v20  ;;  %v575_v27 = vld [vmem:[#allocation2 + $0x3c0] sm:$0xff] }
  0x32   :  { %196 = vmatprep.mubr.bf16.mxu0 %v7834_v0  ;;  %1386 = vmatprep.subr.bf16.mxu0 %v5943_v1  ;;  %v5918_v25 = vcombine.low %v456_v21, %v460_v23  ;;  %v5919_v26 = vcombine.high %v456_v21, %v460_v23  ;;  %v579_v28 = vld [vmem:[#allocation2 + $0x3e0] sm:$0xff]  ;;  %v576_v30 = vld [vmem:[#allocation2 + $0x3c8] sm:$0xff] }
  0x33   :  { %v6037_v29 = vcombine.high %v575_v27, %v579_v28  ;;  %v580_v31 = vld [vmem:[#allocation2 + $0x3e8] sm:$0xff]  ;;  %v6036_v33 = vcombine.low %v575_v27, %v579_v28  ;;  %v567_v35 = vld [vmem:[#allocation2 + $0x380] sm:$0xff]  ;;  %v7961_v27 = vld [vmem:[#allocation2 + $0x1d0] sm:$0xff] }
  0x34   :  { %1274 = vmatpush1.bf16.msra.mxu1 %v5940_v2  ;;  %1387 = vmatpush1.bf16.msra.mxu0 %v5942_v3  ;;  %v6039_v32 = vcombine.high %v576_v30, %v580_v31  ;;  %v6038_v34 = vcombine.low %v576_v30, %v580_v31  ;;  %v571_v36 = vld [vmem:[#allocation2 + $0x3a0] sm:$0xff]  ;;  %v568_v37 = vld [vmem:[#allocation2 + $0x388] sm:$0xff]  ;;  %v7963_v28 = vld [vmem:[#allocation2 + $0x1f0] sm:$0xff] }
  0x35   :  { %1275 = vmatprep.subr.bf16.mxu1 %v5933_v7  ;;  %1388 = vmatprep.subr.bf16.mxu0 %v5935_v11  ;;  %v6029_v38 = vcombine.high %v567_v35, %v571_v36  ;;  %v572_v39 = vld [vmem:[#allocation2 + $0x3a8] sm:$0xff]  ;;  %v6028_v40 = vcombine.low %v567_v35, %v571_v36  ;;  %v559_v43 = vld [vmem:[#allocation2 + $0x340] sm:$0xff]  ;;  %v5977_v30 = vcombine.high %v7961_v27, %v7963_v28  ;;  %v7969_v31 = vld [vmem:[#allocation2 + $0x1f8] sm:$0xff]  ;;  %v89_v35 = vlaneseq }
  0x36   :  { %v6030_v41 = vcombine.low %v568_v37, %v572_v39  ;;  %v6031_v42 = vcombine.high %v568_v37, %v572_v39  ;;  %v563_v44 = vld [vmem:[#allocation2 + $0x360] sm:$0xff]  ;;  %v560_v45 = vld [vmem:[#allocation2 + $0x348] sm:$0xff] }
  0x37   :  { %v6021_v46 = vcombine.high %v559_v43, %v563_v44  ;;  %v564_v47 = vld [vmem:[#allocation2 + $0x368] sm:$0xff]  ;;  %v6020_v48 = vcombine.low %v559_v43, %v563_v44  ;;  %v551_v51 = vld [vmem:[#allocation2 + $0x300] sm:$0xff]  ;;  %v7977_v36 = vshrl.u32 %v89_v35, 7 }
  0x38   :  { %1276 = vmatpush1.bf16.msra.mxu1 %v5932_v9  ;;  %1389 = vmatpush1.bf16.msra.mxu0 %v5934_v10  ;;  %v6023_v50 = vcombine.high %v560_v45, %v564_v47  ;;  %v552_v53 = vld [vmem:[#allocation2 + $0x308] sm:$0xff]  ;;  %v543_v59 = vld [vmem:[#allocation2 + $0x2c0] sm:$0xff] }
  0x39   :  { %5911 = vmatmul.mubr.msk.bf16.gmra.mxu0 %vm109_vm0, %v80_v49  ;;  %1390 = vmatprep.subr.bf16.mxu0 %v5927_v18  ;;  %v6022_v49 = vcombine.low %v560_v45, %v564_v47  ;;  %v547_v60 = vld [vmem:[#allocation2 + $0x2e0] sm:$0xff]  ;;  %v544_v62 = vld [vmem:[#allocation2 + $0x2c8] sm:$0xff]  ;;  %10636 = vst [vmem:[#allocation8_spill] sm:$0xff] %v7977_v36  ;;  %v7980_v37 = vsub.s32 0, %v7977_v36  ;;  %v7986_v39 = vsub.s32 1, %v7977_v36 }
  0x3a   :  { %206 = vmatprep.mubr.bf16.mxu0 %v7834_v0  ;;  %v548_v63 = vld [vmem:[#allocation2 + $0x2e8] sm:$0xff]  ;;  %v6004_v2 = vcombine.low %v543_v59, %v547_v60  ;;  %v535_v4 = vld [vmem:[#allocation2 + $0x280] sm:$0xff] }
  0x3b   :  { %v6007_v1 = vcombine.high %v544_v62, %v548_v63  ;;  %v6006_v3 = vcombine.low %v544_v62, %v548_v63  ;;  %v539_v5 = vld [vmem:[#allocation2 + $0x2a0] sm:$0xff]  ;;  %v536_v6 = vld [vmem:[#allocation2 + $0x288] sm:$0xff]  ;;  %10637 = vst [vmem:[#allocation9_spill] sm:$0xff] %v7980_v37  ;;  %10638 = vst [vmem:[#allocation10_spill] sm:$0xff] %v7986_v39 }
  0x3c   :  { %1391 = vmatpush1.bf16.msra.mxu0 %v5926_v17  ;;  %v5997_v7 = vcombine.high %v535_v4, %v539_v5  ;;  %v540_v8 = vld [vmem:[#allocation2 + $0x2a8] sm:$0xff]  ;;  %v5996_v9 = vcombine.low %v535_v4, %v539_v5  ;;  %v519_v19 = vld [vmem:[#allocation2 + $0x200] sm:$0xff] }
  0x3d   :  { %1392 = vmatprep.subr.bf16.mxu0 %v5919_v26  ;;  %v5998_v10 = vcombine.low %v536_v6, %v540_v8  ;;  %v5999_v11 = vcombine.high %v536_v6, %v540_v8  ;;  %v528_v13 = vld [vmem:[#allocation2 + $0x248] sm:$0xff]  ;;  %v523_v20 = vld [vmem:[#allocation2 + $0x220] sm:$0xff] }
  0x3e   :  { %v532_v15 = vld [vmem:[#allocation2 + $0x268] sm:$0xff] }
  0x3f   :  { %v5990_v17 = vcombine.low %v528_v13, %v532_v15  ;;  %v5991_v18 = vcombine.high %v528_v13, %v532_v15  ;;  %v520_v21 = vld [vmem:[#allocation2 + $0x208] sm:$0xff] }
  0x40   :  { %1393 = vmatpush1.bf16.msra.mxu0 %v5918_v25  ;;  %v524_v23 = vld [vmem:[#allocation2 + $0x228] sm:$0xff] }
  0x41   :  { %5912 = vmatmul.mubr.msk.bf16.gmra.mxu0 %vm109_vm0, %v81_v52  ;;  %1394 = vmatprep.subr.bf16.mxu0 %v6039_v32  ;;  %v555_v52 = vld [vmem:[#allocation2 + $0x320] sm:$0xff]  ;;  %v5982_v25 = vcombine.low %v520_v21, %v524_v23  ;;  %v5983_v26 = vcombine.high %v520_v21, %v524_v23 }
  0x42   :  { %216 = vmatprep.mubr.bf16.mxu0 %v7834_v0  ;;  %v6013_v54 = vcombine.high %v551_v51, %v555_v52  ;;  %v6012_v56 = vcombine.low %v551_v51, %v555_v52 }
  0x44   :  { %1395 = vmatpush2.bf16.msra.mxu0 %v6038_v34 }
  0x45   :  { %1396 = vmatprep.subr.bf16.mxu0 %v6031_v42 }
  0x48   :  { %1397 = vmatpush2.bf16.msra.mxu0 %v6030_v41 }
  0x49   :  { %5913 = vmatmul.mubr.msk.bf16.gmra.mxu0 %vm109_vm0, %v82_v55  ;;  %1398 = vmatprep.subr.bf16.mxu0 %v6023_v50  ;;  %v556_v55 = vld [vmem:[#allocation2 + $0x328] sm:$0xff] }
  0x4a   :  { %226 = vmatprep.mubr.bf16.mxu0 %v7834_v0  ;;  %v6014_v57 = vcombine.low %v552_v53, %v556_v55 }
  0x4c   :  { %1399 = vmatpush2.bf16.msra.mxu0 %v6022_v49 }
  0x51   :  { %5914 = vmatmul.mubr.msk.bf16.gmra.mxu0 %vm109_vm0, %v83_v58  ;;  %v6015_v58 = vcombine.high %v552_v53, %v556_v55 }
  0x52   :  { %236 = vmatprep.mubr.bf16.mxu0 %v7834_v0  ;;  %v463_v0 = vld [vmem:[#allocation2 + $0x40] sm:$0xff] }
  0x53   :  { %v5925_v14 = vcombine.high %v463_v0, %v467_v12  ;;  %v5924_v16 = vcombine.low %v463_v0, %v467_v12  ;;  %1400 = vmatprep.subr.bf16.mxu0 %v6015_v58  ;;  %v527_v0 = vld [vmem:[#allocation2 + $0x240] sm:$0xff] }
  0x54   :  { %1401 = vmatpush2.bf16.msra.mxu0 %v6014_v57  ;;  %v531_v12 = vld [vmem:[#allocation2 + $0x260] sm:$0xff] }
  0x55   :  { %1277 = vmatprep.subr.bf16.mxu1 %v5925_v14  ;;  %1402 = vmatprep.subr.bf16.mxu0 %v6007_v1  ;;  %v5989_v14 = vcombine.high %v527_v0, %v531_v12 }
  0x56   :  { %1278 = vmatpush1.bf16.msra.mxu1 %v5924_v16  ;;  %v5988_v16 = vcombine.low %v527_v0, %v531_v12 }
  0x57   :  { %1279 = vmatprep.subr.bf16.mxu1 %v5917_v22  ;;  %v5981_v22 = vcombine.high %v519_v19, %v523_v20 }
  0x58   :  { %1403 = vmatpush2.bf16.msra.mxu0 %v6006_v3 }
  0x59   :  { %5915 = vmatmul.mubr.msk.bf16.gmra.mxu0 %vm109_vm0, %v84_v61  ;;  %v6005_v61 = vcombine.high %v543_v59, %v547_v60  ;;  %1404 = vmatprep.subr.bf16.mxu0 %v5999_v11 }
  0x5a   :  { %1280 = vmatpush1.bf16.msra.mxu1 %v5916_v24  ;;  %v5980_v24 = vcombine.low %v519_v19, %v523_v20 }
  0x5b   :  { %1281 = vmatprep.subr.bf16.mxu1 %v6037_v29  ;;  %v7965_v29 = vld [vmem:[#allocation2 + $0x1d8] sm:$0xff] }
  0x5c   :  { %1405 = vmatpush2.bf16.msra.mxu0 %v5998_v10  ;;  %v5979_v34 = vcombine.high %v7965_v29, %v7969_v31 }
  0x5d   :  { %1406 = vmatprep.subr.bf16.mxu0 %v5991_v18 }
  0x5e   :  { %1282 = vmatpush2.bf16.msra.mxu1 %v6036_v33 }
  0x5f   :  { %1283 = vmatprep.subr.bf16.mxu1 %v6029_v38  ;;  %v87_v38 = vld [vmem:[%s10539_s2] sm:$0x3] }
  0x60   :  { %1407 = vmatpush2.bf16.msra.mxu0 %v5990_v17  ;;  %v7992_v41 = vrot.slane %v87_v38, %v7986_v39 }
  0x61   :  { %1408 = vmatprep.subr.bf16.mxu0 %v5983_v26 }
  0x62   :  { %1284 = vmatpush2.bf16.msra.mxu1 %v6028_v40  ;;  %v7989_v40 = vrot.slane %v87_v38, %v7980_v37 }
  0x63   :  { %1285 = vmatprep.subr.bf16.mxu1 %v6021_v46 }
  0x64   :  { %1409 = vmatpush2.bf16.msra.mxu0 %v5982_v25 }
  0x65   :  { %1604 = vmatprep.subr.bf16.mxu0 %v5979_v34 }
  0x66   :  { %1286 = vmatpush2.bf16.msra.mxu1 %v6020_v48 }
  0x67   :  { %1287 = vmatprep.subr.bf16.mxu1 %v6013_v54 }
  0x6a   :  { %1288 = vmatpush2.bf16.msra.mxu1 %v6012_v56 }
  0x6b   :  { %1289 = vmatprep.subr.bf16.mxu1 %v6005_v61 }
  0x6e   :  { %1290 = vmatpush2.bf16.msra.mxu1 %v6004_v2 }
  0x6f   :  { %1291 = vmatprep.subr.bf16.mxu1 %v5997_v7 }
  0x72   :  { %1292 = vmatpush2.bf16.msra.mxu1 %v5996_v9 }
  0x73   :  { %1293 = vmatprep.subr.bf16.mxu1 %v5989_v14 }
  0x76   :  { %1294 = vmatpush2.bf16.msra.mxu1 %v5988_v16 }
  0x77   :  { %1295 = vmatprep.subr.bf16.mxu1 %v5981_v22 }
  0x7a   :  { %1296 = vmatpush2.bf16.msra.mxu1 %v5980_v24 }
  0x7b   :  { %1491 = vmatprep.subr.bf16.mxu1 %v5977_v30 }
  0xe1   :  { %v168_v42 = vpop.f32.mrf.mxu0 }
  0xe2   :  { %v7995_v43 = vadd.f32 %v168_v42, %v7989_v40 }
  0xe3   :  { %v170_v44 = vpop.f32.mrf.mxu0 }
  0xe4   :  { %v247_v45 = vsub.f32 0.0, %v7995_v43  ;;  %v7999_v46 = vadd.f32 %v170_v44, %v7992_v41 }
  0xe5   :  { %v172_v47 = vpop.f32.mrf.mxu0 }
  0xe6   :  { %v279_v48 = vmul.f32 1.442695, %v247_v45  ;;  %v248_v49 = vsub.f32 0.0, %v7999_v46  ;;  %v8003_v50 = vadd.f32 %v172_v47, %v7989_v40 }
  0xe7   :  { %v174_v51 = vpop.f32.mrf.mxu0 }
  0xe8   :  { %6887 = vpow2.f32 %v279_v48  ;;  %v281_v52 = vmul.f32 1.442695, %v248_v49  ;;  %v249_v53 = vsub.f32 0.0, %v8003_v50  ;;  %v8007_v54 = vadd.f32 %v174_v51, %v7992_v41 }
  0xe9   :  { %v178_v55 = vpop.f32.mrf.mxu0 }
  0xea   :  { %6889 = vpow2.f32 %v281_v52  ;;  %v283_v56 = vmul.f32 1.442695, %v249_v53  ;;  %v250_v57 = vsub.f32 0.0, %v8007_v54  ;;  %v8011_v58 = vadd.f32 %v178_v55, %v7989_v40  ;;  %v8046_v52 = vld [vmem:[#allocation2 + $0x190] sm:$0xff] }
  0xeb   :  { %v180_v59 = vpop.f32.mrf.mxu0  ;;  %v8048_v53 = vld [vmem:[#allocation2 + $0x1b0] sm:$0xff] }
  0xec   :  { %6891 = vpow2.f32 %v283_v56  ;;  %v285_v60 = vmul.f32 1.442695, %v250_v57  ;;  %v251_v61 = vsub.f32 0.0, %v8011_v58  ;;  %v8015_v62 = vadd.f32 %v180_v59, %v7992_v41 }
  0xed   :  { %v182_v63 = vpop.f32.mrf.mxu0 }
  0xee   :  { %6893 = vpow2.f32 %v285_v60  ;;  %v287_v1 = vmul.f32 1.442695, %v251_v61  ;;  %v252_v2 = vsub.f32 0.0, %v8015_v62  ;;  %v8019_v3 = vadd.f32 %v182_v63, %v7989_v40  ;;  %v8056_v63 = vld [vmem:[#allocation2 + $0x198] sm:$0xff] }
  0xef   :  { %v184_v4 = vpop.f32.mrf.mxu0 }
  0xf0   :  { %6895 = vpow2.f32 %v287_v1  ;;  %v289_v5 = vmul.f32 1.442695, %v252_v2  ;;  %v253_v6 = vsub.f32 0.0, %v8019_v3  ;;  %v8023_v7 = vadd.f32 %v184_v4, %v7992_v41  ;;  %v8058_v1 = vld [vmem:[#allocation2 + $0x1b8] sm:$0xff] }
  0xf1   :  { %v188_v8 = vpop.f32.mrf.mxu0 }
  0xf2   :  { %6897 = vpow2.f32 %v289_v5  ;;  %v291_v9 = vmul.f32 1.442695, %v253_v6  ;;  %v254_v10 = vsub.f32 0.0, %v8023_v7  ;;  %v8027_v11 = vadd.f32 %v188_v8, %v7989_v40 }
  0xf3   :  { %v190_v0 = vpop.f32.mrf.mxu0 }
  0xf4   :  { %6899 = vpow2.f32 %v291_v9  ;;  %v293_v12 = vmul.f32 1.442695, %v254_v10  ;;  %v255_v13 = vsub.f32 0.0, %v8027_v11  ;;  %v8031_v14 = vadd.f32 %v190_v0, %v7992_v41 }
  0xf5   :  { %v6888_v15 = vpop.eup %6887  ;;  %v192_v16 = vpop.f32.mrf.mxu0 }
  0xf6   :  { %v343_v17 = vadd.f32 1.0, %v6888_v15  ;;  %6901 = vpow2.f32 %v293_v12  ;;  %v295_v18 = vmul.f32 1.442695, %v255_v13  ;;  %v256_v19 = vsub.f32 0.0, %v8031_v14  ;;  %v8069_v12 = vld [vmem:[#allocation2 + $0x150] sm:$0xff] }
  0xf7   :  { %v6890_v20 = vpop.eup %6889  ;;  %v8035_v21 = vadd.f32 %v192_v16, %v7989_v40  ;;  %v194_v22 = vpop.f32.mrf.mxu0  ;;  %v8071_v13 = vld [vmem:[#allocation2 + $0x170] sm:$0xff] }
  0xf8   :  { %6903 = vrcp.f32 %v343_v17  ;;  %v344_v23 = vadd.f32 1.0, %v6890_v20  ;;  %v297_v24 = vmul.f32 1.442695, %v256_v19  ;;  %v8038_v25 = vadd.f32 %v194_v22, %v7992_v41 }
  0xf9   :  { %v6892_v26 = vpop.eup %6891  ;;  %6905 = vpow2.f32 %v295_v18  ;;  %v257_v30 = vsub.f32 0.0, %v8035_v21  ;;  %v198_v34 = vpop.f32.mrf.mxu0 }
  0xfa   :  { %6907 = vrcp.f32 %v344_v23  ;;  %v345_v35 = vadd.f32 1.0, %v6892_v26  ;;  %v258_v38 = vsub.f32 0.0, %v8038_v25  ;;  %v8043_v42 = vadd.f32 %v198_v34, %v7989_v40  ;;  %v8080_v26 = vld [vmem:[#allocation2 + $0x178] sm:$0xff] }
  0xfb   :  { %v6894_v44 = vpop.eup %6893  ;;  %6909 = vpow2.f32 %v297_v24  ;;  %v299_v45 = vmul.f32 1.442695, %v257_v30  ;;  %v200_v47 = vpop.f32.mrf.mxu0  ;;  %v8078_v24 = vld [vmem:[#allocation2 + $0x158] sm:$0xff] }
  0xfc   :  { %6911 = vrcp.f32 %v345_v35  ;;  %v346_v48 = vadd.f32 1.0, %v6894_v44  ;;  %v301_v49 = vmul.f32 1.442695, %v258_v38  ;;  %v259_v51 = vsub.f32 0.0, %v8043_v42 }
  0xfd   :  { %v6896_v55 = vpop.eup %6895  ;;  %6913 = vpow2.f32 %v299_v45  ;;  %v8051_v56 = vadd.f32 %v200_v47, %v7992_v41  ;;  %v202_v57 = vpop.f32.mrf.mxu0  ;;  %v8089_v45 = vld [vmem:[#allocation2 + $0x110] sm:$0xff] }
  0xfe   :  { %6915 = vrcp.f32 %v346_v48  ;;  %v347_v59 = vadd.f32 1.0, %v6896_v55  ;;  %v303_v60 = vmul.f32 1.442695, %v259_v51  ;;  %v8054_v61 = vadd.f32 %v202_v57, %v7989_v40  ;;  %v8091_v47 = vld [vmem:[#allocation2 + $0x130] sm:$0xff] }
  0xff   :  { %v6898_v2 = vpop.eup %6897  ;;  %6917 = vpow2.f32 %v301_v49  ;;  %v260_v4 = vsub.f32 0.0, %v8051_v56  ;;  %v204_v5 = vpop.f32.mrf.mxu0 }
 0x100   :  { %6919 = vrcp.f32 %v347_v59  ;;  %v348_v9 = vadd.f32 1.0, %v6898_v2  ;;  %v261_v10 = vsub.f32 0.0, %v8054_v61  ;;  %v8067_v0 = vadd.f32 %v204_v5, %v7992_v41  ;;  %v8103_v5 = vld [vmem:[#allocation2 + $0x138] sm:$0xff] }
 0x101   :  { %v6900_v15 = vpop.eup %6899  ;;  %6921 = vpow2.f32 %v303_v60  ;;  %v305_v16 = vmul.f32 1.442695, %v260_v4  ;;  %v208_v17 = vpop.f32.mrf.mxu0  ;;  %v8101_v4 = vld [vmem:[#allocation2 + $0x118] sm:$0xff] }
 0x102   :  { %6923 = vrcp.f32 %v348_v9  ;;  %v349_v20 = vadd.f32 1.0, %v6900_v15  ;;  %v307_v22 = vmul.f32 1.442695, %v261_v10  ;;  %v262_v23 = vsub.f32 0.0, %v8067_v0 }
 0x103   :  { %v6902_v30 = vpop.eup %6901  ;;  %6925 = vpow2.f32 %v305_v16  ;;  %v8083_v34 = vadd.f32 %v208_v17, %v7989_v40  ;;  %v210_v35 = vpop.f32.mrf.mxu0  ;;  %v8111_v17 = vld [vmem:[#allocation2 + $0xd0] sm:$0xff] }
 0x104   :  { %6927 = vrcp.f32 %v349_v20  ;;  %v350_v48 = vadd.f32 1.0, %v6902_v30  ;;  %v309_v49 = vmul.f32 1.442695, %v262_v23  ;;  %v8094_v51 = vadd.f32 %v210_v35, %v7992_v41  ;;  %v8113_v20 = vld [vmem:[#allocation2 + $0xf0] sm:$0xff] }
 0x105   :  { %v6904_v55 = vpop.eup %6903  ;;  %6929 = vpow2.f32 %v307_v22  ;;  %v263_v57 = vsub.f32 0.0, %v8083_v34  ;;  %v212_v59 = vpop.f32.mrf.mxu0 }
 0x106   :  { %v6906_v9 = vpop.eup %6905  ;;  %6931 = vrcp.f32 %v350_v48  ;;  %v264_v10 = vsub.f32 0.0, %v8094_v51  ;;  %v8107_v15 = vadd.f32 %v212_v59, %v7989_v40  ;;  %v407_v16 = vmul.f32 %v6904_v55, %v7995_v43 }
 0x107   :  { %v6908_v22 = vpop.eup %6907  ;;  %v351_v23 = vadd.f32 1.0, %v6906_v9  ;;  %6933 = vpow2.f32 %v309_v49  ;;  %v311_v30 = vmul.f32 1.442695, %v263_v57  ;;  %v214_v35 = vpop.f32.mrf.mxu0 }
 0x108   :  { %v6910_v60 = vpop.eup %6909  ;;  %v313_v38 = vmul.f32 1.442695, %v264_v10  ;;  %v265_v59 = vsub.f32 0.0, %v8107_v15  ;;  %v8119_v2 = vadd.f32 %v214_v35, %v7992_v41  ;;  %v408_v33 = vmul.f32 %v6908_v22, %v7999_v46 }
 0x109   :  { %v6912_v44 = vpop.eup %6911  ;;  %6935 = vrcp.f32 %v351_v23  ;;  %v352_v18 = vadd.f32 1.0, %v6910_v60  ;;  %v218_v9 = vpop.f32.mrf.mxu0 }
 0x10a   :  { %v6914_v48 = vpop.eup %6913  ;;  %v409_v10 = vmul.f32 %v6912_v44, %v8003_v50  ;;  %6937 = vpow2.f32 %v311_v30  ;;  %v315_v6 = vmul.f32 1.442695, %v265_v59  ;;  %v266_v35 = vsub.f32 0.0, %v8119_v2 }
 0x10b   :  { %v6916_v19 = vpop.eup %6915  ;;  %6939 = vrcp.f32 %v352_v18  ;;  %v353_v23 = vadd.f32 1.0, %v6914_v48  ;;  %v8131_v60 = vadd.f32 %v218_v9, %v7989_v40  ;;  %v220_v8 = vpop.f32.mrf.mxu0 }
 0x10c   :  { %v6918_v49 = vpop.eup %6917  ;;  %v410_v57 = vmul.f32 %v6916_v19, %v8007_v54  ;;  %6941 = vpow2.f32 %v313_v38  ;;  %v317_v50 = vmul.f32 1.442695, %v266_v35  ;;  %v8137_v43 = vadd.f32 %v220_v8, %v7992_v41  ;;  %v8146_v54 = vld [vmem:[#allocation2 + $0xd8] sm:$0xff] }
 0x10d   :  { %v6920_v44 = vpop.eup %6919  ;;  %6943 = vrcp.f32 %v353_v23  ;;  %v354_v30 = vadd.f32 1.0, %v6918_v49  ;;  %v267_v59 = vsub.f32 0.0, %v8131_v60  ;;  %v222_v18 = vpop.f32.mrf.mxu0  ;;  %v8139_v48 = vpack.c.bf16 %v409_v10, %v407_v16  ;;  %v8148_v19 = vld [vmem:[#allocation2 + $0xf8] sm:$0xff] }
 0x10e   :  { %v6922_v55 = vpop.eup %6921  ;;  %v8141_v9 = vpack.c.bf16 %v410_v57, %v408_v33  ;;  %6945 = vpow2.f32 %v315_v6  ;;  %v8144_v46 = vadd.f32 %v222_v18, %v7989_v40  ;;  %v268_v8 = vsub.f32 0.0, %v8137_v43 }
 0x10f   :  { %v6924_v38 = vpop.eup %6923  ;;  %6947 = vrcp.f32 %v354_v30  ;;  %v355_v22 = vadd.f32 1.0, %v6922_v55  ;;  %v319_v49 = vmul.f32 1.442695, %v267_v59  ;;  %v224_v35 = vpop.f32.mrf.mxu0  ;;  %v411_v55 = vmul.f32 %v6920_v44, %v8011_v58 }
 0x110   :  { %v6926_v23 = vpop.eup %6925  ;;  %6949 = vpow2.f32 %v317_v50  ;;  %v269_v33 = vsub.f32 0.0, %v8144_v46  ;;  %v8153_v6 = vadd.f32 %v224_v35, %v7992_v41  ;;  %1297 = vmatprep.mubr.bf16.mxu1 %v8141_v9  ;;  %1410 = vmatprep.mubr.bf16.mxu0 %v8141_v9  ;;  %v321_v30 = vmul.f32 1.442695, %v268_v8 }
 0x111   :  { %v6928_v57 = vpop.eup %6927  ;;  %6951 = vrcp.f32 %v355_v22  ;;  %v356_v10 = vadd.f32 1.0, %v6926_v23  ;;  %v228_v59 = vpop.f32.mrf.mxu0  ;;  %1298 = vmatmul.mubr.bf16.vlgmr.msra.gmra.mxu1 %v8139_v48  ;;  %1411 = vmatmul.mubr.bf16.vlgmr.msra.gmra.mxu0 %v8139_v48  ;;  %v10639_v22 = vcombine.low %v7961_v27, %v7963_v28  ;;  %v10640_v8 = vcombine.low %v7965_v29, %v7969_v31 }
 0x112   :  { %v6930_v18 = vpop.eup %6929  ;;  %6953 = vpow2.f32 %v319_v49  ;;  %v323_v35 = vmul.f32 1.442695, %v269_v33  ;;  %v270_v32 = vsub.f32 0.0, %v8153_v6  ;;  %v413_v16 = vmul.f32 %v6928_v57, %v8019_v3 }
 0x113   :  { %1492 = vmatpush1.bf16.msra.mxu1 %v10639_v22  ;;  %1605 = vmatpush1.bf16.msra.mxu0 %v10640_v8  ;;  %v6932_v23 = vpop.eup %6931  ;;  %6955 = vrcp.f32 %v356_v10  ;;  %v357_v50 = vadd.f32 1.0, %v6930_v18  ;;  %v8173_v39 = vadd.f32 %v228_v59, %v7989_v40  ;;  %v230_v58 = vpop.f32.mrf.mxu0  ;;  %v10641_v44 = vcombine.high %v8046_v52, %v8048_v53  ;;  %v8187_v59 = vld [vmem:[#allocation2 + $0x90] sm:$0xff]  ;;  %v8206_v8 = vld [vmem:[#allocation2 + $0xb8] sm:$0xff] }
 0x114   :  { %v10642_v27 = vcombine.high %v8056_v63, %v8058_v1  ;;  %v6934_v28 = vpop.eup %6933  ;;  %v412_v29 = vmul.f32 %v6924_v38, %v8015_v62  ;;  %v414_v31 = vmul.f32 %v6932_v23, %v8023_v7  ;;  %6957 = vpow2.f32 %v321_v30  ;;  %v8202_v30 = vld [vmem:[#allocation2 + $0xb0] sm:$0xff] }
 0x115   :  { %1493 = vmatprep.subr.bf16.mxu1 %v10641_v44  ;;  %v325_v3 = vmul.f32 1.442695, %v270_v32  ;;  %6959 = vrcp.f32 %v357_v50  ;;  %v358_v49 = vadd.f32 1.0, %v6934_v28  ;;  %v271_v33 = vsub.f32 0.0, %v8173_v39  ;;  %v232_v10 = vpop.f32.mrf.mxu0  ;;  %v8204_v50 = vld [vmem:[#allocation2 + $0x98] sm:$0xff] }
 0x116   :  { %1606 = vmatprep.subr.bf16.mxu0 %v10642_v27  ;;  %v8185_v57 = vadd.f32 %v230_v58, %v7992_v41  ;;  %v6936_v18 = vpop.eup %6935  ;;  %v8189_v22 = vpack.c.bf16 %v414_v31, %v412_v29  ;;  %6961 = vpow2.f32 %v323_v35  ;;  %v8192_v62 = vadd.f32 %v232_v10, %v7989_v40 }
 0x117   :  { %v10643_v32 = vcombine.low %v8046_v52, %v8048_v53  ;;  %v10644_v7 = vcombine.low %v8056_v63, %v8058_v1  ;;  %v5947_v38 = vcombine.high %v8146_v54, %v8148_v19  ;;  %v6938_v35 = vpop.eup %6937  ;;  %v8208_v23 = vpack.c.bf16 %v413_v16, %v411_v55  ;;  %v234_v53 = vpop.f32.mrf.mxu0 }
 0x118   :  { %6963 = vrcp.f32 %v358_v49  ;;  %v327_v58 = vmul.f32 1.442695, %v271_v33  ;;  %v272_v52 = vsub.f32 0.0, %v8185_v57  ;;  %v10645_v63 = vcombine.high %v8069_v12, %v8071_v13  ;;  %v6940_v44 = vpop.eup %6939  ;;  %1307 = vmatprep.mubr.bf16.mxu1 %v8189_v22  ;;  %1420 = vmatprep.mubr.bf16.mxu0 %v8189_v22 }
 0x119   :  { %1494 = vmatpush1.bf16.msra.mxu1 %v10643_v32  ;;  %1607 = vmatpush1.bf16.msra.mxu0 %v10644_v7  ;;  %v10646_v1 = vcombine.high %v8078_v24, %v8080_v26  ;;  %v359_v27 = vadd.f32 1.0, %v6938_v35  ;;  %6965 = vpow2.f32 %v325_v3  ;;  %v273_v28 = vsub.f32 0.0, %v8192_v62  ;;  %v6942_v55 = vpop.eup %6941  ;;  %v238_v31 = vpop.f32.mrf.mxu0 }
 0x11a   :  { %1495 = vmatprep.subr.bf16.mxu1 %v10645_v63  ;;  %v8219_v16 = vadd.f32 %v234_v53, %v7992_v41  ;;  %6967 = vpow2.f32 %v327_v58  ;;  %v329_v29 = vmul.f32 1.442695, %v272_v52  ;;  %1308 = vmatmul.mubr.bf16.gmra.mxu1 %v8208_v23  ;;  %v5937_v3 = vcombine.high %v8187_v59, %v8202_v30  ;;  %v6944_v33 = vpop.eup %6943 }
 0x11b   :  { %1608 = vmatprep.subr.bf16.mxu0 %v10646_v1  ;;  %1421 = vmatmul.mubr.bf16.gmra.mxu0 %v8208_v23  ;;  %v5939_v49 = vcombine.high %v8204_v50, %v8206_v8  ;;  %6969 = vrcp.f32 %v359_v27  ;;  %v360_v10 = vadd.f32 1.0, %v6942_v55  ;;  %v331_v32 = vmul.f32 1.442695, %v273_v28  ;;  %v6946_v52 = vpop.eup %6945  ;;  %v240_v27 = vpop.f32.mrf.mxu0 }
 0x11c   :  { %v274_v7 = vsub.f32 0.0, %v8219_v16  ;;  %v10647_v35 = vcombine.low %v8069_v12, %v8071_v13  ;;  %v10648_v58 = vcombine.low %v8078_v24, %v8080_v26  ;;  %v415_v53 = vmul.f32 %v6936_v18, %v8027_v11  ;;  %v6948_v13 = vpop.eup %6947 }
 0x11d   :  { %v417_v63 = vmul.f32 %v6944_v33, %v8035_v21  ;;  %6971 = vpow2.f32 %v329_v29  ;;  %v8239_v1 = vadd.f32 %v238_v31, %v7989_v40  ;;  %v10649_v28 = vcombine.high %v8089_v45, %v8091_v47  ;;  %v6950_v21 = vpop.eup %6949  ;;  %v242_v31 = vpop.f32.mrf.mxu0 }
 0x11e   :  { %1496 = vmatpush1.bf16.msra.mxu1 %v10647_v35  ;;  %1609 = vmatpush1.bf16.msra.mxu0 %v10648_v58  ;;  %v10650_v12 = vcombine.high %v8101_v4, %v8103_v5  ;;  %6973 = vrcp.f32 %v360_v10  ;;  %v361_v24 = vadd.f32 1.0, %v6946_v52  ;;  %v333_v26 = vmul.f32 1.442695, %v274_v7  ;;  %v6952_v33 = vpop.eup %6951 }
 0x11f   :  { %1497 = vmatprep.subr.bf16.mxu1 %v10649_v28  ;;  %v8248_v11 = vadd.f32 %v240_v27, %v7992_v41  ;;  %v416_v18 = vmul.f32 %v6940_v44, %v8031_v14  ;;  %v418_v55 = vmul.f32 %v6948_v13, %v8038_v25  ;;  %6975 = vpow2.f32 %v331_v32  ;;  %v6954_v25 = vpop.eup %6953  ;;  %v244_v27 = vpop.f32.mrf.mxu0  ;;  %v8285_v13 = vld [vmem:[#allocation2 + $0x78] sm:$0xff] }
 0x120   :  { %1610 = vmatprep.subr.bf16.mxu0 %v10650_v12  ;;  %v275_v29 = vsub.f32 0.0, %v8239_v1  ;;  %6977 = vrcp.f32 %v361_v24  ;;  %v362_v35 = vadd.f32 1.0, %v6950_v21  ;;  %v8255_v10 = vadd.f32 %v242_v31, %v7989_v40 }
 0x121   :  { %v276_v58 = vsub.f32 0.0, %v8248_v11  ;;  %v10651_v7 = vcombine.low %v8089_v45, %v8091_v47  ;;  %v10652_v14 = vcombine.low %v8101_v4, %v8103_v5  ;;  %v8263_v44 = vpack.c.bf16 %v417_v63, %v415_v53  ;;  %v6956_v45 = vpop.eup %6955  ;;  %v8274_v53 = vld [vmem:[#allocation2 + $0x50] sm:$0xff] }
 0x122   :  { %v8265_v32 = vpack.c.bf16 %v418_v55, %v416_v18  ;;  %6979 = vpow2.f32 %v333_v26  ;;  %v335_v52 = vmul.f32 1.442695, %v275_v29  ;;  %v10653_v40 = vcombine.high %v8111_v17, %v8113_v20  ;;  %v8276_v63 = vld [vmem:[#allocation2 + $0x70] sm:$0xff]  ;;  %v6958_v28 = vpop.eup %6957 }
 0x123   :  { %1498 = vmatpush1.bf16.msra.mxu1 %v10651_v7  ;;  %1611 = vmatpush1.bf16.msra.mxu0 %v10652_v14  ;;  %6981 = vrcp.f32 %v362_v35  ;;  %v363_v47 = vadd.f32 1.0, %v6954_v25  ;;  %v337_v4 = vmul.f32 1.442695, %v276_v58  ;;  %v277_v5 = vsub.f32 0.0, %v8255_v10  ;;  %v6960_v24 = vpop.eup %6959 }
 0x124   :  { %1499 = vmatprep.subr.bf16.mxu1 %v10653_v40  ;;  %1612 = vmatprep.subr.bf16.mxu0 %v5947_v38  ;;  %6983 = vpow2.f32 %v335_v52  ;;  %v8279_v12 = vadd.f32 %v244_v27, %v7992_v41  ;;  %v8283_v38 = vld [vmem:[#allocation2 + $0x58] sm:$0xff]  ;;  %v364_v26 = vadd.f32 1.0, %v6958_v28  ;;  %v5936_v41 = vcombine.low %v8187_v59, %v8202_v30  ;;  %v6962_v18 = vpop.eup %6961  ;;  %v461_v27 = vld [vmem:[#allocation2 + $0x30] sm:$0xff] }
 0x125   :  { %1317 = vmatprep.mubr.bf16.mxu1 %v8265_v32  ;;  %1430 = vmatprep.mubr.bf16.mxu0 %v8265_v32  ;;  %6985 = vrcp.f32 %v363_v47  ;;  %v339_v21 = vmul.f32 1.442695, %v277_v5  ;;  %v10654_v29 = vcombine.low %v8111_v17, %v8113_v20  ;;  %v10655_v31 = vcombine.low %v8146_v54, %v8148_v19  ;;  %v6964_v7 = vpop.eup %6963  ;;  %v8311_v20 = vld [vmem:[#allocation2 + $0x10] sm:$0xff]  ;;  %v458_v40 = vld [vmem:[#allocation2 + $0x18] sm:$0xff] }
 0x126   :  { %1318 = vmatmul.mubr.bf16.gmra.mxu1 %v8263_v44  ;;  %1431 = vmatmul.mubr.bf16.gmra.mxu0 %v8263_v44  ;;  %6987 = vpow2.f32 %v337_v4  ;;  %v278_v55 = vsub.f32 0.0, %v8279_v12  ;;  %v5938_v35 = vcombine.low %v8204_v50, %v8206_v8  ;;  %v5929_v58 = vcombine.high %v8274_v53, %v8276_v63  ;;  %v6966_v54 = vpop.eup %6965  ;;  %v462_v59 = vld [vmem:[#allocation2 + $0x38] sm:$0xff]  ;;  %v8325_v4 = vld [vmem:[#allocation2 + $0x3d0] sm:$0xff] }
 0x127   :  { %1500 = vmatpush1.bf16.msra.mxu1 %v10654_v29  ;;  %1613 = vmatpush1.bf16.msra.mxu0 %v10655_v31  ;;  %v421_v14 = vmul.f32 %v6960_v24, %v8054_v61  ;;  %6989 = vrcp.f32 %v364_v26  ;;  %v365_v25 = vadd.f32 1.0, %v6962_v18  ;;  %v5931_v17 = vcombine.high %v8283_v38, %v8285_v13  ;;  %v6968_v30 = vpop.eup %6967 }
 0x128   :  { %1501 = vmatprep.subr.bf16.mxu1 %v5937_v3  ;;  %1614 = vmatprep.subr.bf16.mxu0 %v5939_v49  ;;  %v420_v19 = vmul.f32 %v6956_v45, %v8051_v56  ;;  %v422_v61 = vmul.f32 %v6964_v7, %v8067_v0  ;;  %6991 = vpow2.f32 %v339_v21  ;;  %v341_v52 = vmul.f32 1.442695, %v278_v55  ;;  %v6970_v8 = vpop.eup %6969 }
 0x129   :  { %v419_v3 = vmul.f32 %v6952_v33, %v8043_v42  ;;  %6993 = vrcp.f32 %v365_v25  ;;  %v366_v50 = vadd.f32 1.0, %v6966_v54  ;;  %v5928_v56 = vcombine.low %v8274_v53, %v8276_v63  ;;  %v581_v53 = vld [vmem:[#allocation2 + $0x3f0] sm:$0xff]  ;;  %v578_v63 = vld [vmem:[#allocation2 + $0x3d8] sm:$0xff] }
 0x12a   :  { %v8316_v49 = vpack.c.bf16 %v422_v61, %v420_v19  ;;  %6995 = vpow2.f32 %v341_v52  ;;  %v5930_v0 = vcombine.low %v8283_v38, %v8285_v13  ;;  %v6972_v45 = vpop.eup %6971  ;;  %v5921_v42 = vcombine.high %v8311_v20, %v461_v27  ;;  %v582_v38 = vld [vmem:[#allocation2 + $0x3f8] sm:$0xff] }
 0x12b   :  { %1502 = vmatpush1.bf16.msra.mxu1 %v5936_v41  ;;  %1615 = vmatpush1.bf16.msra.mxu0 %v5938_v35  ;;  %v8322_v47 = vpack.c.bf16 %v421_v14, %v419_v3  ;;  %6997 = vrcp.f32 %v366_v50  ;;  %v5923_v33 = vcombine.high %v458_v40, %v462_v59  ;;  %v6974_v5 = vpop.eup %6973  ;;  %v368_v28 = vadd.f32 1.0, %v6972_v45  ;;  %v569_v14 = vld [vmem:[#allocation2 + $0x390] sm:$0xff]  ;;  %v570_v19 = vld [vmem:[#allocation2 + $0x398] sm:$0xff] }
 0x12c   :  { %1503 = vmatprep.subr.bf16.mxu1 %v5929_v58  ;;  %1616 = vmatprep.subr.bf16.mxu0 %v5931_v17  ;;  %v6976_v13 = vpop.eup %6975  ;;  %v367_v24 = vadd.f32 1.0, %v6968_v30  ;;  %v5920_v41 = vcombine.low %v8311_v20, %v461_v27  ;;  %v5922_v18 = vcombine.low %v458_v40, %v462_v59  ;;  %v6041_v29 = vcombine.high %v8325_v4, %v581_v53  ;;  %v573_v20 = vld [vmem:[#allocation2 + $0x3b0] sm:$0xff]  ;;  %v574_v61 = vld [vmem:[#allocation2 + $0x3b8] sm:$0xff] }
 0x12d   :  { %1327 = vmatprep.mubr.bf16.mxu1 %v8316_v49  ;;  %1440 = vmatprep.mubr.bf16.mxu0 %v8316_v49  ;;  %v6978_v26 = vpop.eup %6977  ;;  %v369_v21 = vadd.f32 1.0, %v6976_v13  ;;  %6999 = vrcp.f32 %v368_v28  ;;  %v6043_v31 = vcombine.high %v578_v63, %v582_v38  ;;  %v424_v17 = vmul.f32 %v6974_v5, %v8094_v51  ;;  %v565_v45 = vld [vmem:[#allocation2 + $0x370] sm:$0xff] }
 0x12e   :  { %1328 = vmatmul.mubr.bf16.gmra.mxu1 %v8322_v47  ;;  %1441 = vmatmul.mubr.bf16.gmra.mxu0 %v8322_v47  ;;  %v425_v58 = vmul.f32 %v6978_v26, %v8107_v15  ;;  %v423_v27 = vmul.f32 %v6970_v8, %v8083_v34  ;;  %v6040_v59 = vcombine.low %v8325_v4, %v581_v53 }
 0x12f   :  { %1504 = vmatpush1.bf16.msra.mxu1 %v5928_v56  ;;  %1617 = vmatpush1.bf16.msra.mxu0 %v5930_v0  ;;  %v6980_v55 = vpop.eup %6979  ;;  %7001 = vrcp.f32 %v369_v21  ;;  %v6042_v30 = vcombine.low %v578_v63, %v582_v38  ;;  %v6033_v50 = vcombine.high %v569_v14, %v573_v20  ;;  %v6035_v56 = vcombine.high %v570_v19, %v574_v61  ;;  %v561_v0 = vld [vmem:[#allocation2 + $0x350] sm:$0xff] }
 0x130   :  { %1505 = vmatprep.subr.bf16.mxu1 %v5921_v42  ;;  %1618 = vmatprep.subr.bf16.mxu0 %v5923_v33  ;;  %v6982_v35 = vpop.eup %6981  ;;  %v370_v7 = vadd.f32 1.0, %v6980_v55  ;;  %7003 = vrcp.f32 %v367_v24  ;;  %v562_v42 = vld [vmem:[#allocation2 + $0x358] sm:$0xff]  ;;  %v6032_v53 = vcombine.low %v569_v14, %v573_v20  ;;  %v6034_v63 = vcombine.low %v570_v19, %v574_v61  ;;  %v549_v19 = vld [vmem:[#allocation2 + $0x2f0] sm:$0xff] }
 0x131   :  { %v6984_v25 = vpop.eup %6983  ;;  %v426_v54 = vmul.f32 %v6982_v35, %v8119_v2  ;;  %v8340_v2 = vpack.c.bf16 %v425_v58, %v423_v27  ;;  %v566_v33 = vld [vmem:[#allocation2 + $0x378] sm:$0xff]  ;;  %v6025_v38 = vcombine.high %v561_v0, %v565_v45 }
 0x132   :  { %v6986_v52 = vpop.eup %6985  ;;  %7005 = vrcp.f32 %v370_v7  ;;  %v371_v8 = vadd.f32 1.0, %v6984_v25  ;;  %v6027_v21 = vcombine.high %v562_v42, %v566_v33  ;;  %v558_v35 = vld [vmem:[#allocation2 + $0x338] sm:$0xff]  ;;  %v6026_v14 = vcombine.low %v562_v42, %v566_v33 }
 0x133   :  { %1506 = vmatpush1.bf16.msra.mxu1 %v5920_v41  ;;  %1619 = vmatpush1.bf16.msra.mxu0 %v5922_v18  ;;  %v6988_v40 = vpop.eup %6987  ;;  %v8337_v15 = vpack.c.bf16 %v426_v54, %v424_v17  ;;  %v553_v41 = vld [vmem:[#allocation2 + $0x310] sm:$0xff]  ;;  %v427_v58 = vmul.f32 %v6986_v52, %v8131_v60  ;;  %v546_v61 = vld [vmem:[#allocation2 + $0x2d8] sm:$0xff] }
 0x134   :  { %1507 = vmatprep.subr.bf16.mxu1 %v6041_v29  ;;  %1620 = vmatprep.subr.bf16.mxu0 %v6043_v31  ;;  %v6990_v51 = vpop.eup %6989  ;;  %v372_v3 = vadd.f32 1.0, %v6988_v40  ;;  %v557_v29 = vld [vmem:[#allocation2 + $0x330] sm:$0xff]  ;;  %v554_v31 = vld [vmem:[#allocation2 + $0x318] sm:$0xff] }
 0x135   :  { %v6992_v34 = vpop.eup %6991  ;;  %1337 = vmatprep.mubr.bf16.mxu1 %v8337_v15  ;;  %1450 = vmatprep.mubr.bf16.mxu0 %v8337_v15  ;;  %v428_v18 = vmul.f32 %v6990_v51, %v8137_v43  ;;  %v6017_v43 = vcombine.high %v553_v41, %v557_v29  ;;  %v545_v60 = vld [vmem:[#allocation2 + $0x2d0] sm:$0xff]  ;;  %v550_v52 = vld [vmem:[#allocation2 + $0x2f8] sm:$0xff]  ;;  %v6016_v40 = vcombine.low %v553_v41, %v557_v29 }
 0x136   :  { %v6994_v4 = vpop.eup %6993  ;;  %v373_v5 = vadd.f32 1.0, %v6992_v34  ;;  %1338 = vmatmul.mubr.bf16.gmra.mxu1 %v8340_v2  ;;  %1451 = vmatmul.mubr.bf16.gmra.mxu0 %v8340_v2  ;;  %7007 = vrcp.f32 %v372_v3  ;;  %v538_v34 = vld [vmem:[#allocation2 + $0x298] sm:$0xff] }
 0x137   :  { %v6996_v28 = vpop.eup %6995  ;;  %1508 = vmatpush2.bf16.msra.mxu1 %v6040_v59  ;;  %1621 = vmatpush2.bf16.msra.mxu0 %v6042_v30  ;;  %v429_v24 = vmul.f32 %v6994_v4, %v8144_v46  ;;  %v6024_v46 = vcombine.low %v561_v0, %v565_v45  ;;  %v6018_v59 = vcombine.low %v554_v31, %v558_v35  ;;  %v541_v45 = vld [vmem:[#allocation2 + $0x2b0] sm:$0xff] }
 0x138   :  { %v6998_v13 = vpop.eup %6997  ;;  %7009 = vrcp.f32 %v373_v5  ;;  %v374_v26 = vadd.f32 1.0, %v6996_v28  ;;  %1509 = vmatprep.subr.bf16.mxu1 %v6033_v50  ;;  %1622 = vmatprep.subr.bf16.mxu0 %v6035_v56  ;;  %v537_v50 = vld [vmem:[#allocation2 + $0x290] sm:$0xff]  ;;  %v6009_v56 = vcombine.high %v545_v60, %v549_v19  ;;  %v6011_v0 = vcombine.high %v546_v61, %v550_v52 }
 0x139   :  { %v430_v55 = vmul.f32 %v6998_v13, %v8153_v6  ;;  %7011 = vrcp.f32 %v371_v8  ;;  %v8352_v17 = vpack.c.bf16 %v429_v24, %v427_v58  ;;  %v6019_v6 = vcombine.high %v554_v31, %v558_v35  ;;  %v542_v8 = vld [vmem:[#allocation2 + $0x2b8] sm:$0xff]  ;;  %v521_v58 = vld [vmem:[#allocation2 + $0x210] sm:$0xff] }
 0x13a   :  { %7013 = vrcp.f32 %v374_v26  ;;  %v7000_v25 = vpop.eup %6999  ;;  %v6008_v4 = vcombine.low %v545_v60, %v549_v19  ;;  %v6003_v28 = vcombine.high %v538_v34, %v542_v8  ;;  %v530_v13 = vld [vmem:[#allocation2 + $0x258] sm:$0xff]  ;;  %v6002_v41 = vcombine.low %v538_v34, %v542_v8  ;;  %v6473_v19 = vld [vmem:[#allocation4 + $0xe4] ss:$16 sps:$4 sm:$0xff]  }
 0x13b   :  { %v8350_v7 = vpack.c.bf16 %v430_v55, %v428_v18  ;;  %1510 = vmatpush2.bf16.msra.mxu1 %v6032_v53  ;;  %1623 = vmatpush2.bf16.msra.mxu0 %v6034_v63  ;;  %v432_v30 = vmul.f32 %v7000_v25, %v8185_v57  ;;  %v6010_v57 = vcombine.low %v546_v61, %v550_v52  ;;  %v529_v63 = vld [vmem:[#allocation2 + $0x250] sm:$0xff]  ;;  %v534_v24 = vld [vmem:[#allocation2 + $0x278] sm:$0xff] }
 0x13c   :  { %1511 = vmatprep.subr.bf16.mxu1 %v6025_v38  ;;  %1624 = vmatprep.subr.bf16.mxu0 %v6027_v21  ;;  %v7002_v54 = vpop.eup %7001  ;;  %v533_v38 = vld [vmem:[#allocation2 + $0x270] sm:$0xff]  ;;  %v6000_v21 = vcombine.low %v537_v50, %v541_v45  ;;  %v5995_v35 = vcombine.high %v530_v13, %v534_v24 }
 0x13d   :  { %1347 = vmatprep.mubr.bf16.mxu1 %v8350_v7  ;;  %1460 = vmatprep.mubr.bf16.mxu0 %v8350_v7  ;;  %v7004_v20 = vpop.eup %7003  ;;  %v433_v51 = vmul.f32 %v7002_v54, %v8192_v62  ;;  %v5993_v31 = vcombine.high %v529_v63, %v533_v38  ;;  %v525_v25 = vld [vmem:[#allocation2 + $0x230] sm:$0xff]  ;;  %v5992_v54 = vcombine.low %v529_v63, %v533_v38 }
 0x13e   :  { %1348 = vmatmul.mubr.bf16.gmra.mxu1 %v8352_v17  ;;  %1461 = vmatmul.mubr.bf16.gmra.mxu0 %v8352_v17  ;;  %v431_v42 = vmul.f32 %v7004_v20, %v8173_v39  ;;  %v6476_v61 = vld [vmem:[#allocation4 + $0x2e4] ss:$16 sps:$4 sm:$0xff]   ;;  %v6471_v52 = vld [vmem:[#allocation4 + $0xe0] ss:$16 sps:$4 sm:$0xff]  }
 0x13f   :  { %v7006_v27 = vpop.eup %7005  ;;  %1512 = vmatpush2.bf16.msra.mxu1 %v6024_v46  ;;  %1625 = vmatpush2.bf16.msra.mxu0 %v6026_v14  ;;  %v6497_v34 = vld [vmem:[#allocation4 + $0x64] ss:$16 sps:$4 sm:$0xff]   ;;  %v6510_v63 = vld [vmem:[#allocation4 + $0x220] ss:$16 sps:$4 sm:$0xff]  }
 0x140   :  { %v434_v3 = vmul.f32 %v7006_v27, %v8219_v16  ;;  %1513 = vmatprep.subr.bf16.mxu1 %v6017_v43  ;;  %1626 = vmatprep.subr.bf16.mxu0 %v6019_v6  ;;  %v8364_v62 = vpack.c.bf16 %v433_v51, %v431_v42  ;;  %v6001_v16 = vcombine.high %v537_v50, %v541_v45  ;;  %v522_v43 = vld [vmem:[#allocation2 + $0x218] sm:$0xff]  ;;  %v6474_v27 = vld [vmem:[#allocation4 + $0x2e0] ss:$16 sps:$4 sm:$0xff]   ;;  %v6485_v51 = vld [vmem:[#allocation4 + $0xa4] ss:$16 sps:$4 sm:$0xff]  }
 0x141   :  { %v526_v6 = vld [vmem:[#allocation2 + $0x238] sm:$0xff]  ;;  %v6483_v50 = vld [vmem:[#allocation4 + $0xa0] ss:$16 sps:$4 sm:$0xff]   ;;  %v6500_v8 = vld [vmem:[#allocation4 + $0x264] ss:$16 sps:$4 sm:$0xff]  }
 0x142   :  { %v8362_v33 = vpack.c.bf16 %v434_v3, %v432_v30  ;;  %v5987_v60 = vcombine.high %v522_v43, %v526_v6  ;;  %v5986_v20 = vcombine.low %v522_v43, %v526_v6  ;;  %v6480_v30 = vld [vmem:[#allocation4 + $0x2c0] ss:$16 sps:$4 sm:$0xff]   ;;  %v6488_v3 = vld [vmem:[#allocation4 + $0x2a4] ss:$16 sps:$4 sm:$0xff]  }
 0x143   :  { %1514 = vmatpush2.bf16.msra.mxu1 %v6016_v40  ;;  %1627 = vmatpush2.bf16.msra.mxu0 %v6018_v59  ;;  %v7008_v5 = vpop.eup %7007  ;;  %v6479_v40 = vld [vmem:[#allocation4 + $0xc4] ss:$16 sps:$4 sm:$0xff]   ;;  %v6492_v45 = vld [vmem:[#allocation4 + $0x280] ss:$16 sps:$4 sm:$0xff]  }
 0x144   :  { %1357 = vmatprep.mubr.bf16.mxu1 %v8362_v33  ;;  %1470 = vmatprep.mubr.bf16.mxu0 %v8362_v33  ;;  %v436_v18 = vmul.f32 %v7008_v5, %v8248_v11  ;;  %v6482_v59 = vld [vmem:[#allocation4 + $0x2c4] ss:$16 sps:$4 sm:$0xff]   ;;  %v6495_v42 = vld [vmem:[#allocation4 + $0x60] ss:$16 sps:$4 sm:$0xff]  }
 0x145   :  { %v7010_v53 = vpop.eup %7009  ;;  %1515 = vmatprep.subr.bf16.mxu1 %v6009_v56  ;;  %1628 = vmatprep.subr.bf16.mxu0 %v6011_v0  ;;  %v6486_v56 = vld [vmem:[#allocation4 + $0x2a0] ss:$16 sps:$4 sm:$0xff]   ;;  %v6491_v0 = vld [vmem:[#allocation4 + $0x84] ss:$16 sps:$4 sm:$0xff]  }
 0x146   :  { %v7012_v39 = vpop.eup %7011  ;;  %1358 = vmatmul.mubr.bf16.gmra.mxu1 %v8364_v62  ;;  %1471 = vmatmul.mubr.bf16.gmra.mxu0 %v8364_v62  ;;  %v437_v55 = vmul.f32 %v7010_v53, %v8255_v10  ;;  %v5994_v10 = vcombine.low %v530_v13, %v534_v24  ;;  %v6504_v5 = vld [vmem:[#allocation4 + $0x240] ss:$16 sps:$4 sm:$0xff]   ;;  %v6521_v13 = vld [vmem:[#allocation4 + $0x1e4] ss:$16 sps:$4 sm:$0xff]  }
 0x147   :  { %v7014_v26 = vpop.eup %7013  ;;  %1516 = vmatpush2.bf16.msra.mxu1 %v6008_v4  ;;  %1629 = vmatpush2.bf16.msra.mxu0 %v6010_v57  ;;  %v435_v46 = vmul.f32 %v7012_v39, %v8239_v1  ;;  %v5984_v1 = vcombine.low %v521_v58, %v525_v25  ;;  %v6498_v4 = vld [vmem:[#allocation4 + $0x260] ss:$16 sps:$4 sm:$0xff]   ;;  %v6503_v57 = vld [vmem:[#allocation4 + $0x44] ss:$16 sps:$4 sm:$0xff]  }
 0x148   :  { %v438_v29 = vmul.f32 %v7014_v26, %v8279_v12  ;;  %1517 = vmatprep.subr.bf16.mxu1 %v6001_v16  ;;  %1630 = vmatprep.subr.bf16.mxu0 %v6003_v28  ;;  %v5985_v12 = vcombine.high %v521_v58, %v525_v25  ;;  %v6509_v16 = vld [vmem:[#allocation4 + $0x24] ss:$16 sps:$4 sm:$0xff]   ;;  %v6507_v53 = vld [vmem:[#allocation4 + $0x20] ss:$16 sps:$4 sm:$0xff]  }
 0x149   :  { %v8376_v11 = vpack.c.bf16 %v437_v55, %v435_v46  ;;  %v6512_v28 = vld [vmem:[#allocation4 + $0x224] ss:$16 sps:$4 sm:$0xff]   ;;  %v6516_v38 = vld [vmem:[#allocation4 + $0x200] ss:$16 sps:$4 sm:$0xff]  }
 0x14a   :  { %v8374_v14 = vpack.c.bf16 %v438_v29, %v436_v18  ;;  %v6515_v39 = vld [vmem:[#allocation4 + $0x4] ss:$16 sps:$4 sm:$0xff]   ;;  %v6519_v26 = vld [vmem:[#allocation4 + $0x1e0] ss:$16 sps:$4 sm:$0xff]  }
 0x14b   :  { %1518 = vmatpush2.bf16.msra.mxu1 %v6000_v21  ;;  %1631 = vmatpush2.bf16.msra.mxu0 %v6002_v41  ;;  %v6524_v24 = vld [vmem:[#allocation4 + $0x3e4] ss:$16 sps:$4 sm:$0xff]   ;;  %v6522_v21 = vld [vmem:[#allocation4 + $0x3e0] ss:$16 sps:$4 sm:$0xff]  }
 0x14c   :  { %1367 = vmatprep.mubr.bf16.mxu1 %v8374_v14  ;;  %1480 = vmatprep.mubr.bf16.mxu0 %v8374_v14  ;;  %v6530_v41 = vld [vmem:[#allocation4 + $0x3c4] ss:$16 sps:$4 sm:$0xff]   ;;  %v6528_v18 = vld [vmem:[#allocation4 + $0x3c0] ss:$16 sps:$4 sm:$0xff]  }
 0x14d   :  { %1519 = vmatprep.subr.bf16.mxu1 %v5993_v31  ;;  %1632 = vmatprep.subr.bf16.mxu0 %v5995_v35  ;;  %v6533_v55 = vld [vmem:[#allocation4 + $0x1a4] ss:$16 sps:$4 sm:$0xff]   ;;  %v6531_v29 = vld [vmem:[#allocation4 + $0x1a0] ss:$16 sps:$4 sm:$0xff]  }
 0x14e   :  { %1368 = vmatmul.mubr.bf16.gmra.mxu1 %v8376_v11  ;;  %1481 = vmatmul.mubr.bf16.gmra.mxu0 %v8376_v11  ;;  %v6536_v31 = vld [vmem:[#allocation4 + $0x3a4] ss:$16 sps:$4 sm:$0xff]   ;;  %v6537_v58 = vld [vmem:[#allocation4 + $0x180] ss:$16 sps:$4 sm:$0xff]  }
 0x14f   :  { %1520 = vmatpush2.bf16.msra.mxu1 %v5992_v54  ;;  %1523 = vmatprep.mubr.bf16.mxu1 %v8141_v9  ;;  %v6542_v35 = vld [vmem:[#allocation4 + $0x384] ss:$16 sps:$4 sm:$0xff]   ;;  %v6540_v46 = vld [vmem:[#allocation4 + $0x380] ss:$16 sps:$4 sm:$0xff]  }
 0x150   :  { %1633 = vmatpush2.bf16.msra.mxu0 %v5994_v10  ;;  %1636 = vmatprep.mubr.bf16.mxu0 %v8141_v9  ;;  %v6477_v9 = vld [vmem:[#allocation4 + $0xc0] ss:$16 sps:$4 sm:$0xff]   ;;  %v6548_v25 = vld [vmem:[#allocation4 + $0x364] ss:$16 sps:$4 sm:$0xff]  }
 0x151   :  { %1521 = vmatprep.subr.bf16.mxu1 %v5985_v12  ;;  %1634 = vmatprep.subr.bf16.mxu0 %v5987_v60  ;;  %v6546_v43 = vld [vmem:[#allocation4 + $0x360] ss:$16 sps:$4 sm:$0xff]   ;;  %v6551_v6 = vld [vmem:[#allocation4 + $0x144] ss:$16 sps:$4 sm:$0xff]  }
 0x152   :  { %v6549_v54 = vld [vmem:[#allocation4 + $0x140] ss:$16 sps:$4 sm:$0xff]   ;;  %v6554_v10 = vld [vmem:[#allocation4 + $0x344] ss:$16 sps:$4 sm:$0xff]  }
 0x153   :  { %1522 = vmatpush2.bf16.msra.mxu1 %v5984_v1  ;;  %v6560_v12 = vld [vmem:[#allocation4 + $0x324] ss:$16 sps:$4 sm:$0xff]   ;;  %v6555_v60 = vld [vmem:[#allocation4 + $0x120] ss:$16 sps:$4 sm:$0xff]  }
 0x154   :  { %1635 = vmatpush2.bf16.msra.mxu0 %v5986_v20  ;;  %4107 = vmatprep.subr.bf16.mxu1 %v6473_v19  ;;  %v6558_v1 = vld [vmem:[#allocation4 + $0x320] ss:$16 sps:$4 sm:$0xff]   ;;  %v6566_v20 = vld [vmem:[#allocation4 + $0x304] ss:$16 sps:$4 sm:$0xff]  }
 0x155   :  { %4220 = vmatprep.subr.bf16.mxu0 %v6476_v61  ;;  %v6561_v19 = vld [vmem:[#allocation4 + $0x100] ss:$16 sps:$4 sm:$0xff]  }
 0x156   :  { %1524 = vmatmul.mubr.bf16.vlgmr.msra.gmra.mxu1 %v8139_v48  ;;  %v6564_v61 = vld [vmem:[#allocation4 + $0x300] ss:$16 sps:$4 sm:$0xff]  }
 0x157   :  { %1637 = vmatmul.mubr.bf16.vlgmr.msra.gmra.mxu0 %v8139_v48  ;;  %1533 = vmatprep.mubr.bf16.mxu1 %v8189_v22  ;;  %v6494_v48 = vld [vmem:[#allocation4 + $0x284] ss:$16 sps:$4 sm:$0xff]  }
 0x158   :  { %1646 = vmatprep.mubr.bf16.mxu0 %v8189_v22  ;;  %4108 = vmatpush1.bf16.msra.mxu1 %v6471_v52  ;;  %v6489_v22 = vld [vmem:[#allocation4 + $0x80] ss:$16 sps:$4 sm:$0xff]   ;;  %v6569_v52 = vld [vmem:[#allocation4 + $0x4e4] ss:$16 sps:$4 sm:$0xff]  }
 0x159   :  { %4221 = vmatpush1.bf16.msra.mxu0 %v6474_v27  ;;  %4109 = vmatprep.subr.bf16.mxu1 %v6479_v40  ;;  %v6572_v27 = vld [vmem:[#allocation4 + $0x6e4] ss:$16 sps:$4 sm:$0xff]   ;;  %v10550_v40 = vsub.s32 2, %v7977_v36 }
 0x15a   :  { %4222 = vmatprep.subr.bf16.mxu0 %v6482_v59  ;;  %v8418_v59 = vld [vmem:[%s10541_s4] sm:$0xff] }
 0x15c   :  { %4110 = vmatpush1.bf16.msra.mxu1 %v6477_v9  ;;  %v10549_v9 = vsub.s32 3, %v7977_v36 }
 0x15d   :  { %4223 = vmatpush1.bf16.msra.mxu0 %v6480_v30  ;;  %4111 = vmatprep.subr.bf16.mxu1 %v6485_v51  ;;  %v8423_v30 = vrot.slane %v8418_v59, %v7980_v37  ;;  %v8428_v51 = vrot.slane %v8418_v59, %v10550_v40 }
 0x15e   :  { %1534 = vmatmul.mubr.bf16.gmra.mxu1 %v8208_v23  ;;  %4224 = vmatprep.subr.bf16.mxu0 %v6488_v3  ;;  %v10656_v3 = vld [vmem:[#allocation10_spill] sm:$0xff] }
 0x15f   :  { %1647 = vmatmul.mubr.bf16.gmra.mxu0 %v8208_v23  ;;  %1543 = vmatprep.mubr.bf16.mxu1 %v8265_v32  ;;  %v6506_v23 = vld [vmem:[#allocation4 + $0x244] ss:$16 sps:$4 sm:$0xff]  }
 0x160   :  { %1656 = vmatprep.mubr.bf16.mxu0 %v8265_v32  ;;  %4112 = vmatpush1.bf16.msra.mxu1 %v6483_v50  ;;  %v6501_v32 = vld [vmem:[#allocation4 + $0x40] ss:$16 sps:$4 sm:$0xff]   ;;  %v8432_v50 = vrot.slane %v8418_v59, %v10656_v3 }
 0x161   :  { %4225 = vmatpush1.bf16.msra.mxu0 %v6486_v56  ;;  %4113 = vmatprep.subr.bf16.mxu1 %v6491_v0  ;;  %v8437_v56 = vrot.slane %v8418_v59, %v10549_v9 }
 0x162   :  { %4226 = vmatprep.subr.bf16.mxu0 %v6494_v48 }
 0x164   :  { %4114 = vmatpush1.bf16.msra.mxu1 %v6489_v22 }
 0x165   :  { %4227 = vmatpush1.bf16.msra.mxu0 %v6492_v45  ;;  %4115 = vmatprep.subr.bf16.mxu1 %v6497_v34 }
 0x166   :  { %1544 = vmatmul.mubr.bf16.gmra.mxu1 %v8263_v44  ;;  %4228 = vmatprep.subr.bf16.mxu0 %v6500_v8 }
 0x167   :  { %1657 = vmatmul.mubr.bf16.gmra.mxu0 %v8263_v44  ;;  %1553 = vmatprep.mubr.bf16.mxu1 %v8316_v49  ;;  %v6518_v44 = vld [vmem:[#allocation4 + $0x204] ss:$16 sps:$4 sm:$0xff]  }
 0x168   :  { %1666 = vmatprep.mubr.bf16.mxu0 %v8316_v49  ;;  %4116 = vmatpush1.bf16.msra.mxu1 %v6495_v42  ;;  %v6513_v49 = vld [vmem:[#allocation4] ss:$16 sps:$4 sm:$0xff]  }
 0x169   :  { %4229 = vmatpush1.bf16.msra.mxu0 %v6498_v4  ;;  %4117 = vmatprep.subr.bf16.mxu1 %v6503_v57 }
 0x16a   :  { %4230 = vmatprep.subr.bf16.mxu0 %v6506_v23 }
 0x16c   :  { %4118 = vmatpush1.bf16.msra.mxu1 %v6501_v32 }
 0x16d   :  { %4231 = vmatpush1.bf16.msra.mxu0 %v6504_v5  ;;  %4119 = vmatprep.subr.bf16.mxu1 %v6509_v16 }
 0x16e   :  { %1554 = vmatmul.mubr.bf16.gmra.mxu1 %v8322_v47  ;;  %4232 = vmatprep.subr.bf16.mxu0 %v6512_v28 }
 0x16f   :  { %1667 = vmatmul.mubr.bf16.gmra.mxu0 %v8322_v47  ;;  %1563 = vmatprep.mubr.bf16.mxu1 %v8337_v15  ;;  %v6527_v47 = vld [vmem:[#allocation4 + $0x1c4] ss:$16 sps:$4 sm:$0xff]  }
 0x170   :  { %1676 = vmatprep.mubr.bf16.mxu0 %v8337_v15  ;;  %4120 = vmatpush1.bf16.msra.mxu1 %v6507_v53  ;;  %v6525_v15 = vld [vmem:[#allocation4 + $0x1c0] ss:$16 sps:$4 sm:$0xff]  }
 0x171   :  { %4233 = vmatpush1.bf16.msra.mxu0 %v6510_v63  ;;  %4121 = vmatprep.subr.bf16.mxu1 %v6515_v39 }
 0x172   :  { %4234 = vmatprep.subr.bf16.mxu0 %v6518_v44 }
 0x174   :  { %4122 = vmatpush1.bf16.msra.mxu1 %v6513_v49 }
 0x175   :  { %4235 = vmatpush1.bf16.msra.mxu0 %v6516_v38  ;;  %4123 = vmatprep.subr.bf16.mxu1 %v6521_v13 }
 0x176   :  { %1564 = vmatmul.mubr.bf16.gmra.mxu1 %v8340_v2  ;;  %4236 = vmatprep.subr.bf16.mxu0 %v6524_v24 }
 0x177   :  { %1677 = vmatmul.mubr.bf16.gmra.mxu0 %v8340_v2  ;;  %1573 = vmatprep.mubr.bf16.mxu1 %v8350_v7  ;;  %v6534_v2 = vld [vmem:[#allocation4 + $0x3a0] ss:$16 sps:$4 sm:$0xff]  }
 0x178   :  { %1686 = vmatprep.mubr.bf16.mxu0 %v8350_v7  ;;  %4124 = vmatpush2.bf16.msra.mxu1 %v6519_v26  ;;  %v6539_v7 = vld [vmem:[#allocation4 + $0x184] ss:$16 sps:$4 sm:$0xff]  }
 0x179   :  { %4237 = vmatpush2.bf16.msra.mxu0 %v6522_v21  ;;  %4125 = vmatprep.subr.bf16.mxu1 %v6527_v47 }
 0x17a   :  { %4238 = vmatprep.subr.bf16.mxu0 %v6530_v41 }
 0x17c   :  { %4126 = vmatpush2.bf16.msra.mxu1 %v6525_v15 }
 0x17d   :  { %4239 = vmatpush2.bf16.msra.mxu0 %v6528_v18  ;;  %4127 = vmatprep.subr.bf16.mxu1 %v6533_v55 }
 0x17e   :  { %1574 = vmatmul.mubr.bf16.gmra.mxu1 %v8352_v17  ;;  %4240 = vmatprep.subr.bf16.mxu0 %v6536_v31 }
 0x17f   :  { %1687 = vmatmul.mubr.bf16.gmra.mxu0 %v8352_v17  ;;  %1583 = vmatprep.mubr.bf16.mxu1 %v8362_v33  ;;  %v6545_v17 = vld [vmem:[#allocation4 + $0x164] ss:$16 sps:$4 sm:$0xff]  }
 0x180   :  { %1696 = vmatprep.mubr.bf16.mxu0 %v8362_v33  ;;  %4128 = vmatpush2.bf16.msra.mxu1 %v6531_v29  ;;  %v6543_v33 = vld [vmem:[#allocation4 + $0x160] ss:$16 sps:$4 sm:$0xff]  }
 0x181   :  { %4241 = vmatpush2.bf16.msra.mxu0 %v6534_v2  ;;  %4129 = vmatprep.subr.bf16.mxu1 %v6539_v7 }
 0x182   :  { %4242 = vmatprep.subr.bf16.mxu0 %v6542_v35 }
 0x184   :  { %4130 = vmatpush2.bf16.msra.mxu1 %v6537_v58 }
 0x185   :  { %4243 = vmatpush2.bf16.msra.mxu0 %v6540_v46  ;;  %4131 = vmatprep.subr.bf16.mxu1 %v6545_v17 }
 0x186   :  { %1584 = vmatmul.mubr.bf16.gmra.mxu1 %v8364_v62  ;;  %4244 = vmatprep.subr.bf16.mxu0 %v6548_v25 }
 0x187   :  { %1697 = vmatmul.mubr.bf16.gmra.mxu0 %v8364_v62  ;;  %1593 = vmatprep.mubr.bf16.mxu1 %v8374_v14  ;;  %v6552_v62 = vld [vmem:[#allocation4 + $0x340] ss:$16 sps:$4 sm:$0xff]  }
 0x188   :  { %1706 = vmatprep.mubr.bf16.mxu0 %v8374_v14  ;;  %4132 = vmatpush2.bf16.msra.mxu1 %v6543_v33  ;;  %v6557_v14 = vld [vmem:[#allocation4 + $0x124] ss:$16 sps:$4 sm:$0xff]  }
 0x189   :  { %4245 = vmatpush2.bf16.msra.mxu0 %v6546_v43  ;;  %4133 = vmatprep.subr.bf16.mxu1 %v6551_v6 }
 0x18a   :  { %4246 = vmatprep.subr.bf16.mxu0 %v6554_v10 }
 0x18c   :  { %4134 = vmatpush2.bf16.msra.mxu1 %v6549_v54 }
 0x18d   :  { %4247 = vmatpush2.bf16.msra.mxu0 %v6552_v62  ;;  %4135 = vmatprep.subr.bf16.mxu1 %v6557_v14 }
 0x18e   :  { %1594 = vmatmul.mubr.bf16.gmra.mxu1 %v8376_v11  ;;  %4248 = vmatprep.subr.bf16.mxu0 %v6560_v12 }
 0x18f   :  { %1707 = vmatmul.mubr.bf16.gmra.mxu0 %v8376_v11  ;;  %v6563_v11 = vld [vmem:[#allocation4 + $0x104] ss:$16 sps:$4 sm:$0xff]  }
 0x190   :  { %4136 = vmatpush2.bf16.msra.mxu1 %v6555_v60 }
 0x191   :  { %4249 = vmatpush2.bf16.msra.mxu0 %v6558_v1  ;;  %4137 = vmatprep.subr.bf16.mxu1 %v6563_v11 }
 0x192   :  { %4250 = vmatprep.subr.bf16.mxu0 %v6566_v20 }
 0x194   :  { %4138 = vmatpush2.bf16.msra.mxu1 %v6561_v19 }
 0x195   :  { %4251 = vmatpush2.bf16.msra.mxu0 %v6564_v61  ;;  %4333 = vmatprep.subr.bf16.mxu1 %v6569_v52 }
 0x196   :  { %4446 = vmatprep.subr.bf16.mxu0 %v6572_v27 }
 0x1d1   :  { %v1299_v0 = vpop.f32.mrf.mxu1  ;;  %v1412_v48 = vpop.f32.mrf.mxu0 }
 0x1d2   :  { %v8440_v22 = vadd.f32 %v1299_v0, %v8423_v30  ;;  %v8443_v45 = vadd.f32 %v1412_v48, %v8428_v51 }
 0x1d3   :  { %v1301_v34 = vpop.f32.mrf.mxu1  ;;  %v1414_v8 = vpop.f32.mrf.mxu0 }
 0x1d4   :  { %v1717_v42 = vsub.f32 0.0, %v8440_v22  ;;  %v1719_v4 = vsub.f32 0.0, %v8443_v45  ;;  %v8448_v57 = vadd.f32 %v1301_v34, %v8432_v50  ;;  %v8451_v23 = vadd.f32 %v1414_v8, %v8437_v56 }
 0x1d5   :  { %v1303_v32 = vpop.f32.mrf.mxu1  ;;  %v1416_v5 = vpop.f32.mrf.mxu0 }
 0x1d6   :  { %v1845_v16 = vmul.f32 1.442695, %v1717_v42  ;;  %v1849_v28 = vmul.f32 1.442695, %v1719_v4  ;;  %v1718_v53 = vsub.f32 0.0, %v8448_v57  ;;  %v1720_v63 = vsub.f32 0.0, %v8451_v23 }
 0x1d7   :  { %v8456_v39 = vadd.f32 %v1303_v32, %v8423_v30  ;;  %v8459_v44 = vadd.f32 %v1416_v5, %v8428_v51  ;;  %v1305_v49 = vpop.f32.mrf.mxu1  ;;  %v1418_v38 = vpop.f32.mrf.mxu0 }
 0x1d8   :  { %7015 = vpow2.f32 %v1845_v16  ;;  %v1847_v13 = vmul.f32 1.442695, %v1718_v53  ;;  %v1851_v24 = vmul.f32 1.442695, %v1720_v63  ;;  %v8462_v26 = vadd.f32 %v1305_v49, %v8432_v50 }
 0x1d9   :  { %7017 = vpow2.f32 %v1849_v28  ;;  %v1725_v21 = vsub.f32 0.0, %v8456_v39  ;;  %v1727_v47 = vsub.f32 0.0, %v8459_v44  ;;  %v8467_v15 = vadd.f32 %v1418_v38, %v8437_v56 }
 0x1da   :  { %v1309_v41 = vpop.f32.mrf.mxu1  ;;  %7019 = vpow2.f32 %v1847_v13  ;;  %v1726_v55 = vsub.f32 0.0, %v8462_v26 }
 0x1db   :  { %v1422_v18 = vpop.f32.mrf.mxu0  ;;  %v8471_v29 = vadd.f32 %v1309_v41, %v8423_v30  ;;  %7021 = vpow2.f32 %v1851_v24  ;;  %v1861_v2 = vmul.f32 1.442695, %v1725_v21  ;;  %v1865_v7 = vmul.f32 1.442695, %v1727_v47 }
 0x1dc   :  { %v8474_v31 = vadd.f32 %v1422_v18, %v8428_v51  ;;  %v1728_v35 = vsub.f32 0.0, %v8467_v15  ;;  %v1311_v58 = vpop.f32.mrf.mxu1  ;;  %v1863_v17 = vmul.f32 1.442695, %v1726_v55 }
 0x1dd   :  { %v1424_v46 = vpop.f32.mrf.mxu0  ;;  %v1733_v33 = vsub.f32 0.0, %v8471_v29  ;;  %v8480_v43 = vadd.f32 %v1311_v58, %v8432_v50  ;;  %7023 = vpow2.f32 %v1861_v2 }
 0x1de   :  { %v1735_v25 = vsub.f32 0.0, %v8474_v31  ;;  %v1867_v6 = vmul.f32 1.442695, %v1728_v35  ;;  %v8483_v54 = vadd.f32 %v1424_v46, %v8437_v56  ;;  %v1313_v10 = vpop.f32.mrf.mxu1  ;;  %7025 = vpow2.f32 %v1865_v7 }
 0x1df   :  { %v1426_v62 = vpop.f32.mrf.mxu0  ;;  %v1877_v14 = vmul.f32 1.442695, %v1733_v33  ;;  %v1734_v60 = vsub.f32 0.0, %v8480_v43  ;;  %7027 = vpow2.f32 %v1863_v17  ;;  %v8488_v11 = vadd.f32 %v1313_v10, %v8423_v30 }
 0x1e0   :  { %v1881_v12 = vmul.f32 1.442695, %v1735_v25  ;;  %v1736_v1 = vsub.f32 0.0, %v8483_v54  ;;  %v8491_v20 = vadd.f32 %v1426_v62, %v8428_v51  ;;  %v1315_v19 = vpop.f32.mrf.mxu1  ;;  %7029 = vpow2.f32 %v1867_v6 }
 0x1e1   :  { %v1428_v61 = vpop.f32.mrf.mxu0  ;;  %v1879_v52 = vmul.f32 1.442695, %v1734_v60  ;;  %v8494_v27 = vadd.f32 %v1315_v19, %v8432_v50  ;;  %7031 = vpow2.f32 %v1877_v14  ;;  %v1741_v34 = vsub.f32 0.0, %v8488_v11 }
 0x1e2   :  { %v8497_v0 = vadd.f32 %v1428_v61, %v8437_v56  ;;  %v1883_v48 = vmul.f32 1.442695, %v1736_v1  ;;  %v1743_v8 = vsub.f32 0.0, %v8491_v20  ;;  %7033 = vpow2.f32 %v1881_v12 }
 0x1e3   :  { %v1742_v42 = vsub.f32 0.0, %v8494_v27  ;;  %7035 = vpow2.f32 %v1879_v52  ;;  %v1893_v5 = vmul.f32 1.442695, %v1741_v34 }
 0x1e4   :  { %v1897_v16 = vmul.f32 1.442695, %v1743_v8  ;;  %7037 = vpow2.f32 %v1883_v48  ;;  %v1744_v53 = vsub.f32 0.0, %v8497_v0 }
 0x1e5   :  { %v1895_v28 = vmul.f32 1.442695, %v1742_v42  ;;  %v7016_v38 = vpop.eup %7015  ;;  %7039 = vpow2.f32 %v1893_v5 }
 0x1e6   :  { %v1319_v4 = vpop.f32.mrf.mxu1  ;;  %v1432_v32 = vpop.f32.mrf.mxu0  ;;  %v2101_v24 = vadd.f32 1.0, %v7016_v38  ;;  %7041 = vpow2.f32 %v1897_v16  ;;  %v1899_v7 = vmul.f32 1.442695, %v1744_v53 }
 0x1e7   :  { %v7018_v13 = vpop.eup %7017  ;;  %7043 = vpow2.f32 %v1895_v28  ;;  %v8504_v17 = vadd.f32 %v1319_v4, %v8423_v30  ;;  %v8507_v25 = vadd.f32 %v1432_v32, %v8428_v51 }
 0x1e8   :  { %v1321_v63 = vpop.f32.mrf.mxu1  ;;  %v1434_v49 = vpop.f32.mrf.mxu0  ;;  %v2103_v18 = vadd.f32 1.0, %v7018_v13  ;;  %7045 = vrcp.f32 %v2101_v24 }
 0x1e9   :  { %v7020_v41 = vpop.eup %7019  ;;  %v1749_v61 = vsub.f32 0.0, %v8504_v17  ;;  %v1751_v8 = vsub.f32 0.0, %v8507_v25  ;;  %v8512_v42 = vadd.f32 %v1321_v63, %v8432_v50  ;;  %v8515_v5 = vadd.f32 %v1434_v49, %v8437_v56 }
 0x1ea   :  { %v1323_v21 = vpop.f32.mrf.mxu1  ;;  %v1436_v47 = vpop.f32.mrf.mxu0  ;;  %v2102_v2 = vadd.f32 1.0, %v7020_v41  ;;  %7047 = vrcp.f32 %v2103_v18 }
 0x1eb   :  { %v7022_v55 = vpop.eup %7021  ;;  %v8518_v38 = vadd.f32 %v1323_v21, %v8423_v30  ;;  %v1909_v41 = vmul.f32 1.442695, %v1749_v61  ;;  %v8521_v63 = vadd.f32 %v1436_v47, %v8428_v51  ;;  %v1913_v49 = vmul.f32 1.442695, %v1751_v8 }
 0x1ec   :  { %v1325_v35 = vpop.f32.mrf.mxu1  ;;  %v1438_v58 = vpop.f32.mrf.mxu0  ;;  %v2104_v46 = vadd.f32 1.0, %v7022_v55  ;;  %7049 = vrcp.f32 %v2102_v2  ;;  %v1752_v21 = vsub.f32 0.0, %v8515_v5 }
 0x1ed   :  { %v7024_v33 = vpop.eup %7023  ;;  %10657 = vst [vmem:[#allocation11_spill] sm:$0xff] %v8518_v38  ;;  %10658 = vst [vmem:[#allocation12_spill] sm:$0xff] %v8521_v63 }
 0x1ee   :  { %v1329_v6 = vpop.f32.mrf.mxu1  ;;  %v7026_v10 = vpop.eup %7025  ;;  %7051 = vrcp.f32 %v2104_v46  ;;  %v2109_v62 = vadd.f32 1.0, %v7024_v33 }
 0x1ef   :  { %v1442_v14 = vpop.f32.mrf.mxu0  ;;  %v7028_v12 = vpop.eup %7027  ;;  %v2111_v60 = vadd.f32 1.0, %v7026_v10  ;;  %7053 = vpow2.f32 %v1899_v7  ;;  %v1750_v7 = vsub.f32 0.0, %v8512_v42  ;;  %v8526_v10 = vadd.f32 %v1325_v35, %v8432_v50 }
 0x1f0   :  { %v7030_v1 = vpop.eup %7029  ;;  %7055 = vrcp.f32 %v2109_v62  ;;  %v2110_v19 = vadd.f32 1.0, %v7028_v12  ;;  %v1331_v52 = vpop.f32.mrf.mxu1 }
 0x1f1   :  { %v7032_v48 = vpop.eup %7031  ;;  %7057 = vrcp.f32 %v2111_v60  ;;  %v2112_v34 = vadd.f32 1.0, %v7030_v1  ;;  %v1444_v16 = vpop.f32.mrf.mxu0  ;;  %10659 = vst [vmem:[#allocation13_spill] sm:$0xff] %v8526_v10  ;;  %v1757_v60 = vsub.f32 0.0, %v8518_v38  ;;  %v8530_v1 = vadd.f32 %v1438_v58, %v8437_v56 }
 0x1f2   :  { %v7034_v4 = vpop.eup %7033  ;;  %7059 = vrcp.f32 %v2110_v19  ;;  %v2117_v32 = vadd.f32 1.0, %v7032_v48  ;;  %v1333_v18 = vpop.f32.mrf.mxu1  ;;  %v1759_v48 = vsub.f32 0.0, %v8521_v63  ;;  %v1915_v58 = vmul.f32 1.442695, %v1752_v21 }
 0x1f3   :  { %v7036_v28 = vpop.eup %7035  ;;  %7061 = vrcp.f32 %v2112_v34  ;;  %v2119_v53 = vadd.f32 1.0, %v7034_v4  ;;  %v1446_v62 = vpop.f32.mrf.mxu0  ;;  %10660 = vst [vmem:[#allocation14_spill] sm:$0xff] %v8530_v1  ;;  %v8536_v34 = vadd.f32 %v1329_v6, %v8423_v30  ;;  %v1911_v4 = vmul.f32 1.442695, %v1750_v7 }
 0x1f4   :  { %v7038_v13 = vpop.eup %7037  ;;  %7063 = vrcp.f32 %v2117_v32  ;;  %v2118_v24 = vadd.f32 1.0, %v7036_v28  ;;  %v1335_v35 = vpop.f32.mrf.mxu1  ;;  %v8541_v32 = vadd.f32 %v1442_v14, %v8428_v51  ;;  %v8553_v7 = vadd.f32 %v1444_v16, %v8437_v56 }
 0x1f5   :  { %v7040_v55 = vpop.eup %7039  ;;  %7065 = vrcp.f32 %v2119_v53  ;;  %v2120_v2 = vadd.f32 1.0, %v7038_v13  ;;  %10661 = vst [vmem:[#allocation15_spill] sm:$0xff] %v8536_v34  ;;  %v1758_v53 = vsub.f32 0.0, %v8526_v10  ;;  %v8547_v13 = vadd.f32 %v1331_v52, %v8432_v50 }
 0x1f6   :  { %v7042_v46 = vpop.eup %7041  ;;  %7067 = vrcp.f32 %v2118_v24  ;;  %v2125_v33 = vadd.f32 1.0, %v7040_v55  ;;  %10662 = vst [vmem:[#allocation16_spill] sm:$0xff] %v8541_v32  ;;  %v1448_v24 = vpop.f32.mrf.mxu0  ;;  %v1925_v55 = vmul.f32 1.442695, %v1757_v60  ;;  %10664 = vst [vmem:[#allocation18_spill] sm:$0xff] %v8553_v7  ;;  %v8557_v21 = vadd.f32 %v1333_v18, %v8423_v30 }
 0x1f7   :  { %v7044_v12 = vpop.eup %7043  ;;  %7069 = vrcp.f32 %v2120_v2  ;;  %v2127_v47 = vadd.f32 1.0, %v7042_v46  ;;  %10663 = vst [vmem:[#allocation17_spill] sm:$0xff] %v8547_v13  ;;  %v1760_v2 = vsub.f32 0.0, %v8530_v1  ;;  %v1929_v46 = vmul.f32 1.442695, %v1759_v48  ;;  %v8559_v52 = vpop.f32.mrf.mxu1 }
 0x1f8   :  { %v8532_v19 = vpop.eup %7045  ;;  %7071 = vrcp.f32 %v2125_v33  ;;  %v2126_v61 = vadd.f32 1.0, %v7044_v12  ;;  %v1765_v33 = vsub.f32 0.0, %v8536_v34  ;;  %10665 = vst [vmem:[#allocation19_spill] sm:$0xff] %v8557_v21  ;;  %v8563_v60 = vadd.f32 %v1446_v62, %v8428_v51  ;;  %v1452_v18 = vpop.f32.mrf.mxu0 }
 0x1f9   :  { %v8538_v8 = vpop.eup %7047  ;;  %7073 = vrcp.f32 %v2127_v47  ;;  %v8567_v48 = vadd.f32 %v1335_v35, %v8432_v50  ;;  %v1931_v40 = vmul.f32 1.442695, %v1760_v2  ;;  %v1773_v3 = vsub.f32 0.0, %v8557_v21 }
 0x1fa   :  { %v8543_v28 = vpop.eup %7049  ;;  %7075 = vrcp.f32 %v2126_v61  ;;  %10666 = vst [vmem:[#allocation20_spill] sm:$0xff] %v8563_v60  ;;  %v1927_v61 = vmul.f32 1.442695, %v1758_v53  ;;  %v1941_v62 = vmul.f32 1.442695, %v1765_v33  ;;  %v1775_v35 = vsub.f32 0.0, %v8563_v60 }
 0x1fb   :  { %v8549_v6 = vpop.eup %7051  ;;  %7077 = vpow2.f32 %v1909_v41  ;;  %v1767_v41 = vsub.f32 0.0, %v8541_v32  ;;  %10667 = vst [vmem:[#allocation21_spill] sm:$0xff] %v8567_v48  ;;  %v1774_v2 = vsub.f32 0.0, %v8567_v48  ;;  %v1957_v60 = vmul.f32 1.442695, %v1773_v3 }
 0x1fc   :  { %v7054_v14 = vpop.eup %7053  ;;  %7079 = vpow2.f32 %v1913_v49  ;;  %v1766_v49 = vsub.f32 0.0, %v8547_v13  ;;  %v8615_v1 = vadd.f32 %v8559_v52, %v8423_v30 }
 0x1fd   :  { %v7056_v12 = vpop.eup %7055  ;;  %v2128_v47 = vadd.f32 1.0, %v7054_v14  ;;  %7081 = vpow2.f32 %v1911_v4  ;;  %v1768_v4 = vsub.f32 0.0, %v8553_v7  ;;  %v1945_v37 = vmul.f32 1.442695, %v1767_v41 }
 0x1fe   :  { %v7058_v16 = vpop.eup %7057  ;;  %7083 = vpow2.f32 %v1915_v58  ;;  %v1341_v58 = vpop.f32.mrf.mxu1  ;;  %v8582_v7 = vadd.f32 %v1448_v24, %v8437_v56  ;;  %v1959_v48 = vmul.f32 1.442695, %v1774_v2  ;;  %v2365_v38 = vmul.f32 %v7056_v12, %v8456_v39 }
 0x1ff   :  { %v8569_v9 = vpop.eup %7059  ;;  %7085 = vrcp.f32 %v2128_v47  ;;  %v1943_v47 = vmul.f32 1.442695, %v1766_v49  ;;  %v1947_v21 = vmul.f32 1.442695, %v1768_v4  ;;  %v1961_v49 = vmul.f32 1.442695, %v1775_v35 }
 0x200   :  { %v8572_v14 = vpop.eup %7061  ;;  %7087 = vpow2.f32 %v1925_v55  ;;  %10668 = vst [vmem:[#allocation22_spill] sm:$0xff] %v8582_v7  ;;  %v8584_v55 = vpop.f32.mrf.mxu0  ;;  %v1776_v34 = vsub.f32 0.0, %v8582_v7  ;;  %v2357_v7 = vmul.f32 %v8532_v19, %v8440_v22  ;;  %v8621_v22 = vadd.f32 %v1452_v18, %v8428_v51 }
 0x201   :  { %v8575_v53 = vpop.eup %7063  ;;  %7089 = vpow2.f32 %v1929_v46  ;;  %v603_v46 = vsub.s32 4, %v7977_v36  ;;  %v8591_v13 = vpop.f32.mrf.mxu1  ;;  %v2359_v19 = vmul.f32 %v8538_v8, %v8443_v45  ;;  %v8636_v18 = vadd.f32 %v1341_v58, %v8432_v50 }
 0x202   :  { %v8578_v32 = vpop.eup %7065  ;;  %7091 = vpow2.f32 %v1927_v61  ;;  %10670 = vst [vmem:[#allocation24_spill] sm:$0xff] %v8621_v22  ;;  %v2366_v45 = vmul.f32 %v8569_v9, %v8462_v26  ;;  %v1781_v8 = vsub.f32 0.0, %v8615_v1  ;;  %v8650_v9 = vmul.f32 %v8575_v53, %v8471_v29 }
 0x203   :  { %v8586_v33 = vpop.eup %7067  ;;  %7093 = vpow2.f32 %v1931_v40  ;;  %v8598_v40 = vpop.f32.mrf.mxu0  ;;  %v1782_v29 = vsub.f32 0.0, %v8636_v18 }
 0x204   :  { %v8589_v41 = vpop.eup %7069  ;;  %7095 = vpow2.f32 %v1941_v62  ;;  %v8603_v62 = vrot.slane %v8418_v59, %v603_v46  ;;  %v8605_v63 = vpop.f32.mrf.mxu1 }
 0x205   :  { %v8593_v61 = vpop.eup %7071  ;;  %7097 = vpow2.f32 %v1945_v37  ;;  %v8617_v37 = vpop.f32.mrf.mxu0 }
 0x206   :  { %v8595_v24 = vpop.eup %7073  ;;  %7099 = vpow2.f32 %v1943_v47  ;;  %10669 = vst [vmem:[#allocation23_spill] sm:$0xff] %v8603_v62  ;;  %v2367_v47 = vmul.f32 %v7058_v16, %v8459_v44  ;;  %v8629_v12 = vpop.f32.mrf.mxu1  ;;  %v2360_v44 = vmul.f32 %v8549_v6, %v8451_v23  ;;  %v8633_v16 = vpack.c.bf16 %v2365_v38, %v2357_v7 }
 0x207   :  { %v8600_v4 = vpop.eup %7075  ;;  %7101 = vpow2.f32 %v1947_v21  ;;  %v1783_v38 = vsub.f32 0.0, %v8621_v22  ;;  %v2368_v6 = vmul.f32 %v8572_v14, %v8467_v15  ;;  %v1973_v14 = vmul.f32 1.442695, %v1781_v8 }
 0x208   :  { %v7078_v3 = vpop.eup %7077  ;;  %7103 = vpow2.f32 %v1957_v60  ;;  %v1963_v60 = vmul.f32 1.442695, %v1776_v34  ;;  %v2358_v34 = vmul.f32 %v8543_v28, %v8448_v57  ;;  %10671 = vst [vmem:[#allocation25_spill] sm:$0xff] %v8633_v16  ;;  %v8641_v28 = vpop.f32.mrf.mxu0 }
 0x209   :  { %v7080_v2 = vpop.eup %7079  ;;  %v2133_v21 = vadd.f32 1.0, %v7078_v3  ;;  %7105 = vpow2.f32 %v1961_v49  ;;  %v8643_v3 = vpack.c.bf16 %v2367_v47, %v2359_v19  ;;  %v1351_v7 = vpop.f32.mrf.mxu1  ;;  %v8654_v47 = vadd.f32 %v8584_v55, %v8437_v56 }
 0x20a   :  { %v7082_v46 = vpop.eup %7081  ;;  %v2135_v62 = vadd.f32 1.0, %v7080_v2  ;;  %7107 = vpow2.f32 %v1959_v48  ;;  %v8658_v2 = vadd.f32 %v8591_v13, %v8423_v30  ;;  %v1464_v53 = vpop.f32.mrf.mxu0  ;;  %v1977_v55 = vmul.f32 1.442695, %v1783_v38 }
 0x20b   :  { %v7084_v35 = vpop.eup %7083  ;;  %7109 = vrcp.f32 %v2133_v21  ;;  %v2134_v10 = vadd.f32 1.0, %v7082_v46  ;;  %10672 = vst [vmem:[#allocation26_spill] sm:$0xff] %v8643_v3  ;;  %v8667_v13 = vmul.f32 %v8586_v33, %v8480_v43  ;;  %v8677_v43 = vadd.f32 %v8605_v63, %v8432_v50 }
 0x20c   :  { %v8623_v39 = vpop.eup %7085  ;;  %7111 = vrcp.f32 %v2135_v62  ;;  %v2136_v52 = vadd.f32 1.0, %v7084_v35  ;;  %10673 = vst [vmem:[#allocation27_spill] sm:$0xff] %v8658_v2  ;;  %v1466_v33 = vpop.f32.mrf.mxu0 }
 0x20d   :  { %v7088_v48 = vpop.eup %7087  ;;  %7113 = vrcp.f32 %v2134_v10 }
 0x20e   :  { %v7090_v49 = vpop.eup %7089  ;;  %7115 = vrcp.f32 %v2136_v52  ;;  %v2141_v57 = vadd.f32 1.0, %v7088_v48 }
 0x20f   :  { %v7092_v62 = vpop.eup %7091  ;;  %v2143_v23 = vadd.f32 1.0, %v7090_v49  ;;  %7117 = vpow2.f32 %v1963_v60  ;;  %v8663_v60 = vmul.f32 %v8578_v32, %v8474_v31  ;;  %v8671_v49 = vadd.f32 %v8598_v40, %v8428_v51  ;;  %v6567_v40 = vld [vmem:[#allocation4 + $0x4e0] ss:$16 sps:$4 sm:$0xff]  }
 0x210   :  { %v7094_v10 = vpop.eup %7093  ;;  %7119 = vrcp.f32 %v2141_v57  ;;  %v2142_v26 = vadd.f32 1.0, %v7092_v62  ;;  %v1353_v57 = vpop.f32.mrf.mxu1  ;;  %v1784_v31 = vsub.f32 0.0, %v8654_v47  ;;  %v1789_v32 = vsub.f32 0.0, %v8658_v2 }
 0x211   :  { %v7096_v58 = vpop.eup %7095  ;;  %7121 = vrcp.f32 %v2143_v23  ;;  %v2144_v35 = vadd.f32 1.0, %v7094_v10  ;;  %v8679_v10 = vpack.c.bf16 %v2366_v45, %v2358_v34  ;;  %v8692_v34 = vadd.f32 %v8629_v12, %v8423_v30  ;;  %v6573_v12 = vld [vmem:[#allocation4 + $0x4c0] ss:$16 sps:$4 sm:$0xff]  }
 0x212   :  { %v7098_v21 = vpop.eup %7097  ;;  %7123 = vrcp.f32 %v2142_v26  ;;  %v2149_v15 = vadd.f32 1.0, %v7096_v58  ;;  %v1355_v45 = vpop.f32.mrf.mxu1 }
 0x213   :  { %v7100_v46 = vpop.eup %7099  ;;  %7125 = vrcp.f32 %v2144_v35  ;;  %v2151_v19 = vadd.f32 1.0, %v7098_v21  ;;  %10674 = vst [vmem:[#allocation28_spill] sm:$0xff] %v8679_v10  ;;  %v8683_v35 = vadd.f32 %v8617_v37, %v8437_v56  ;;  %v8685_v21 = vpack.c.bf16 %v2368_v6, %v2360_v44  ;;  %10676 = vst [vmem:[#allocation30_spill] sm:$0xff] %v8692_v34  ;;  %4139 = vmatprep.mubr.bf16.mxu1 %v8679_v10 }
 0x214   :  { %v7102_v52 = vpop.eup %7101  ;;  %7127 = vrcp.f32 %v2149_v15  ;;  %v2150_v48 = vadd.f32 1.0, %v7100_v46  ;;  %v6570_v15 = vld [vmem:[#allocation4 + $0x6e0] ss:$16 sps:$4 sm:$0xff]   ;;  %v6575_v46 = vld [vmem:[#allocation4 + $0x4c4] ss:$16 sps:$4 sm:$0xff]   ;;  %v8699_v44 = vmul.f32 %v8589_v41, %v8483_v54  ;;  %4140 = vmatmul.mubr.bf16.vlgmr.msra.gmra.mxu1 %v8633_v16  ;;  %v8711_v54 = vadd.f32 %v1351_v7, %v8432_v50  ;;  %v1468_v41 = vpop.f32.mrf.mxu0 }
 0x215   :  { %v7104_v8 = vpop.eup %7103  ;;  %7129 = vrcp.f32 %v2151_v19  ;;  %v2152_v62 = vadd.f32 1.0, %v7102_v52  ;;  %10675 = vst [vmem:[#allocation29_spill] sm:$0xff] %v8685_v21  ;;  %v1791_v52 = vsub.f32 0.0, %v8671_v49  ;;  %v1975_v6 = vmul.f32 1.442695, %v1782_v29  ;;  %4252 = vmatprep.mubr.bf16.mxu0 %v8685_v21  ;;  %4334 = vmatpush1.bf16.msra.mxu1 %v6567_v40  ;;  %v1359_v10 = vpop.f32.mrf.mxu1 }
 0x216   :  { %v7106_v23 = vpop.eup %7105  ;;  %7131 = vrcp.f32 %v2150_v48  ;;  %v2157_v38 = vadd.f32 1.0, %v7104_v8  ;;  %v6578_v48 = vld [vmem:[#allocation4 + $0x6c4] ss:$16 sps:$4 sm:$0xff]   ;;  %v8703_v8 = vadd.f32 %v8641_v28, %v8428_v51  ;;  %10678 = vst [vmem:[#allocation32_spill] sm:$0xff] %v8711_v54  ;;  %4253 = vmatmul.mubr.bf16.vlgmr.msra.gmra.mxu0 %v8643_v3  ;;  %v6576_v28 = vld [vmem:[#allocation4 + $0x6c0] ss:$16 sps:$4 sm:$0xff]   ;;  %4335 = vmatprep.subr.bf16.mxu1 %v6575_v46 }
 0x217   :  { %v7108_v26 = vpop.eup %7107  ;;  %7133 = vrcp.f32 %v2152_v62  ;;  %v2159_v58 = vadd.f32 1.0, %v7106_v23  ;;  %v1979_v23 = vmul.f32 1.442695, %v1784_v31  ;;  %v8721_v31 = vadd.f32 %v1353_v57, %v8423_v30  ;;  %4447 = vmatpush1.bf16.msra.mxu0 %v6570_v15  ;;  %v6581_v7 = vld [vmem:[#allocation4 + $0x4a4] ss:$16 sps:$4 sm:$0xff]   ;;  %v1361_v2 = vpop.f32.mrf.mxu1 }
 0x218   :  { %v8687_v19 = vpop.eup %7109  ;;  %7135 = vrcp.f32 %v2157_v38  ;;  %v2158_v63 = vadd.f32 1.0, %v7108_v26  ;;  %10677 = vst [vmem:[#allocation31_spill] sm:$0xff] %v8703_v8  ;;  %v1790_v38 = vsub.f32 0.0, %v8677_v43  ;;  %v1792_v26 = vsub.f32 0.0, %v8683_v35  ;;  %4448 = vmatprep.subr.bf16.mxu0 %v6578_v48  ;;  %v6579_v15 = vld [vmem:[#allocation4 + $0x4a0] ss:$16 sps:$4 sm:$0xff]   ;;  %v1472_v48 = vpop.f32.mrf.mxu0 }
 0x219   :  { %v8695_v37 = vpop.eup %7111  ;;  %7137 = vrcp.f32 %v2159_v58  ;;  %v8718_v58 = vadd.f32 %v1464_v53, %v8437_v56  ;;  %10680 = vst [vmem:[#allocation34_spill] sm:$0xff] %v8721_v31  ;;  %v1989_v3 = vmul.f32 1.442695, %v1789_v32  ;;  %v1993_v40 = vmul.f32 1.442695, %v1791_v52  ;;  %4336 = vmatpush1.bf16.msra.mxu1 %v6573_v12 }
 0x21a   :  { %v8707_v62 = vpop.eup %7113  ;;  %7139 = vrcp.f32 %v2158_v63  ;;  %v6584_v63 = vld [vmem:[#allocation4 + $0x6a4] ss:$16 sps:$4 sm:$0xff]   ;;  %v1797_v21 = vsub.f32 0.0, %v8692_v34  ;;  %v1799_v53 = vsub.f32 0.0, %v8703_v8  ;;  %v8728_v57 = vadd.f32 %v1466_v33, %v8428_v51  ;;  %v6582_v34 = vld [vmem:[#allocation4 + $0x6a0] ss:$16 sps:$4 sm:$0xff]   ;;  %4337 = vmatprep.subr.bf16.mxu1 %v6581_v7 }
 0x21b   :  { %v8714_v29 = vpop.eup %7115  ;;  %7141 = vpow2.f32 %v1973_v14  ;;  %10679 = vst [vmem:[#allocation33_spill] sm:$0xff] %v8718_v58  ;;  %v1798_v32 = vsub.f32 0.0, %v8711_v54  ;;  %v8734_v52 = vadd.f32 %v1355_v45, %v8432_v50  ;;  %v1800_v33 = vsub.f32 0.0, %v8718_v58  ;;  %4449 = vmatpush1.bf16.msra.mxu0 %v6576_v28 }
 0x21c   :  { %v7118_v16 = vpop.eup %7117  ;;  %7143 = vpow2.f32 %v1977_v55  ;;  %v1991_v55 = vmul.f32 1.442695, %v1790_v38  ;;  %v1805_v8 = vsub.f32 0.0, %v8721_v31  ;;  %v2382_v45 = vmul.f32 %v8600_v4, %v8494_v27  ;;  %4450 = vmatprep.subr.bf16.mxu0 %v6584_v63 }
 0x21d   :  { %v8724_v14 = vpop.eup %7119  ;;  %v2160_v22 = vadd.f32 1.0, %v7118_v16  ;;  %7145 = vpow2.f32 %v1975_v6  ;;  %v1995_v6 = vmul.f32 1.442695, %v1792_v26  ;;  %v2384_v12 = vmul.f32 %v8623_v39, %v8497_v0  ;;  %v8757_v39 = vpop.f32.mrf.mxu0  ;;  %4338 = vmatpush1.bf16.msra.mxu1 %v6579_v15 }
 0x21e   :  { %v8730_v46 = vpop.eup %7121  ;;  %7147 = vpow2.f32 %v1979_v23  ;;  %v6587_v23 = vld [vmem:[#allocation4 + $0x484] ss:$16 sps:$4 sm:$0xff]   ;;  %v2005_v54 = vmul.f32 1.442695, %v1797_v21  ;;  %v2381_v28 = vmul.f32 %v8593_v61, %v8488_v11  ;;  %v2009_v7 = vmul.f32 1.442695, %v1799_v53 }
 0x21f   :  { %v8736_v16 = vpop.eup %7123  ;;  %7149 = vrcp.f32 %v2160_v22  ;;  %v6590_v22 = vld [vmem:[#allocation4 + $0x684] ss:$16 sps:$4 sm:$0xff]   ;;  %v1807_v31 = vsub.f32 0.0, %v8728_v57  ;;  %v2007_v27 = vmul.f32 1.442695, %v1798_v32  ;;  %v1806_v0 = vsub.f32 0.0, %v8734_v52  ;;  %4451 = vmatpush1.bf16.msra.mxu0 %v6582_v34  ;;  %4339 = vmatprep.subr.bf16.mxu1 %v6587_v23 }
 0x220   :  { %v8740_v38 = vpop.eup %7125  ;;  %7151 = vpow2.f32 %v1989_v3  ;;  %v8755_v4 = vadd.f32 %v1468_v41, %v8437_v56  ;;  %v6585_v3 = vld [vmem:[#allocation4 + $0x480] ss:$16 sps:$4 sm:$0xff]   ;;  %v2383_v11 = vmul.f32 %v8595_v24, %v8491_v20  ;;  %v2011_v61 = vmul.f32 1.442695, %v1800_v33  ;;  %4452 = vmatprep.subr.bf16.mxu0 %v6590_v22  ;;  %v6593_v20 = vld [vmem:[#allocation4 + $0x464] ss:$16 sps:$4 sm:$0xff]   ;;  %v8787_v33 = vpop.f32.mrf.mxu0 }
 0x221   :  { %v8746_v26 = vpop.eup %7127  ;;  %7153 = vpow2.f32 %v1993_v40  ;;  %v2021_v63 = vmul.f32 1.442695, %v1805_v8  ;;  %v6588_v40 = vld [vmem:[#allocation4 + $0x680] ss:$16 sps:$4 sm:$0xff]   ;;  %v8766_v41 = vadd.f32 %v1359_v10, %v8423_v30  ;;  %v8771_v15 = vpack.c.bf16 %v2382_v45, %v8667_v13  ;;  %4340 = vmatpush1.bf16.msra.mxu1 %v6585_v3 }
 0x222   :  { %v8751_v58 = vpop.eup %7129  ;;  %7155 = vpow2.f32 %v1991_v55  ;;  %v8768_v55 = vpop.f32.mrf.mxu1  ;;  %v8774_v32 = vpack.c.bf16 %v2384_v12, %v8699_v44  ;;  %v2025_v34 = vmul.f32 1.442695, %v1807_v31  ;;  %v8779_v8 = vadd.f32 %v1472_v48, %v8428_v51  ;;  %v6591_v23 = vld [vmem:[#allocation4 + $0x460] ss:$16 sps:$4 sm:$0xff]   ;;  %4341 = vmatprep.subr.bf16.mxu1 %v6593_v20 }
 0x223   :  { %v8759_v21 = vpop.eup %7131  ;;  %7157 = vpow2.f32 %v1995_v6  ;;  %10681 = vst [vmem:[#allocation35_spill] sm:$0xff] %v8766_v41  ;;  %10682 = vst [vmem:[#allocation36_spill] sm:$0xff] %v8771_v15  ;;  %v8782_v10 = vadd.f32 %v1361_v2, %v8432_v50  ;;  %v2023_v13 = vmul.f32 1.442695, %v1806_v0  ;;  %v1808_v44 = vsub.f32 0.0, %v8755_v4  ;;  %4149 = vmatprep.mubr.bf16.mxu1 %v8771_v15  ;;  %4453 = vmatpush1.bf16.msra.mxu0 %v6588_v40 }
 0x224   :  { %v8763_v53 = vpop.eup %7133  ;;  %7159 = vpow2.f32 %v2005_v54  ;;  %10683 = vst [vmem:[#allocation37_spill] sm:$0xff] %v8774_v32  ;;  %10684 = vst [vmem:[#allocation38_spill] sm:$0xff] %v8779_v8  ;;  %v6596_v54 = vld [vmem:[#allocation4 + $0x664] ss:$16 sps:$4 sm:$0xff]   ;;  %4262 = vmatprep.mubr.bf16.mxu0 %v8774_v32  ;;  %v8792_v31 = vpack.c.bf16 %v2381_v28, %v8650_v9  ;;  %v8797_v2 = vpack.c.bf16 %v2383_v11, %v8663_v60  ;;  %v10687_v45 = vsub.s32 6, %v7977_v36  ;;  %v1365_v0 = vpop.f32.mrf.mxu1 }
 0x225   :  { %v8776_v24 = vpop.eup %7135  ;;  %7161 = vpow2.f32 %v2009_v7  ;;  %v6594_v22 = vld [vmem:[#allocation4 + $0x660] ss:$16 sps:$4 sm:$0xff]   ;;  %v10688_v7 = vsub.s32 5, %v7977_v36  ;;  %v1813_v60 = vsub.f32 0.0, %v8766_v41  ;;  %v10689_v3 = vsub.s32 7, %v7977_v36  ;;  %4454 = vmatprep.subr.bf16.mxu0 %v6596_v54  ;;  %4342 = vmatpush1.bf16.msra.mxu1 %v6591_v23 }
 0x226   :  { %v8784_v6 = vpop.eup %7137  ;;  %7163 = vpow2.f32 %v2007_v27  ;;  %10685 = vst [vmem:[#allocation39_spill] sm:$0xff] %v8792_v31  ;;  %10686 = vst [vmem:[#allocation40_spill] sm:$0xff] %v8797_v2  ;;  %v8802_v12 = vrot.slane %v8418_v59, %v10687_v45  ;;  %v8811_v27 = vmul.f32 %v8687_v19, %v8504_v17  ;;  %4150 = vmatmul.mubr.bf16.gmra.mxu1 %v8792_v31  ;;  %v6602_v40 = vld [vmem:[#allocation4 + $0x644] ss:$16 sps:$4 sm:$0xff]   ;;  %v1815_v17 = vsub.f32 0.0, %v8779_v8 }
 0x227   :  { %v8794_v48 = vpop.eup %7139  ;;  %7165 = vpow2.f32 %v2011_v61  ;;  %v8807_v9 = vrot.slane %v8418_v59, %v10688_v7  ;;  %v8818_v11 = vrot.slane %v8418_v59, %v10689_v3  ;;  %v6599_v61 = vld [vmem:[#allocation4 + $0x444] ss:$16 sps:$4 sm:$0xff]   ;;  %v1814_v19 = vsub.f32 0.0, %v8782_v10  ;;  %4263 = vmatmul.mubr.bf16.gmra.mxu0 %v8797_v2  ;;  %v1478_v3 = vpop.f32.mrf.mxu0  ;;  %v6597_v36 = vld [vmem:[#allocation4 + $0x440] ss:$16 sps:$4 sm:$0xff]  }
 0x228   :  { %v7142_v28 = vpop.eup %7141  ;;  %7167 = vpow2.f32 %v2021_v63  ;;  %v2027_v20 = vmul.f32 1.442695, %v1808_v44  ;;  %v8825_v59 = vadd.f32 %v8757_v39, %v8437_v56  ;;  %4455 = vmatpush1.bf16.msra.mxu0 %v6594_v22  ;;  %v6605_v44 = vld [vmem:[#allocation4 + $0x424] ss:$16 sps:$4 sm:$0xff]   ;;  %v2392_v39 = vmul.f32 %v8714_v29, %v8515_v5  ;;  %4343 = vmatprep.subr.bf16.mxu1 %v6599_v61 }
 0x229   :  { %v7144_v45 = vpop.eup %7143  ;;  %v2165_v7 = vadd.f32 1.0, %v7142_v28  ;;  %7169 = vpow2.f32 %v2025_v34  ;;  %v8829_v34 = vmul.f32 %v8695_v37, %v8507_v25  ;;  %v2390_v28 = vmul.f32 %v8707_v62, %v8512_v42  ;;  %v8839_v25 = vpop.f32.mrf.mxu1  ;;  %4456 = vmatprep.subr.bf16.mxu0 %v6602_v40  ;;  %v6608_v42 = vld [vmem:[#allocation4 + $0x624] ss:$16 sps:$4 sm:$0xff]   ;;  %v10690_v62 = vld [vmem:[#allocation13_spill] sm:$0xff]  ;;  %4344 = vmatpush1.bf16.msra.mxu1 %v6597_v36 }
 0x22a   :  { %v7146_v63 = vpop.eup %7145  ;;  %v2167_v31 = vadd.f32 1.0, %v7144_v45  ;;  %7171 = vpow2.f32 %v2023_v13  ;;  %v6600_v13 = vld [vmem:[#allocation4 + $0x640] ss:$16 sps:$4 sm:$0xff]   ;;  %v8837_v15 = vmul.f32 1.442695, %v1813_v60  ;;  %v2398_v23 = vmul.f32 %v8736_v16, %v10690_v62  ;;  %v8850_v60 = vpop.f32.mrf.mxu0  ;;  %4345 = vmatprep.subr.bf16.mxu1 %v6605_v44 }
 0x22b   :  { %v7148_v32 = vpop.eup %7147  ;;  %7173 = vrcp.f32 %v2165_v7  ;;  %v2166_v54 = vadd.f32 1.0, %v7146_v63  ;;  %v8843_v22 = vmul.f32 1.442695, %v1815_v17  ;;  %v8845_v7 = vmul.f32 1.442695, %v1814_v19  ;;  %v10691_v5 = vld [vmem:[#allocation14_spill] sm:$0xff] }
 0x22c   :  { %v8833_v45 = vpop.eup %7149  ;;  %7175 = vrcp.f32 %v2167_v31  ;;  %v2168_v2 = vadd.f32 1.0, %v7148_v32  ;;  %v2400_v29 = vmul.f32 %v8740_v38, %v10691_v5  ;;  %v1816_v31 = vsub.f32 0.0, %v8825_v59  ;;  %4457 = vmatpush1.bf16.msra.mxu0 %v6600_v13  ;;  %v6603_v38 = vld [vmem:[#allocation4 + $0x420] ss:$16 sps:$4 sm:$0xff]   ;;  %v10693_v19 = vld [vmem:[#allocation11_spill] sm:$0xff] }
 0x22d   :  { %v7152_v37 = vpop.eup %7151  ;;  %7177 = vrcp.f32 %v2166_v54  ;;  %v8854_v16 = vadd.f32 %v8768_v55, %v8423_v30  ;;  %v8858_v17 = vadd.f32 %v8787_v33, %v8428_v51  ;;  %v2397_v54 = vmul.f32 %v8724_v14, %v10693_v19  ;;  %v6606_v55 = vld [vmem:[#allocation4 + $0x620] ss:$16 sps:$4 sm:$0xff]   ;;  %4458 = vmatprep.subr.bf16.mxu0 %v6608_v42  ;;  %v6611_v41 = vld [vmem:[#allocation4 + $0x404] ss:$16 sps:$4 sm:$0xff]   ;;  %v8874_v19 = vpop.f32.mrf.mxu0  ;;  %4346 = vmatpush1.bf16.msra.mxu1 %v6603_v38 }
 0x22e   :  { %v7154_v63 = vpop.eup %7153  ;;  %7179 = vrcp.f32 %v2168_v2  ;;  %v2173_v32 = vadd.f32 1.0, %v7152_v37  ;;  %v8863_v62 = vadd.f32 %v1365_v0, %v8432_v50  ;;  %v10694_v33 = vld [vmem:[#allocation12_spill] sm:$0xff]  ;;  %v8869_v5 = vpack.c.bf16 %v2398_v23, %v2390_v28  ;;  %4347 = vmatprep.subr.bf16.mxu1 %v6611_v41 }
 0x22f   :  { %v7156_v61 = vpop.eup %7155  ;;  %v2175_v40 = vadd.f32 1.0, %v7154_v63  ;;  %7181 = vpow2.f32 %v2027_v20  ;;  %10692 = vst [vmem:[#allocation13_spill] sm:$0xff] %v8854_v16  ;;  %v8865_v20 = vpop.f32.mrf.mxu1  ;;  %v2399_v36 = vmul.f32 %v8730_v46, %v10694_v33  ;;  %v6614_v14 = vld [vmem:[#allocation4 + $0x604] ss:$16 sps:$4 sm:$0xff]   ;;  %v8872_v0 = vadd.f32 %v1478_v3, %v8437_v56  ;;  %v6609_v23 = vld [vmem:[#allocation4 + $0x400] ss:$16 sps:$4 sm:$0xff]  }
 0x230   :  { %v7158_v2 = vpop.eup %7157  ;;  %7183 = vrcp.f32 %v2173_v32  ;;  %v2174_v37 = vadd.f32 1.0, %v7156_v61  ;;  %10695 = vst [vmem:[#allocation14_spill] sm:$0xff] %v8869_v5  ;;  %v8876_v44 = vpack.c.bf16 %v2400_v29, %v2392_v39  ;;  %v1821_v46 = vsub.f32 0.0, %v8854_v16  ;;  %4159 = vmatprep.mubr.bf16.mxu1 %v8869_v5  ;;  %4459 = vmatpush1.bf16.msra.mxu0 %v6606_v55  ;;  %v6612_v29 = vld [vmem:[#allocation4 + $0x600] ss:$16 sps:$4 sm:$0xff]   ;;  %v10699_v5 = vld [vmem:[#allocation15_spill] sm:$0xff]  ;;  %v1486_v55 = vpop.f32.mrf.mxu0 }
 0x231   :  { %v7160_v63 = vpop.eup %7159  ;;  %7185 = vrcp.f32 %v2175_v40  ;;  %v2176_v13 = vadd.f32 1.0, %v7158_v2  ;;  %v1823_v28 = vsub.f32 0.0, %v8858_v17  ;;  %v1822_v3 = vsub.f32 0.0, %v8863_v62  ;;  %4460 = vmatprep.subr.bf16.mxu0 %v6614_v14  ;;  %4348 = vmatpush1.bf16.msra.mxu1 %v6609_v23 }
 0x232   :  { %v7162_v32 = vpop.eup %7161  ;;  %7187 = vrcp.f32 %v2174_v37  ;;  %v2181_v61 = vadd.f32 1.0, %v7160_v63  ;;  %10696 = vst [vmem:[#allocation11_spill] sm:$0xff] %v8876_v44  ;;  %v8882_v37 = vpop.f32.mrf.mxu1  ;;  %4272 = vmatprep.mubr.bf16.mxu0 %v8876_v44  ;;  %v8886_v39 = vpack.c.bf16 %v2397_v54, %v8811_v27  ;;  %v6617_v63 = vld [vmem:[#allocation4 + $0x5e4] ss:$16 sps:$4 sm:$0xff]   ;;  %v8888_v38 = vmul.f32 1.442695, %v1816_v31 }
 0x233   :  { %v7164_v42 = vpop.eup %7163  ;;  %7189 = vrcp.f32 %v2176_v13  ;;  %v2183_v8 = vadd.f32 1.0, %v7162_v32  ;;  %v8891_v32 = vpack.c.bf16 %v2399_v36, %v8829_v34  ;;  %v8895_v44 = vmul.f32 %v8746_v26, %v10699_v5  ;;  %v6618_v31 = vld [vmem:[#allocation4 + $0x7e0] ss:$16 sps:$4 sm:$0xff]   ;;  %v6623_v26 = vld [vmem:[#allocation4 + $0x5c4] ss:$16 sps:$4 sm:$0xff]   ;;  %4349 = vmatprep.subr.bf16.mxu1 %v6617_v63 }
 0x234   :  { %v7166_v40 = vpop.eup %7165  ;;  %7191 = vrcp.f32 %v2181_v61  ;;  %v2182_v2 = vadd.f32 1.0, %v7164_v42  ;;  %10697 = vst [vmem:[#allocation12_spill] sm:$0xff] %v8886_v39  ;;  %v6620_v61 = vld [vmem:[#allocation4 + $0x7e4] ss:$16 sps:$4 sm:$0xff]   ;;  %v1824_v54 = vsub.f32 0.0, %v8872_v0  ;;  %4160 = vmatmul.mubr.bf16.gmra.mxu1 %v8886_v39  ;;  %v8903_v36 = vadd.f32 %v8839_v25, %v8423_v30  ;;  %4461 = vmatpush1.bf16.msra.mxu0 %v6612_v29 }
 0x235   :  { %v7168_v33 = vpop.eup %7167  ;;  %7193 = vrcp.f32 %v2183_v8  ;;  %v2184_v13 = vadd.f32 1.0, %v7166_v40  ;;  %10698 = vst [vmem:[#allocation41_spill] sm:$0xff] %v8891_v32  ;;  %v6615_v8 = vld [vmem:[#allocation4 + $0x5e0] ss:$16 sps:$4 sm:$0xff]   ;;  %v8899_v41 = vmul.f32 1.442695, %v1821_v46  ;;  %4273 = vmatmul.mubr.bf16.gmra.mxu0 %v8891_v32  ;;  %4462 = vmatprep.subr.bf16.mxu0 %v6620_v61  ;;  %v8928_v63 = vadd.f32 %v8865_v20, %v8432_v50 }
 0x236   :  { %v7170_v42 = vpop.eup %7169  ;;  %7195 = vrcp.f32 %v2182_v2  ;;  %v2189_v27 = vadd.f32 1.0, %v7168_v33  ;;  %10700 = vst [vmem:[#allocation15_spill] sm:$0xff] %v8903_v36  ;;  %v8908_v2 = vmul.f32 1.442695, %v1823_v28  ;;  %v8910_v33 = vmul.f32 1.442695, %v1822_v3  ;;  %4350 = vmatpush2.bf16.msra.mxu1 %v6615_v8 }
 0x237   :  { %v7172_v40 = vpop.eup %7171  ;;  %7197 = vrcp.f32 %v2184_v13  ;;  %v2191_v34 = vadd.f32 1.0, %v7170_v42  ;;  %v1375_v13 = vpop.f32.mrf.mxu1  ;;  %v10701_v42 = vld [vmem:[#allocation17_spill] sm:$0xff]  ;;  %v10702_v39 = vld [vmem:[#allocation18_spill] sm:$0xff]  ;;  %v8924_v29 = vmul.f32 1.442695, %v1824_v54  ;;  %v1829_v54 = vsub.f32 0.0, %v8903_v36  ;;  %4351 = vmatprep.subr.bf16.mxu1 %v6623_v26 }
 0x238   :  { %v8906_v5 = vpop.eup %7173  ;;  %7199 = vrcp.f32 %v2189_v27  ;;  %v2190_v14 = vadd.f32 1.0, %v7172_v40  ;;  %v2406_v25 = vmul.f32 %v8759_v21, %v10701_v42  ;;  %v2408_v23 = vmul.f32 %v8763_v53, %v10702_v39  ;;  %v6626_v28 = vld [vmem:[#allocation4 + $0x7c4] ss:$16 sps:$4 sm:$0xff]   ;;  %v1488_v53 = vpop.f32.mrf.mxu0  ;;  %v10705_v40 = vld [vmem:[#allocation21_spill] sm:$0xff]  ;;  %v6621_v20 = vld [vmem:[#allocation4 + $0x5c0] ss:$16 sps:$4 sm:$0xff]   ;;  %4463 = vmatpush2.bf16.msra.mxu0 %v6618_v31 }
 0x239   :  { %v8912_v46 = vpop.eup %7175  ;;  %7201 = vrcp.f32 %v2191_v34  ;;  %v8920_v27 = vadd.f32 %v8850_v60, %v8428_v51  ;;  %v8932_v21 = vadd.f32 %v8874_v19, %v8437_v56  ;;  %v10704_v60 = vld [vmem:[#allocation19_spill] sm:$0xff]  ;;  %v2414_v34 = vmul.f32 %v8794_v48, %v10705_v40  ;;  %v10706_v42 = vld [vmem:[#allocation20_spill] sm:$0xff]  ;;  %v10707_v32 = vld [vmem:[#allocation22_spill] sm:$0xff]  ;;  %v1525_v48 = vpop.f32.mrf.mxu1  ;;  %4464 = vmatprep.subr.bf16.mxu0 %v6626_v28 }
 0x23a   :  { %v8922_v3 = vpop.eup %7177  ;;  %7203 = vrcp.f32 %v2190_v14  ;;  %v8938_v61 = vmul.f32 %v8776_v24, %v10704_v60  ;;  %v2415_v19 = vmul.f32 %v8784_v6, %v10706_v42  ;;  %v2416_v16 = vmul.f32 %v8833_v45, %v10707_v32  ;;  %v6629_v60 = vld [vmem:[#allocation4 + $0x5a4] ss:$16 sps:$4 sm:$0xff]   ;;  %v1638_v26 = vpop.f32.mrf.mxu0  ;;  %4352 = vmatpush2.bf16.msra.mxu1 %v6621_v20  ;;  %v6627_v28 = vld [vmem:[#allocation4 + $0x5a0] ss:$16 sps:$4 sm:$0xff]  }
 0x23b   :  { %10703 = vst [vmem:[#allocation17_spill] sm:$0xff] %v8932_v21  ;;  %v8934_v39 = vpop.eup %7179  ;;  %7205 = vpow2.f32 %v8837_v15  ;;  %v8951_v24 = vadd.f32 %v8882_v37, %v8423_v30  ;;  %v6624_v15 = vld [vmem:[#allocation4 + $0x7c0] ss:$16 sps:$4 sm:$0xff]   ;;  %v1831_v6 = vsub.f32 0.0, %v8920_v27  ;;  %v8958_v45 = vadd.f32 %v1486_v55, %v8428_v51  ;;  %v1527_v36 = vpop.f32.mrf.mxu1  ;;  %4353 = vmatprep.subr.bf16.mxu1 %v6629_v60 }
 0x23c   :  { %v7182_v14 = vpop.eup %7181  ;;  %7207 = vpow2.f32 %v8843_v22  ;;  %v6632_v22 = vld [vmem:[#allocation4 + $0x7a4] ss:$16 sps:$4 sm:$0xff]   ;;  %v1830_v30 = vsub.f32 0.0, %v8928_v63  ;;  %v1832_v37 = vsub.f32 0.0, %v8932_v21  ;;  %v8966_v31 = vadd.f32 %v1375_v13, %v8432_v50  ;;  %v10710_v50 = vld [vmem:[#allocation23_spill] sm:$0xff]  ;;  %4465 = vmatpush2.bf16.msra.mxu0 %v6624_v15 }
 0x23d   :  { %10708 = vst [vmem:[#allocation18_spill] sm:$0xff] %v8951_v24  ;;  %v8953_v8 = vpop.eup %7183  ;;  %v2192_v40 = vadd.f32 1.0, %v7182_v14  ;;  %7209 = vpow2.f32 %v8845_v7  ;;  %v2069_v14 = vmul.f32 1.442695, %v1829_v54  ;;  %v8971_v51 = vadd.f32 %v1488_v53, %v8437_v56  ;;  %v6630_v56 = vld [vmem:[#allocation4 + $0x7a0] ss:$16 sps:$4 sm:$0xff]   ;;  %4466 = vmatprep.subr.bf16.mxu0 %v6632_v22 }
 0x23e   :  { %v8960_v32 = vpop.eup %7185  ;;  %7211 = vpow2.f32 %v8888_v38  ;;  %v8973_v55 = vpack.c.bf16 %v2414_v34, %v2406_v25  ;;  %v1837_v42 = vsub.f32 0.0, %v8951_v24  ;;  %v8980_v13 = vadd.f32 %v1525_v48, %v10710_v50  ;;  %v6635_v53 = vld [vmem:[#allocation4 + $0x584] ss:$16 sps:$4 sm:$0xff]   ;;  %4354 = vmatpush2.bf16.msra.mxu1 %v6627_v28 }
 0x23f   :  { %v8968_v7 = vpop.eup %7187  ;;  %7213 = vrcp.f32 %v2192_v40  ;;  %v8982_v21 = vpack.c.bf16 %v2416_v16, %v2408_v23  ;;  %v10713_v34 = vld [vmem:[#allocation16_spill] sm:$0xff]  ;;  %v1839_v20 = vsub.f32 0.0, %v8958_v45  ;;  %v2071_v23 = vmul.f32 1.442695, %v1830_v30  ;;  %v1640_v40 = vpop.f32.mrf.mxu0  ;;  %4355 = vmatprep.subr.bf16.mxu1 %v6635_v53 }
 0x240   :  { %10709 = vst [vmem:[#allocation19_spill] sm:$0xff] %v8973_v55  ;;  %v8975_v38 = vpop.eup %7189  ;;  %7215 = vpow2.f32 %v8899_v41  ;;  %10711 = vst [vmem:[#allocation21_spill] sm:$0xff] %v8980_v13  ;;  %v2407_v54 = vmul.f32 %v8751_v58, %v10713_v34  ;;  %v2073_v41 = vmul.f32 1.442695, %v1831_v6  ;;  %4169 = vmatprep.mubr.bf16.mxu1 %v8973_v55  ;;  %v6638_v48 = vld [vmem:[#allocation4 + $0x784] ss:$16 sps:$4 sm:$0xff]   ;;  %v9002_v6 = vpack.c.bf16 %v8938_v61, %v8895_v44 }
 0x241   :  { %10712 = vst [vmem:[#allocation20_spill] sm:$0xff] %v8982_v21  ;;  %v8984_v25 = vpop.eup %7191  ;;  %7217 = vpow2.f32 %v8908_v2  ;;  %v2075_v15 = vmul.f32 1.442695, %v1832_v37  ;;  %v1838_v60 = vsub.f32 0.0, %v8966_v31  ;;  %4282 = vmatprep.mubr.bf16.mxu0 %v8982_v21  ;;  %v1840_v2 = vsub.f32 0.0, %v8971_v51  ;;  %4467 = vmatpush2.bf16.msra.mxu0 %v6630_v56 }
 0x242   :  { %v8991_v16 = vpop.eup %7193  ;;  %7219 = vpow2.f32 %v8910_v33  ;;  %10714 = vst [vmem:[#allocation22_spill] sm:$0xff] %v9002_v6  ;;  %v9004_v22 = vpack.c.bf16 %v2415_v19, %v2407_v54  ;;  %v6633_v33 = vld [vmem:[#allocation4 + $0x580] ss:$16 sps:$4 sm:$0xff]   ;;  %v2085_v34 = vmul.f32 1.442695, %v1837_v42  ;;  %v1721_v21 = vsub.f32 0.0, %v8980_v13  ;;  %4170 = vmatmul.mubr.bf16.gmra.mxu1 %v9002_v6  ;;  %v1642_v42 = vpop.f32.mrf.mxu0  ;;  %4468 = vmatprep.subr.bf16.mxu0 %v6638_v48 }
 0x243   :  { %v8996_v58 = vpop.eup %7195  ;;  %7221 = vpow2.f32 %v8924_v29  ;;  %v6636_v30 = vld [vmem:[#allocation4 + $0x780] ss:$16 sps:$4 sm:$0xff]   ;;  %v9010_v55 = vadd.f32 %v1638_v26, %v8802_v12  ;;  %v1529_v29 = vpop.f32.mrf.mxu1  ;;  %v6641_v24 = vld [vmem:[#allocation4 + $0x564] ss:$16 sps:$4 sm:$0xff]   ;;  %v2089_v61 = vmul.f32 1.442695, %v1839_v20  ;;  %v9015_v19 = vadd.f32 %v1527_v36, %v8807_v9  ;;  %4356 = vmatpush2.bf16.msra.mxu1 %v6633_v33 }
 0x244   :  { %10715 = vst [vmem:[#allocation23_spill] sm:$0xff] %v9004_v22  ;;  %v9006_v37 = vpop.eup %7197  ;;  %7223 = vpow2.f32 %v2069_v14  ;;  %4283 = vmatmul.mubr.bf16.gmra.mxu0 %v9004_v22  ;;  %v6644_v14 = vld [vmem:[#allocation4 + $0x764] ss:$16 sps:$4 sm:$0xff]   ;;  %v2087_v26 = vmul.f32 1.442695, %v1838_v60  ;;  %v9027_v6 = vadd.f32 %v1640_v40, %v8818_v11  ;;  %4357 = vmatprep.subr.bf16.mxu1 %v6641_v24  ;;  %v2430_v40 = vmul.f32 %v8968_v7, %v8677_v43 }
 0x245   :  { %10716 = vst [vmem:[#allocation16_spill] sm:$0xff] %v9010_v55  ;;  %v9012_v44 = vpop.eup %7199  ;;  %7225 = vpow2.f32 %v2073_v41  ;;  %v2091_v53 = vmul.f32 1.442695, %v1840_v2  ;;  %v6639_v54 = vld [vmem:[#allocation4 + $0x560] ss:$16 sps:$4 sm:$0xff]   ;;  %4469 = vmatpush2.bf16.msra.mxu0 %v6636_v30  ;;  %v9039_v24 = vadd.f32 %v1529_v29, %v10710_v50  ;;  %v1644_v30 = vpop.f32.mrf.mxu0  ;;  %v2422_v43 = vmul.f32 %v8922_v3, %v8636_v18 }
 0x246   :  { %v9019_v28 = vpop.eup %7201  ;;  %7227 = vpow2.f32 %v2071_v23  ;;  %v6642_v41 = vld [vmem:[#allocation4 + $0x760] ss:$16 sps:$4 sm:$0xff]   ;;  %v9023_v20 = vmul.f32 1.442695, %v1721_v21  ;;  %10717 = vst [vmem:[#allocation42_spill] sm:$0xff] %v9027_v6  ;;  %v9029_v23 = vpop.f32.mrf.mxu1  ;;  %v1722_v21 = vsub.f32 0.0, %v9015_v19  ;;  %4470 = vmatprep.subr.bf16.mxu0 %v6644_v14  ;;  %v2431_v7 = vmul.f32 %v8960_v32, %v8671_v49 }
 0x247   :  { %v9021_v56 = vpop.eup %7203  ;;  %7229 = vpow2.f32 %v2075_v15  ;;  %v6647_v48 = vld [vmem:[#allocation4 + $0x544] ss:$16 sps:$4 sm:$0xff]   ;;  %v9033_v15 = vmul.f32 %v8906_v5, %v8615_v1  ;;  %v2432_v1 = vmul.f32 %v8975_v38, %v8683_v35  ;;  %4358 = vmatpush2.bf16.msra.mxu1 %v6639_v54  ;;  %v6645_v14 = vld [vmem:[#allocation4 + $0x540] ss:$16 sps:$4 sm:$0xff]   ;;  %v10718_v54 = vld [vmem:[#allocation27_spill] sm:$0xff]  ;;  %v1724_v18 = vsub.f32 0.0, %v9027_v6 }
 0x248   :  { %v7206_v36 = vpop.eup %7205  ;;  %7231 = vpow2.f32 %v2085_v34  ;;  %v6650_v33 = vld [vmem:[#allocation4 + $0x744] ss:$16 sps:$4 sm:$0xff]   ;;  %4359 = vmatprep.subr.bf16.mxu1 %v6647_v48  ;;  %v6648_v35 = vld [vmem:[#allocation4 + $0x740] ss:$16 sps:$4 sm:$0xff]   ;;  %v9061_v48 = vpack.c.bf16 %v2430_v40, %v2422_v43 }
 0x249   :  { %v7208_v60 = vpop.eup %7207  ;;  %v2197_v2 = vadd.f32 1.0, %v7206_v36  ;;  %7233 = vpow2.f32 %v2089_v61  ;;  %v9044_v61 = vadd.f32 %v1642_v42, %v8802_v12  ;;  %4471 = vmatpush2.bf16.msra.mxu0 %v6642_v41  ;;  %v2424_v42 = vmul.f32 %v8934_v39, %v8654_v47  ;;  %v6653_v3 = vld [vmem:[#allocation4 + $0x524] ss:$16 sps:$4 sm:$0xff]   ;;  %v1648_v41 = vpop.f32.mrf.mxu0  ;;  %v6654_v40 = vld [vmem:[#allocation4 + $0x720] ss:$16 sps:$4 sm:$0xff]  }
 0x24a   :  { %v7210_v34 = vpop.eup %7209  ;;  %v2199_v22 = vadd.f32 1.0, %v7208_v60  ;;  %7235 = vpow2.f32 %v2087_v26  ;;  %v9052_v26 = vpop.f32.mrf.mxu1  ;;  %v2429_v60 = vmul.f32 %v8953_v8, %v10718_v54  ;;  %4472 = vmatprep.subr.bf16.mxu0 %v6650_v33  ;;  %v10719_v32 = vld [vmem:[#allocation24_spill] sm:$0xff]  ;;  %10720 = vst [vmem:[#allocation27_spill] sm:$0xff] %v9061_v48  ;;  %v1729_v39 = vsub.f32 0.0, %v9039_v24  ;;  %4179 = vmatprep.mubr.bf16.mxu1 %v9061_v48 }
 0x24b   :  { %v7212_v13 = vpop.eup %7211  ;;  %7237 = vrcp.f32 %v2197_v2  ;;  %v2198_v5 = vadd.f32 1.0, %v7210_v34  ;;  %v6656_v2 = vld [vmem:[#allocation4 + $0x724] ss:$16 sps:$4 sm:$0xff]   ;;  %v9064_v8 = vpack.c.bf16 %v2432_v1, %v2424_v42  ;;  %4360 = vmatpush2.bf16.msra.mxu1 %v6645_v14  ;;  %v6651_v33 = vld [vmem:[#allocation4 + $0x520] ss:$16 sps:$4 sm:$0xff]   ;;  %v10723_v14 = vsub.f32 0.0, %v9010_v55 }
 0x24c   :  { %v9046_v36 = vpop.eup %7213  ;;  %7239 = vrcp.f32 %v2199_v22  ;;  %v2200_v29 = vadd.f32 1.0, %v7212_v13  ;;  %v2423_v13 = vmul.f32 %v8912_v46, %v10719_v32  ;;  %4361 = vmatprep.subr.bf16.mxu1 %v6653_v3 }
 0x24d   :  { %v7216_v38 = vpop.eup %7215  ;;  %7241 = vrcp.f32 %v2198_v5  ;;  %10721 = vst [vmem:[#allocation24_spill] sm:$0xff] %v9064_v8  ;;  %4473 = vmatpush2.bf16.msra.mxu0 %v6648_v35  ;;  %v9074_v42 = vmul.f32 1.442695, %v10723_v14  ;;  %4292 = vmatprep.mubr.bf16.mxu0 %v9064_v8  ;;  %v9082_v35 = vadd.f32 %v9029_v23, %v8807_v9  ;;  %v10727_v8 = vld [vmem:[#allocation32_spill] sm:$0xff] }
 0x24e   :  { %v7218_v49 = vpop.eup %7217  ;;  %7243 = vrcp.f32 %v2200_v29  ;;  %v2205_v22 = vadd.f32 1.0, %v7216_v38  ;;  %v9066_v54 = vpack.c.bf16 %v2431_v7, %v2423_v13  ;;  %v1731_v29 = vsub.f32 0.0, %v9044_v61  ;;  %v9069_v38 = vpop.f32.mrf.mxu1  ;;  %4474 = vmatprep.subr.bf16.mxu0 %v6656_v2 }
 0x24f   :  { %v7220_v34 = vpop.eup %7219  ;;  %v2207_v47 = vadd.f32 1.0, %v7218_v49  ;;  %7245 = vpow2.f32 %v2091_v53  ;;  %v6659_v53 = vld [vmem:[#allocation4 + $0x504] ss:$16 sps:$4 sm:$0xff]   ;;  %v9078_v7 = vpack.c.bf16 %v2429_v60, %v9033_v15  ;;  %v6660_v15 = vld [vmem:[#allocation4 + $0x700] ss:$16 sps:$4 sm:$0xff]   ;;  %4362 = vmatpush2.bf16.msra.mxu1 %v6651_v33  ;;  %v1730_v33 = vsub.f32 0.0, %v9082_v35 }
 0x250   :  { %v7222_v5 = vpop.eup %7221  ;;  %10722 = vst [vmem:[#allocation43_spill] sm:$0xff] %v9066_v54  ;;  %7247 = vrcp.f32 %v2205_v22  ;;  %v2206_v46 = vadd.f32 1.0, %v7220_v34  ;;  %v6662_v49 = vld [vmem:[#allocation4 + $0x704] ss:$16 sps:$4 sm:$0xff]   ;;  %v9085_v22 = vadd.f32 %v1644_v30, %v8818_v11  ;;  %v9087_v34 = vpop.f32.mrf.mxu0  ;;  %4293 = vmatmul.mubr.bf16.gmra.mxu0 %v9066_v54  ;;  %v9099_v14 = vmul.f32 1.442695, %v1731_v29  ;;  %4363 = vmatprep.subr.bf16.mxu1 %v6659_v53 }
 0x251   :  { %v7224_v43 = vpop.eup %7223  ;;  %7249 = vrcp.f32 %v2207_v47  ;;  %v2208_v1 = vadd.f32 1.0, %v7222_v5  ;;  %10724 = vst [vmem:[#allocation44_spill] sm:$0xff] %v9078_v7  ;;  %v6657_v47 = vld [vmem:[#allocation4 + $0x500] ss:$16 sps:$4 sm:$0xff]   ;;  %v9092_v5 = vmul.f32 1.442695, %v1722_v21  ;;  %4180 = vmatmul.mubr.bf16.gmra.mxu1 %v9078_v7  ;;  %v1539_v2 = vpop.f32.mrf.mxu1  ;;  %4475 = vmatpush2.bf16.msra.mxu0 %v6654_v40  ;;  %v9103_v21 = vadd.f32 %v9052_v26, %v10710_v50 }
 0x252   :  { %v7226_v32 = vpop.eup %7225  ;;  %7251 = vrcp.f32 %v2206_v46  ;;  %v2213_v13 = vadd.f32 1.0, %v7224_v43  ;;  %v9094_v46 = vmul.f32 1.442695, %v1724_v18  ;;  %v9097_v43 = vmul.f32 1.442695, %v1729_v39  ;;  %4476 = vmatprep.subr.bf16.mxu0 %v6662_v49  ;;  %v10725_v54 = vld [vmem:[#allocation30_spill] sm:$0xff] }
 0x253   :  { %v7228_v60 = vpop.eup %7227  ;;  %7253 = vrcp.f32 %v2208_v1  ;;  %v2215_v3 = vadd.f32 1.0, %v7226_v32  ;;  %v9106_v18 = vadd.f32 %v1648_v41, %v8802_v12  ;;  %v6668_v39 = vld [vmem:[#allocation4 + $0x2ec] ss:$16 sps:$4 sm:$0xff]   ;;  %v1732_v40 = vsub.f32 0.0, %v9085_v22  ;;  %v1541_v55 = vpop.f32.mrf.mxu1  ;;  %4364 = vmatpush2.bf16.msra.mxu1 %v6657_v47  ;;  %v10729_v47 = vld [vmem:[#allocation34_spill] sm:$0xff] }
 0x254   :  { %v7230_v23 = vpop.eup %7229  ;;  %7255 = vrcp.f32 %v2213_v13  ;;  %v2214_v30 = vadd.f32 1.0, %v7228_v60  ;;  %v6665_v13 = vld [vmem:[#allocation4 + $0xec] ss:$16 sps:$4 sm:$0xff]   ;;  %v2437_v26 = vmul.f32 %v8984_v25, %v10725_v54  ;;  %v2448_v25 = vmul.f32 %v9046_v36, %v8755_v4 }
 0x255   :  { %v7232_v1 = vpop.eup %7231  ;;  %7257 = vrcp.f32 %v2215_v3  ;;  %v2216_v32 = vadd.f32 1.0, %v7230_v23  ;;  %v1652_v3 = vpop.f32.mrf.mxu0  ;;  %v10726_v7 = vld [vmem:[#allocation31_spill] sm:$0xff]  ;;  %4477 = vmatpush2.bf16.msra.mxu0 %v6660_v15  ;;  %v1739_v54 = vsub.f32 0.0, %v9106_v18  ;;  %4559 = vmatprep.subr.bf16.mxu1 %v6665_v13  ;;  %v2445_v15 = vmul.f32 %v9012_v44, %v10729_v47 }
 0x256   :  { %v7234_v60 = vpop.eup %7233  ;;  %7259 = vrcp.f32 %v2214_v30  ;;  %v2221_v29 = vadd.f32 1.0, %v7232_v1  ;;  %v2439_v41 = vmul.f32 %v8991_v16, %v10726_v7  ;;  %v2438_v30 = vmul.f32 %v8996_v58, %v10727_v8  ;;  %4672 = vmatprep.subr.bf16.mxu0 %v6668_v39 }
 0x257   :  { %v7236_v23 = vpop.eup %7235  ;;  %7261 = vrcp.f32 %v2216_v32  ;;  %v2223_v53 = vadd.f32 1.0, %v7234_v60  ;;  %v2446_v1 = vmul.f32 %v9021_v56, %v8734_v52  ;;  %v1737_v16 = vsub.f32 0.0, %v9103_v21  ;;  %v10728_v52 = vld [vmem:[#allocation33_spill] sm:$0xff]  ;;  %v1654_v4 = vpop.f32.mrf.mxu0 }
 0x258   :  { %v9114_v49 = vpop.eup %7237  ;;  %7263 = vrcp.f32 %v2221_v29  ;;  %v2222_v48 = vadd.f32 1.0, %v7236_v23  ;;  %v2440_v56 = vmul.f32 %v9006_v37, %v10728_v52  ;;  %v2447_v8 = vmul.f32 %v9019_v28, %v8728_v57 }
 0x259   :  { %v9120_v6 = vpop.eup %7239  ;;  %7265 = vrcp.f32 %v2223_v53  ;;  %v9134_v7 = vadd.f32 %v9069_v38, %v8807_v9  ;;  %v9143_v32 = vadd.f32 %v9087_v34, %v8818_v11  ;;  %v9146_v37 = vadd.f32 %v1539_v2, %v10710_v50  ;;  %v1545_v38 = vpop.f32.mrf.mxu1 }
 0x25a   :  { %v9126_v58 = vpop.eup %7241  ;;  %7267 = vrcp.f32 %v2222_v48  ;;  %v9150_v28 = vadd.f32 %v1652_v3, %v8802_v12  ;;  %v9153_v48 = vadd.f32 %v1541_v55, %v8807_v9  ;;  %v9155_v44 = vpack.c.bf16 %v2446_v1, %v2438_v30  ;;  %v1658_v29 = vpop.f32.mrf.mxu0 }
 0x25b   :  { %v9136_v36 = vpop.eup %7243  ;;  %7269 = vpow2.f32 %v9023_v20  ;;  %v9161_v34 = vadd.f32 %v1654_v4, %v8818_v11  ;;  %v9163_v2 = vpack.c.bf16 %v2448_v25, %v2440_v56  ;;  %v9165_v39 = vpack.c.bf16 %v2447_v8, %v2439_v41  ;;  %v1547_v1 = vpop.f32.mrf.mxu1 }
 0x25c   :  { %v7246_v57 = vpop.eup %7245  ;;  %7271 = vpow2.f32 %v9074_v42  ;;  %10730 = vst [vmem:[#allocation30_spill] sm:$0xff] %v9155_v44  ;;  %v1871_v55 = vmul.f32 1.442695, %v1730_v33  ;;  %v1738_v60 = vsub.f32 0.0, %v9134_v7  ;;  %4189 = vmatprep.mubr.bf16.mxu1 %v9155_v44  ;;  %v1875_v23 = vmul.f32 1.442695, %v1732_v40  ;;  %v1660_v8 = vpop.f32.mrf.mxu0 }
 0x25d   :  { %v9157_v20 = vpop.eup %7247  ;;  %v2224_v13 = vadd.f32 1.0, %v7246_v57  ;;  %7273 = vpow2.f32 %v9092_v5  ;;  %10731 = vst [vmem:[#allocation31_spill] sm:$0xff] %v9163_v2  ;;  %10732 = vst [vmem:[#allocation32_spill] sm:$0xff] %v9165_v39  ;;  %v1740_v5 = vsub.f32 0.0, %v9143_v32  ;;  %4302 = vmatprep.mubr.bf16.mxu0 %v9163_v2  ;;  %v9172_v53 = vpack.c.bf16 %v2445_v15, %v2437_v26 }
 0x25e   :  { %v7250_v42 = vpop.eup %7249  ;;  %7275 = vpow2.f32 %v9094_v46  ;;  %v1885_v41 = vmul.f32 1.442695, %v1737_v16  ;;  %v1889_v46 = vmul.f32 1.442695, %v1739_v54  ;;  %v1745_v33 = vsub.f32 0.0, %v9146_v37  ;;  %4303 = vmatmul.mubr.bf16.gmra.mxu0 %v9165_v39 }
 0x25f   :  { %v7252_v3 = vpop.eup %7251  ;;  %7277 = vrcp.f32 %v2224_v13  ;;  %10733 = vst [vmem:[#allocation33_spill] sm:$0xff] %v9172_v53  ;;  %v1747_v40 = vsub.f32 0.0, %v9150_v28  ;;  %v1746_v52 = vsub.f32 0.0, %v9153_v48  ;;  %v1748_v26 = vsub.f32 0.0, %v9161_v34  ;;  %4190 = vmatmul.mubr.bf16.gmra.mxu1 %v9172_v53 }
 0x260   :  { %v7254_v30 = vpop.eup %7253  ;;  %7279 = vpow2.f32 %v9097_v43  ;;  %v1887_v16 = vmul.f32 1.442695, %v1738_v60  ;;  %v9187_v54 = vadd.f32 %v1545_v38, %v10710_v50  ;;  %v9190_v56 = vadd.f32 %v1658_v29, %v8802_v12  ;;  %v1549_v29 = vpop.f32.mrf.mxu1 }
 0x261   :  { %v9177_v25 = vpop.eup %7255  ;;  %7281 = vpow2.f32 %v9099_v14  ;;  %v1891_v4 = vmul.f32 1.442695, %v1740_v5  ;;  %v9195_v47 = vadd.f32 %v1547_v1, %v8807_v9  ;;  %v1901_v57 = vmul.f32 1.442695, %v1745_v33  ;;  %v1662_v1 = vpop.f32.mrf.mxu0 }
 0x262   :  { %v9184_v43 = vpop.eup %7257  ;;  %7283 = vpow2.f32 %v1871_v55  ;;  %10734 = vst [vmem:[#allocation34_spill] sm:$0xff] %v9187_v54  ;;  %10735 = vst [vmem:[#allocation45_spill] sm:$0xff] %v9190_v56  ;;  %v1905_v38 = vmul.f32 1.442695, %v1747_v40  ;;  %v1903_v55 = vmul.f32 1.442695, %v1746_v52  ;;  %v2462_v53 = vmul.f32 %v7252_v3, %v8863_v62 }
 0x263   :  { %v9192_v14 = vpop.eup %7259  ;;  %7285 = vpow2.f32 %v1875_v23  ;;  %v1907_v60 = vmul.f32 1.442695, %v1748_v26  ;;  %v1753_v23 = vsub.f32 0.0, %v9187_v54  ;;  %v1755_v5 = vsub.f32 0.0, %v9190_v56  ;;  %v10737_v56 = vld [vmem:[#allocation38_spill] sm:$0xff] }
 0x264   :  { %v9197_v15 = vpop.eup %7261  ;;  %7287 = vpow2.f32 %v1885_v41  ;;  %v2464_v41 = vmul.f32 %v7254_v30, %v8872_v0  ;;  %v9211_v33 = vadd.f32 %v1660_v8, %v8818_v11  ;;  %v2454_v62 = vmul.f32 %v9126_v58, %v8782_v10  ;;  %v10736_v30 = vld [vmem:[#allocation13_spill] sm:$0xff]  ;;  %v1551_v8 = vpop.f32.mrf.mxu1 }
 0x265   :  { %v9199_v13 = vpop.eup %7263  ;;  %7289 = vpow2.f32 %v1889_v46  ;;  %v1754_v46 = vsub.f32 0.0, %v9195_v47  ;;  %v2463_v3 = vmul.f32 %v7250_v42, %v8858_v17  ;;  %v9217_v52 = vadd.f32 %v1549_v29, %v10710_v50  ;;  %v1664_v17 = vpop.f32.mrf.mxu0  ;;  %v10739_v29 = vld [vmem:[#allocation35_spill] sm:$0xff] }
 0x266   :  { %v9201_v39 = vpop.eup %7265  ;;  %7291 = vpow2.f32 %v1887_v16  ;;  %v2456_v0 = vmul.f32 %v9136_v36, %v8825_v59  ;;  %v2461_v16 = vmul.f32 %v9157_v20, %v10736_v30  ;;  %v2455_v10 = vmul.f32 %v9120_v6, %v10737_v56 }
 0x267   :  { %v9206_v2 = vpop.eup %7267  ;;  %7293 = vpow2.f32 %v1891_v4  ;;  %v9225_v42 = vpack.c.bf16 %v2462_v53, %v2454_v62  ;;  %v2453_v54 = vmul.f32 %v9114_v49, %v10739_v29  ;;  %v1756_v6 = vsub.f32 0.0, %v9211_v33 }
 0x268   :  { %v7270_v40 = vpop.eup %7269  ;;  %7295 = vpow2.f32 %v1901_v57  ;;  %v9229_v36 = vpack.c.bf16 %v2464_v41, %v2456_v0  ;;  %v9236_v53 = vadd.f32 %v1662_v1, %v8802_v12  ;;  %v1761_v62 = vsub.f32 0.0, %v9217_v52 }
 0x269   :  { %v7272_v26 = vpop.eup %7271  ;;  %v2105_v4 = vadd.f32 1.0, %v7270_v40  ;;  %7297 = vpow2.f32 %v1905_v38  ;;  %10738 = vst [vmem:[#allocation13_spill] sm:$0xff] %v9225_v42  ;;  %v9231_v38 = vpack.c.bf16 %v2463_v3, %v2455_v10  ;;  %4199 = vmatprep.mubr.bf16.mxu1 %v9225_v42  ;;  %v9239_v49 = vpack.c.bf16 %v2461_v16, %v2453_v54  ;;  %v1668_v3 = vpop.f32.mrf.mxu0  ;;  %v10753_v42 = vld [vmem:[#allocation16_spill] sm:$0xff] }
 0x26a   :  { %v7274_v44 = vpop.eup %7273  ;;  %v2107_v58 = vadd.f32 1.0, %v7272_v26  ;;  %7299 = vpow2.f32 %v1903_v55  ;;  %10740 = vst [vmem:[#allocation38_spill] sm:$0xff] %v9229_v36  ;;  %v1555_v55 = vpop.f32.mrf.mxu1  ;;  %4312 = vmatprep.mubr.bf16.mxu0 %v9229_v36  ;;  %v9243_v30 = vmul.f32 1.442695, %v1753_v23  ;;  %v9245_v1 = vmul.f32 1.442695, %v1755_v5 }
 0x26b   :  { %v7276_v57 = vpop.eup %7275  ;;  %7301 = vrcp.f32 %v2105_v4  ;;  %v2106_v59 = vadd.f32 1.0, %v7274_v44  ;;  %10741 = vst [vmem:[#allocation35_spill] sm:$0xff] %v9231_v38  ;;  %10742 = vst [vmem:[#allocation46_spill] sm:$0xff] %v9239_v49  ;;  %4313 = vmatmul.mubr.bf16.gmra.mxu0 %v9231_v38  ;;  %4200 = vmatmul.mubr.bf16.gmra.mxu1 %v9239_v49  ;;  %v9248_v16 = vmul.f32 1.442695, %v1754_v46  ;;  %v1763_v29 = vsub.f32 0.0, %v9236_v53  ;;  %v1670_v46 = vpop.f32.mrf.mxu0 }
 0x26c   :  { %v7278_v20 = vpop.eup %7277  ;;  %7303 = vrcp.f32 %v2107_v58  ;;  %v2108_v40 = vadd.f32 1.0, %v7276_v57  ;;  %v9250_v10 = vmul.f32 1.442695, %v1756_v6  ;;  %v1557_v23 = vpop.f32.mrf.mxu1 }
 0x26d   :  { %v7280_v56 = vpop.eup %7279  ;;  %7305 = vrcp.f32 %v2106_v59 }
 0x26e   :  { %v7282_v44 = vpop.eup %7281  ;;  %7307 = vrcp.f32 %v2108_v40  ;;  %v2113_v41 = vadd.f32 1.0, %v7280_v56  ;;  %v9256_v40 = vmul.f32 1.442695, %v1761_v62  ;;  %v9259_v56 = vadd.f32 %v1664_v17, %v8818_v11 }
 0x26f   :  { %v7284_v26 = vpop.eup %7283  ;;  %v2115_v0 = vadd.f32 1.0, %v7282_v44  ;;  %7309 = vpow2.f32 %v1907_v60  ;;  %v9254_v60 = vadd.f32 %v1551_v8, %v8807_v9  ;;  %v2478_v44 = vmul.f32 %v9206_v2, %v8966_v31 }
 0x270   :  { %v7286_v4 = vpop.eup %7285  ;;  %7311 = vrcp.f32 %v2113_v41  ;;  %v2114_v54 = vadd.f32 1.0, %v7284_v26  ;;  %v9264_v26 = vadd.f32 %v1555_v55, %v10710_v50  ;;  %v9268_v62 = vadd.f32 %v1668_v3, %v8802_v12 }
 0x271   :  { %v7288_v58 = vpop.eup %7287  ;;  %7313 = vrcp.f32 %v2115_v0  ;;  %v2116_v57 = vadd.f32 1.0, %v7286_v4  ;;  %v2480_v0 = vmul.f32 %v7278_v20, %v8971_v51  ;;  %v2479_v31 = vmul.f32 %v9201_v39, %v8958_v45  ;;  %v10743_v51 = vld [vmem:[#allocation17_spill] sm:$0xff] }
 0x272   :  { %v7290_v5 = vpop.eup %7289  ;;  %7315 = vrcp.f32 %v2114_v54  ;;  %v2121_v59 = vadd.f32 1.0, %v7288_v58  ;;  %v2470_v54 = vmul.f32 %v9192_v14, %v8928_v63  ;;  %v1559_v58 = vpop.f32.mrf.mxu1  ;;  %v2472_v20 = vmul.f32 %v9197_v15, %v10743_v51 }
 0x273   :  { %v7292_v6 = vpop.eup %7291  ;;  %7317 = vrcp.f32 %v2116_v57  ;;  %v2123_v41 = vadd.f32 1.0, %v7290_v5  ;;  %v2471_v57 = vmul.f32 %v9184_v43, %v8920_v27  ;;  %v1672_v5 = vpop.f32.mrf.mxu0  ;;  %v9285_v27 = vadd.f32 %v1557_v23, %v8807_v9 }
 0x274   :  { %v7294_v8 = vpop.eup %7293  ;;  %7319 = vrcp.f32 %v2121_v59  ;;  %v2122_v4 = vadd.f32 1.0, %v7292_v6  ;;  %v10744_v6 = vld [vmem:[#allocation18_spill] sm:$0xff]  ;;  %v9280_v45 = vpack.c.bf16 %v2478_v44, %v2470_v54  ;;  %v9287_v43 = vpack.c.bf16 %v2480_v0, %v2472_v20  ;;  %v1561_v44 = vpop.f32.mrf.mxu1 }
 0x275   :  { %v7296_v17 = vpop.eup %7295  ;;  %7321 = vrcp.f32 %v2123_v41  ;;  %v2124_v2 = vadd.f32 1.0, %v7294_v8  ;;  %v2477_v63 = vmul.f32 %v9199_v13, %v10744_v6  ;;  %v10747_v8 = vld [vmem:[#allocation15_spill] sm:$0xff]  ;;  %v9296_v13 = vadd.f32 %v1670_v46, %v8818_v11 }
 0x276   :  { %v7298_v55 = vpop.eup %7297  ;;  %7323 = vrcp.f32 %v2122_v4  ;;  %v2129_v3 = vadd.f32 1.0, %v7296_v17  ;;  %10745 = vst [vmem:[#allocation17_spill] sm:$0xff] %v9280_v45  ;;  %10746 = vst [vmem:[#allocation18_spill] sm:$0xff] %v9287_v43  ;;  %v2469_v4 = vmul.f32 %v9177_v25, %v10747_v8  ;;  %v9293_v17 = vpack.c.bf16 %v2479_v31, %v2471_v57  ;;  %4209 = vmatprep.mubr.bf16.mxu1 %v9280_v45  ;;  %v1565_v6 = vpop.f32.mrf.mxu1 }
 0x277   :  { %v7300_v59 = vpop.eup %7299  ;;  %7325 = vrcp.f32 %v2124_v2  ;;  %v2131_v14 = vadd.f32 1.0, %v7298_v55  ;;  %v1937_v23 = vmul.f32 1.442695, %v1763_v29  ;;  %v1762_v0 = vsub.f32 0.0, %v9254_v60  ;;  %v1674_v55 = vpop.f32.mrf.mxu0  ;;  %4322 = vmatprep.mubr.bf16.mxu0 %v9287_v43 }
 0x278   :  { %v9282_v39 = vpop.eup %7301  ;;  %7327 = vrcp.f32 %v2129_v3  ;;  %v2130_v41 = vadd.f32 1.0, %v7300_v59  ;;  %10748 = vst [vmem:[#allocation15_spill] sm:$0xff] %v9293_v17  ;;  %v9301_v2 = vadd.f32 %v1559_v58, %v10710_v50  ;;  %v1764_v46 = vsub.f32 0.0, %v9259_v56  ;;  %4323 = vmatmul.mubr.bf16.gmra.mxu0 %v9293_v17 }
 0x279   :  { %v9289_v15 = vpop.eup %7303  ;;  %7329 = vrcp.f32 %v2131_v14  ;;  %v9307_v31 = vadd.f32 %v1672_v5, %v8802_v12  ;;  %v9309_v57 = vpack.c.bf16 %v2477_v63, %v2469_v4  ;;  %v1769_v58 = vsub.f32 0.0, %v9264_v26 }
 0x27a   :  { %v7306_v54 = vpop.eup %7305  ;;  %7331 = vrcp.f32 %v2130_v41  ;;  %v1771_v51 = vsub.f32 0.0, %v9268_v62  ;;  %v1770_v20 = vsub.f32 0.0, %v9285_v27  ;;  %v1772_v5 = vsub.f32 0.0, %v9296_v13  ;;  %v1678_v41 = vpop.f32.mrf.mxu0 }
 0x27b   :  { %v7308_v25 = vpop.eup %7307  ;;  %7333 = vpow2.f32 %v9243_v30  ;;  %10749 = vst [vmem:[#allocation47_spill] sm:$0xff] %v9309_v57  ;;  %v9319_v59 = vadd.f32 %v1561_v44, %v8807_v9  ;;  %4210 = vmatmul.mubr.bf16.gmra.mxu1 %v9309_v57  ;;  %v1777_v14 = vsub.f32 0.0, %v9301_v2  ;;  %v1939_v4 = vmul.f32 1.442695, %v1764_v46 }
 0x27c   :  { %v7310_v29 = vpop.eup %7309  ;;  %7335 = vpow2.f32 %v9245_v1  ;;  %v1935_v1 = vmul.f32 1.442695, %v1762_v0  ;;  %v1949_v44 = vmul.f32 1.442695, %v1769_v58  ;;  %v1953_v17 = vmul.f32 1.442695, %v1771_v51  ;;  %v1567_v0 = vpop.f32.mrf.mxu1 }
 0x27d   :  { %v7312_v3 = vpop.eup %7311  ;;  %v2132_v30 = vadd.f32 1.0, %v7310_v29  ;;  %7337 = vpow2.f32 %v9248_v16  ;;  %v1779_v16 = vsub.f32 0.0, %v9307_v31  ;;  %v1951_v57 = vmul.f32 1.442695, %v1770_v20 }
 0x27e   :  { %v7314_v63 = vpop.eup %7313  ;;  %7339 = vpow2.f32 %v9250_v10  ;;  %v1955_v38 = vmul.f32 1.442695, %v1772_v5  ;;  %v1778_v10 = vsub.f32 0.0, %v9319_v59  ;;  %v1965_v46 = vmul.f32 1.442695, %v1777_v14  ;;  %v10750_v14 = vld [vmem:[#allocation21_spill] sm:$0xff] }
 0x27f   :  { %v7316_v8 = vpop.eup %7315  ;;  %7341 = vrcp.f32 %v2132_v30  ;;  %v9333_v49 = vadd.f32 %v1674_v55, %v8818_v11  ;;  %v2369_v51 = vmul.f32 %v7312_v3, %v9039_v24  ;;  %v9339_v20 = vadd.f32 %v1565_v6, %v10710_v50 }
 0x280   :  { %v7318_v29 = vpop.eup %7317  ;;  %7343 = vpow2.f32 %v9256_v40  ;;  %v2370_v30 = vmul.f32 %v7316_v8, %v9082_v35  ;;  %v1680_v40 = vpop.f32.mrf.mxu0  ;;  %v2362_v36 = vmul.f32 %v7306_v54, %v9015_v19  ;;  %v9346_v55 = vadd.f32 %v1678_v41, %v8802_v12 }
 0x281   :  { %v9326_v43 = vpop.eup %7319  ;;  %7345 = vpow2.f32 %v1937_v23  ;;  %v1969_v23 = vmul.f32 1.442695, %v1779_v16  ;;  %v2372_v35 = vmul.f32 %v7318_v29, %v9085_v22  ;;  %v2361_v24 = vmul.f32 %v9282_v39, %v10750_v14  ;;  %v1569_v8 = vpop.f32.mrf.mxu1  ;;  %v10751_v16 = vld [vmem:[#allocation42_spill] sm:$0xff]  ;;  %v6663_v29 = vld [vmem:[#allocation4 + $0xe8] ss:$16 sps:$4 sm:$0xff]  }
 0x282   :  { %v9329_v45 = vpop.eup %7321  ;;  %7347 = vpow2.f32 %v1935_v1  ;;  %v2371_v3 = vmul.f32 %v7314_v63, %v9044_v61  ;;  %v1967_v6 = vmul.f32 1.442695, %v1778_v10  ;;  %v2364_v19 = vmul.f32 %v7308_v25, %v10751_v16  ;;  %v1682_v54 = vpop.f32.mrf.mxu0  ;;  %v6671_v63 = vld [vmem:[#allocation4 + $0xcc] ss:$16 sps:$4 sm:$0xff]  }
 0x283   :  { %v9335_v58 = vpop.eup %7323  ;;  %7349 = vpow2.f32 %v1939_v4  ;;  %v1780_v22 = vsub.f32 0.0, %v9333_v49  ;;  %v9357_v41 = vpack.c.bf16 %v2370_v30, %v2362_v36  ;;  %v2363_v39 = vmul.f32 %v9289_v15, %v10753_v42  ;;  %v6666_v30 = vld [vmem:[#allocation4 + $0x2e8] ss:$16 sps:$4 sm:$0xff]  }
 0x284   :  { %v9341_v5 = vpop.eup %7325  ;;  %7351 = vpow2.f32 %v1949_v44  ;;  %v9363_v61 = vpack.c.bf16 %v2369_v51, %v2361_v24  ;;  %v1787_v25 = vsub.f32 0.0, %v9346_v55  ;;  %v9371_v36 = vpack.c.bf16 %v2372_v35, %v2364_v19  ;;  %v1571_v51 = vpop.f32.mrf.mxu1 }
 0x285   :  { %v9348_v1 = vpop.eup %7327  ;;  %7353 = vpow2.f32 %v1953_v17  ;;  %10752 = vst [vmem:[#allocation21_spill] sm:$0xff] %v9357_v41  ;;  %v1785_v17 = vsub.f32 0.0, %v9339_v20  ;;  %4365 = vmatprep.mubr.bf16.mxu1 %v9357_v41  ;;  %v9373_v42 = vpack.c.bf16 %v2371_v3, %v2363_v39  ;;  %v9380_v16 = vadd.f32 %v1569_v8, %v10710_v50  ;;  %v1684_v3 = vpop.f32.mrf.mxu0 }
 0x286   :  { %v9353_v4 = vpop.eup %7329  ;;  %7355 = vpow2.f32 %v1951_v57  ;;  %10754 = vst [vmem:[#allocation42_spill] sm:$0xff] %v9363_v61  ;;  %v9368_v57 = vadd.f32 %v1567_v0, %v8807_v9  ;;  %10755 = vst [vmem:[#allocation16_spill] sm:$0xff] %v9371_v36  ;;  %4366 = vmatmul.mubr.bf16.vlgmr.msra.gmra.mxu1 %v9363_v61  ;;  %v9383_v35 = vadd.f32 %v1682_v54, %v8802_v12  ;;  %4478 = vmatprep.mubr.bf16.mxu0 %v9371_v36  ;;  %v6672_v54 = vld [vmem:[#allocation4 + $0x2c8] ss:$16 sps:$4 sm:$0xff]  }
 0x287   :  { %v9359_v44 = vpop.eup %7331  ;;  %7357 = vpow2.f32 %v1955_v38  ;;  %10756 = vst [vmem:[#allocation48_spill] sm:$0xff] %v9373_v42  ;;  %v9376_v38 = vadd.f32 %v1680_v40, %v8818_v11  ;;  %4560 = vmatpush1.bf16.msra.mxu1 %v6663_v29  ;;  %v1971_v39 = vmul.f32 1.442695, %v1780_v22  ;;  %4479 = vmatmul.mubr.bf16.vlgmr.msra.gmra.mxu0 %v9373_v42  ;;  %v9389_v36 = vmul.f32 1.442695, %v1787_v25  ;;  %v1575_v22 = vpop.f32.mrf.mxu1 }
 0x288   :  { %v7334_v10 = vpop.eup %7333  ;;  %7359 = vpow2.f32 %v1965_v46  ;;  %v6674_v46 = vld [vmem:[#allocation4 + $0x2cc] ss:$16 sps:$4 sm:$0xff]   ;;  %4561 = vmatprep.subr.bf16.mxu1 %v6671_v63  ;;  %4673 = vmatpush1.bf16.msra.mxu0 %v6666_v30  ;;  %v1688_v30 = vpop.f32.mrf.mxu0  ;;  %v9396_v29 = vadd.f32 %v1571_v51, %v8807_v9 }
 0x289   :  { %v7336_v14 = vpop.eup %7335  ;;  %v2137_v15 = vadd.f32 1.0, %v7334_v10  ;;  %7361 = vpow2.f32 %v1969_v23  ;;  %v6669_v23 = vld [vmem:[#allocation4 + $0xc8] ss:$16 sps:$4 sm:$0xff]   ;;  %v6677_v10 = vld [vmem:[#allocation4 + $0xac] ss:$16 sps:$4 sm:$0xff]   ;;  %4674 = vmatprep.subr.bf16.mxu0 %v6674_v46 }
 0x28a   :  { %v7338_v24 = vpop.eup %7337  ;;  %v2139_v0 = vadd.f32 1.0, %v7336_v14  ;;  %7363 = vpow2.f32 %v1967_v6  ;;  %v9387_v14 = vmul.f32 1.442695, %v1785_v17  ;;  %v6683_v46 = vld [vmem:[#allocation4 + $0x8c] ss:$16 sps:$4 sm:$0xff]  }
 0x28b   :  { %v7340_v40 = vpop.eup %7339  ;;  %7365 = vrcp.f32 %v2137_v15  ;;  %v2138_v19 = vadd.f32 1.0, %v7338_v24  ;;  %v6680_v24 = vld [vmem:[#allocation4 + $0x2ac] ss:$16 sps:$4 sm:$0xff]   ;;  %4562 = vmatpush1.bf16.msra.mxu1 %v6669_v23  ;;  %v9399_v15 = vadd.f32 %v1684_v3, %v8818_v11  ;;  %v9404_v23 = vadd.f32 %v1575_v22, %v10710_v50 }
 0x28c   :  { %v7342_v6 = vpop.eup %7341  ;;  %7367 = vrcp.f32 %v2139_v0  ;;  %v2140_v8 = vadd.f32 1.0, %v7340_v40  ;;  %v6675_v40 = vld [vmem:[#allocation4 + $0xa8] ss:$16 sps:$4 sm:$0xff]   ;;  %4563 = vmatprep.subr.bf16.mxu1 %v6677_v10  ;;  %4675 = vmatpush1.bf16.msra.mxu0 %v6672_v54  ;;  %v9408_v3 = vadd.f32 %v1688_v30, %v8802_v12  ;;  %v6686_v10 = vld [vmem:[#allocation4 + $0x28c] ss:$16 sps:$4 sm:$0xff]   ;;  %v1577_v30 = vpop.f32.mrf.mxu1 }
 0x28d   :  { %v7344_v61 = vpop.eup %7343  ;;  %7369 = vrcp.f32 %v2138_v19  ;;  %10757 = vst [vmem:[#allocation49_spill] sm:$0xff] %v9404_v23  ;;  %v2388_v51 = vmul.f32 %v7342_v6, %v9161_v34  ;;  %4676 = vmatprep.subr.bf16.mxu0 %v6680_v24  ;;  %v6681_v54 = vld [vmem:[#allocation4 + $0x88] ss:$16 sps:$4 sm:$0xff]   ;;  %v2380_v34 = vmul.f32 %v9341_v5, %v9143_v32  ;;  %v2385_v6 = vmul.f32 %v9348_v1, %v9146_v37 }
 0x28e   :  { %v7346_v63 = vpop.eup %7345  ;;  %7371 = vrcp.f32 %v2140_v8  ;;  %v2145_v42 = vadd.f32 1.0, %v7344_v61  ;;  %v2386_v61 = vmul.f32 %v9359_v44, %v9153_v48  ;;  %10758 = vst [vmem:[#allocation50_spill] sm:$0xff] %v9408_v3  ;;  %v2378_v48 = vmul.f32 %v9335_v58, %v9134_v7  ;;  %v6689_v7 = vld [vmem:[#allocation4 + $0x6c] ss:$16 sps:$4 sm:$0xff]   ;;  %v6684_v1 = vld [vmem:[#allocation4 + $0x288] ss:$16 sps:$4 sm:$0xff]  }
 0x28f   :  { %v7348_v19 = vpop.eup %7347  ;;  %v2147_v25 = vadd.f32 1.0, %v7346_v63  ;;  %7373 = vpow2.f32 %v1971_v39  ;;  %v6678_v63 = vld [vmem:[#allocation4 + $0x2a8] ss:$16 sps:$4 sm:$0xff]   ;;  %v2387_v44 = vmul.f32 %v9353_v4, %v9150_v28  ;;  %4564 = vmatpush1.bf16.msra.mxu1 %v6675_v40  ;;  %v2379_v28 = vmul.f32 %v9329_v45, %v9106_v18 }
 0x290   :  { %v7350_v8 = vpop.eup %7349  ;;  %7375 = vrcp.f32 %v2145_v42  ;;  %v2146_v17 = vadd.f32 1.0, %v7348_v19  ;;  %v1690_v19 = vpop.f32.mrf.mxu0  ;;  %4565 = vmatprep.subr.bf16.mxu1 %v6683_v46  ;;  %4677 = vmatpush1.bf16.msra.mxu0 %v6678_v63  ;;  %v2377_v32 = vmul.f32 %v9326_v43, %v9103_v21  ;;  %v9424_v5 = vpack.c.bf16 %v2388_v51, %v2380_v34  ;;  %v6692_v46 = vld [vmem:[#allocation4 + $0x26c] ss:$16 sps:$4 sm:$0xff]  }
 0x291   :  { %v7352_v39 = vpop.eup %7351  ;;  %7377 = vrcp.f32 %v2147_v25  ;;  %v2148_v0 = vadd.f32 1.0, %v7350_v8  ;;  %4678 = vmatprep.subr.bf16.mxu0 %v6686_v10  ;;  %v9429_v45 = vadd.f32 %v1577_v30, %v8807_v9  ;;  %v6687_v25 = vld [vmem:[#allocation4 + $0x68] ss:$16 sps:$4 sm:$0xff]   ;;  %v1794_v8 = vsub.f32 0.0, %v9396_v29  ;;  %v6695_v51 = vld [vmem:[#allocation4 + $0x4c] ss:$16 sps:$4 sm:$0xff]  }
 0x292   :  { %v7354_v41 = vpop.eup %7353  ;;  %7379 = vrcp.f32 %v2146_v17  ;;  %v2153_v42 = vadd.f32 1.0, %v7352_v39  ;;  %v9420_v17 = vpack.c.bf16 %v2386_v61, %v2378_v48  ;;  %10760 = vst [vmem:[#allocation52_spill] sm:$0xff] %v9424_v5  ;;  %v1579_v61 = vpop.f32.mrf.mxu1  ;;  %4488 = vmatprep.mubr.bf16.mxu0 %v9424_v5  ;;  %v9434_v39 = vpack.c.bf16 %v2385_v6, %v2377_v32 }
 0x293   :  { %v7356_v22 = vpop.eup %7355  ;;  %7381 = vrcp.f32 %v2148_v0  ;;  %v2155_v24 = vadd.f32 1.0, %v7354_v41  ;;  %v9426_v0 = vpack.c.bf16 %v2387_v44, %v2379_v28  ;;  %4566 = vmatpush1.bf16.msra.mxu1 %v6681_v54  ;;  %v1692_v63 = vpop.f32.mrf.mxu0  ;;  %v1796_v44 = vsub.f32 0.0, %v9399_v15  ;;  %v6690_v54 = vld [vmem:[#allocation4 + $0x268] ss:$16 sps:$4 sm:$0xff]  }
 0x294   :  { %v7358_v58 = vpop.eup %7357  ;;  %7383 = vrcp.f32 %v2153_v42  ;;  %v2154_v4 = vadd.f32 1.0, %v7356_v22  ;;  %10759 = vst [vmem:[#allocation51_spill] sm:$0xff] %v9420_v17  ;;  %4375 = vmatprep.mubr.bf16.mxu1 %v9420_v17  ;;  %10762 = vst [vmem:[#allocation54_spill] sm:$0xff] %v9434_v39  ;;  %4567 = vmatprep.subr.bf16.mxu1 %v6689_v7  ;;  %v1801_v42 = vsub.f32 0.0, %v9404_v23  ;;  %v10763_v34 = vsub.f32 0.0, %v9368_v57 }
 0x295   :  { %v7360_v40 = vpop.eup %7359  ;;  %7385 = vrcp.f32 %v2155_v24  ;;  %v2156_v37 = vadd.f32 1.0, %v7358_v58  ;;  %10761 = vst [vmem:[#allocation53_spill] sm:$0xff] %v9426_v0  ;;  %4489 = vmatmul.mubr.bf16.gmra.mxu0 %v9426_v0  ;;  %v1803_v24 = vsub.f32 0.0, %v9408_v3  ;;  %v9447_v30 = vadd.f32 %v1690_v19, %v8818_v11  ;;  %4376 = vmatmul.mubr.bf16.gmra.mxu1 %v9434_v39  ;;  %v6693_v7 = vld [vmem:[#allocation4 + $0x48] ss:$16 sps:$4 sm:$0xff]  }
 0x296   :  { %v7362_v41 = vpop.eup %7361  ;;  %7387 = vrcp.f32 %v2154_v4  ;;  %v2161_v18 = vadd.f32 1.0, %v7360_v40  ;;  %v1983_v6 = vmul.f32 1.442695, %v10763_v34  ;;  %4679 = vmatpush1.bf16.msra.mxu0 %v6684_v1  ;;  %v10765_v28 = vsub.f32 0.0, %v9376_v38  ;;  %v1694_v34 = vpop.f32.mrf.mxu0 }
 0x297   :  { %v7364_v21 = vpop.eup %7363  ;;  %7389 = vrcp.f32 %v2156_v37  ;;  %v2163_v43 = vadd.f32 1.0, %v7362_v41  ;;  %10764 = vst [vmem:[#allocation55_spill] sm:$0xff] %v9447_v30  ;;  %v1802_v40 = vsub.f32 0.0, %v9429_v45  ;;  %v9454_v32 = vadd.f32 %v1579_v61, %v10710_v50  ;;  %4568 = vmatpush1.bf16.msra.mxu1 %v6687_v25  ;;  %4680 = vmatprep.subr.bf16.mxu0 %v6692_v46  ;;  %v6698_v37 = vld [vmem:[#allocation4 + $0x24c] ss:$16 sps:$4 sm:$0xff]  }
 0x298   :  { %v9436_v10 = vpop.eup %7365  ;;  %7391 = vrcp.f32 %v2161_v18  ;;  %v2162_v48 = vadd.f32 1.0, %v7364_v21  ;;  %v1987_v4 = vmul.f32 1.442695, %v10765_v28  ;;  %v10766_v19 = vsub.f32 0.0, %v9380_v16  ;;  %4569 = vmatprep.subr.bf16.mxu1 %v6695_v51  ;;  %v6696_v61 = vld [vmem:[#allocation4 + $0x248] ss:$16 sps:$4 sm:$0xff]  }
 0x299   :  { %v9441_v22 = vpop.eup %7367  ;;  %7393 = vrcp.f32 %v2163_v43  ;;  %v10767_v18 = vsub.f32 0.0, %v9383_v35  ;;  %v9462_v43 = vadd.f32 %v1692_v63, %v8802_v12  ;;  %v6701_v28 = vld [vmem:[#allocation4 + $0x2c] ss:$16 sps:$4 sm:$0xff]   ;;  %v1999_v46 = vmul.f32 1.442695, %v1794_v8 }
 0x29a   :  { %v7370_v58 = vpop.eup %7369  ;;  %7395 = vrcp.f32 %v2162_v48  ;;  %v1997_v1 = vmul.f32 1.442695, %v10766_v19  ;;  %v1581_v48 = vpop.f32.mrf.mxu1  ;;  %v2003_v0 = vmul.f32 1.442695, %v1796_v44  ;;  %v2017_v19 = vmul.f32 1.442695, %v1803_v24  ;;  %4681 = vmatpush1.bf16.msra.mxu0 %v6690_v54 }
 0x29b   :  { %v7372_v41 = vpop.eup %7371  ;;  %7397 = vpow2.f32 %v9387_v14  ;;  %v2001_v21 = vmul.f32 1.442695, %v10767_v18  ;;  %v2013_v14 = vmul.f32 1.442695, %v1801_v42  ;;  %v1804_v18 = vsub.f32 0.0, %v9447_v30  ;;  %4570 = vmatpush1.bf16.msra.mxu1 %v6693_v7  ;;  %4682 = vmatprep.subr.bf16.mxu0 %v6698_v37  ;;  %v9475_v24 = vpop.f32.mrf.mxu0  ;;  %v10769_v30 = vld [vmem:[#allocation45_spill] sm:$0xff] }
 0x29c   :  { %v7374_v25 = vpop.eup %7373  ;;  %7399 = vpow2.f32 %v9389_v36  ;;  %v6699_v63 = vld [vmem:[#allocation4 + $0x28] ss:$16 sps:$4 sm:$0xff]   ;;  %v2015_v3 = vmul.f32 1.442695, %v1802_v40  ;;  %v1809_v51 = vsub.f32 0.0, %v9454_v32  ;;  %v9468_v23 = vadd.f32 %v1581_v48, %v8807_v9  ;;  %4571 = vmatprep.subr.bf16.mxu1 %v6701_v28 }
 0x29d   :  { %v7376_v39 = vpop.eup %7375  ;;  %v2164_v5 = vadd.f32 1.0, %v7374_v25  ;;  %7401 = vpow2.f32 %v1983_v6  ;;  %v6704_v36 = vld [vmem:[#allocation4 + $0x22c] ss:$16 sps:$4 sm:$0xff]   ;;  %v1811_v42 = vsub.f32 0.0, %v9462_v43  ;;  %v9473_v54 = vadd.f32 %v1694_v34, %v8818_v11  ;;  %v1585_v6 = vpop.f32.mrf.mxu1 }
 0x29e   :  { %v7378_v17 = vpop.eup %7377  ;;  %7403 = vpow2.f32 %v1987_v4  ;;  %v2401_v44 = vmul.f32 %v7376_v39, %v9217_v52  ;;  %v6707_v4 = vld [vmem:[#allocation4 + $0xc] ss:$16 sps:$4 sm:$0xff]   ;;  %v2394_v48 = vmul.f32 %v7370_v58, %v9195_v47  ;;  %v2396_v34 = vmul.f32 %v7372_v41, %v9211_v33  ;;  %4683 = vmatpush1.bf16.msra.mxu0 %v6696_v61 }
 0x29f   :  { %v7380_v8 = vpop.eup %7379  ;;  %7405 = vrcp.f32 %v2164_v5  ;;  %v2403_v7 = vmul.f32 %v7378_v17, %v9236_v53  ;;  %v10768_v5 = vld [vmem:[#allocation34_spill] sm:$0xff]  ;;  %v2395_v47 = vmul.f32 %v9441_v22, %v10769_v30  ;;  %v1810_v53 = vsub.f32 0.0, %v9468_v23  ;;  %4572 = vmatpush1.bf16.msra.mxu1 %v6699_v63  ;;  %4684 = vmatprep.subr.bf16.mxu0 %v6704_v36  ;;  %v6705_v17 = vld [vmem:[#allocation4 + $0x8] ss:$16 sps:$4 sm:$0xff]   ;;  %v9491_v58 = vpop.f32.mrf.mxu1  ;;  %v6713_v30 = vld [vmem:[#allocation4 + $0x1ec] ss:$16 sps:$4 sm:$0xff]  }
 0x2a0   :  { %v7382_v40 = vpop.eup %7381  ;;  %v2402_v37 = vmul.f32 %v7380_v8, %v9254_v60  ;;  %7407 = vpow2.f32 %v1997_v1  ;;  %v2393_v39 = vmul.f32 %v9436_v10, %v10768_v5  ;;  %v2019_v33 = vmul.f32 1.442695, %v1804_v18  ;;  %v6702_v22 = vld [vmem:[#allocation4 + $0x228] ss:$16 sps:$4 sm:$0xff]   ;;  %4573 = vmatprep.subr.bf16.mxu1 %v6707_v4 }
 0x2a1   :  { %v7384_v52 = vpop.eup %7383  ;;  %v2404_v25 = vmul.f32 %v7382_v40, %v9259_v56  ;;  %7409 = vpow2.f32 %v2001_v21  ;;  %v9493_v56 = vpop.f32.mrf.mxu0  ;;  %v9501_v61 = vpack.c.bf16 %v2403_v7, %v2395_v47  ;;  %v2033_v63 = vmul.f32 1.442695, %v1811_v42 }
 0x2a2   :  { %v9484_v28 = vpop.eup %7385  ;;  %7411 = vpow2.f32 %v1999_v46  ;;  %v9489_v60 = vpack.c.bf16 %v2402_v37, %v2394_v48  ;;  %v9497_v1 = vpack.c.bf16 %v2401_v44, %v2393_v39  ;;  %v2029_v46 = vmul.f32 1.442695, %v1809_v51  ;;  %v9512_v42 = vpop.f32.mrf.mxu1  ;;  %4685 = vmatpush1.bf16.msra.mxu0 %v6702_v22  ;;  %v6719_v48 = vld [vmem:[#allocation4 + $0x1cc] ss:$16 sps:$4 sm:$0xff]  }
 0x2a3   :  { %v7388_v10 = vpop.eup %7387  ;;  %7413 = vpow2.f32 %v2003_v0  ;;  %v9495_v41 = vpack.c.bf16 %v2404_v25, %v2396_v34  ;;  %10773 = vst [vmem:[#allocation57_spill] sm:$0xff] %v9501_v61  ;;  %v6710_v0 = vld [vmem:[#allocation4 + $0x20c] ss:$16 sps:$4 sm:$0xff]   ;;  %v2031_v8 = vmul.f32 1.442695, %v1810_v53  ;;  %v1812_v44 = vsub.f32 0.0, %v9473_v54  ;;  %4574 = vmatpush1.bf16.msra.mxu1 %v6705_v17  ;;  %v9514_v40 = vpop.f32.mrf.mxu0 }
 0x2a4   :  { %10770 = vst [vmem:[#allocation34_spill] sm:$0xff] %v9489_v60  ;;  %10772 = vst [vmem:[#allocation56_spill] sm:$0xff] %v9497_v1  ;;  %v9499_v21 = vpop.eup %7389  ;;  %7415 = vpow2.f32 %v2013_v14  ;;  %4385 = vmatprep.mubr.bf16.mxu1 %v9489_v60  ;;  %v6711_v14 = vld [vmem:[#allocation4 + $0x1e8] ss:$16 sps:$4 sm:$0xff]   ;;  %4575 = vmatprep.subr.bf16.mxu1 %v6713_v30  ;;  %v2410_v37 = vmul.f32 %v7388_v10, %v9285_v27  ;;  %v9521_v25 = vadd.f32 %v9475_v24, %v8802_v12 }
 0x2a5   :  { %10771 = vst [vmem:[#allocation45_spill] sm:$0xff] %v9495_v41  ;;  %v7392_v18 = vpop.eup %7391  ;;  %7417 = vpow2.f32 %v2017_v19  ;;  %4498 = vmatprep.mubr.bf16.mxu0 %v9495_v41  ;;  %4386 = vmatmul.mubr.bf16.gmra.mxu1 %v9497_v1  ;;  %v9510_v19 = vadd.f32 %v1585_v6, %v10710_v50  ;;  %v2409_v6 = vmul.f32 %v7384_v52, %v9264_v26  ;;  %v2035_v17 = vmul.f32 1.442695, %v1812_v44  ;;  %v6717_v27 = vld [vmem:[#allocation4 + $0x1c8] ss:$16 sps:$4 sm:$0xff]   ;;  %v9526_v26 = vpop.f32.mrf.mxu1 }
 0x2a6   :  { %v7394_v36 = vpop.eup %7393  ;;  %7419 = vpow2.f32 %v2015_v3  ;;  %4499 = vmatmul.mubr.bf16.gmra.mxu0 %v9501_v61  ;;  %v2417_v4 = vmul.f32 %v7392_v18, %v9301_v2  ;;  %v6708_v3 = vld [vmem:[#allocation4 + $0x208] ss:$16 sps:$4 sm:$0xff]   ;;  %4686 = vmatprep.subr.bf16.mxu0 %v6710_v0  ;;  %v6716_v2 = vld [vmem:[#allocation4 + $0x3ec] ss:$16 sps:$4 sm:$0xff]   ;;  %v9528_v52 = vpop.f32.mrf.mxu0 }
 0x2a7   :  { %v7396_v51 = vpop.eup %7395  ;;  %7421 = vpow2.f32 %v2019_v33  ;;  %4576 = vmatpush2.bf16.msra.mxu1 %v6711_v14  ;;  %v1817_v22 = vsub.f32 0.0, %v9510_v19  ;;  %4687 = vmatpush1.bf16.msra.mxu0 %v6708_v3  ;;  %v6714_v24 = vld [vmem:[#allocation4 + $0x3e8] ss:$16 sps:$4 sm:$0xff]   ;;  %v2419_v18 = vmul.f32 %v7394_v36, %v9307_v31  ;;  %v6722_v44 = vld [vmem:[#allocation4 + $0x3cc] ss:$16 sps:$4 sm:$0xff]   ;;  %v1819_v3 = vsub.f32 0.0, %v9521_v25 }
 0x2a8   :  { %v7398_v7 = vpop.eup %7397  ;;  %v2418_v5 = vmul.f32 %v7396_v51, %v9319_v59  ;;  %7423 = vpow2.f32 %v2029_v46  ;;  %v9530_v30 = vpack.c.bf16 %v2417_v4, %v2409_v6  ;;  %4577 = vmatprep.subr.bf16.mxu1 %v6719_v48  ;;  %v6725_v46 = vld [vmem:[#allocation4 + $0x1ac] ss:$16 sps:$4 sm:$0xff]   ;;  %4688 = vmatprep.subr.bf16.mxu0 %v6716_v2  ;;  %v2412_v51 = vmul.f32 %v9499_v21, %v9296_v13  ;;  %v6720_v2 = vld [vmem:[#allocation4 + $0x3c8] ss:$16 sps:$4 sm:$0xff]  }
 0x2a9   :  { %v7400_v39 = vpop.eup %7399  ;;  %v2169_v34 = vadd.f32 1.0, %v7398_v7  ;;  %7425 = vpow2.f32 %v2033_v63  ;;  %v9547_v48 = vadd.f32 %v9493_v56, %v8818_v11  ;;  %v6723_v7 = vld [vmem:[#allocation4 + $0x1a8] ss:$16 sps:$4 sm:$0xff]   ;;  %v6728_v56 = vld [vmem:[#allocation4 + $0x3ac] ss:$16 sps:$4 sm:$0xff]  }
 0x2aa   :  { %v7402_v47 = vpop.eup %7401  ;;  %v2171_v53 = vadd.f32 1.0, %v7400_v39  ;;  %7427 = vpow2.f32 %v2031_v8  ;;  %v9523_v33 = vpack.c.bf16 %v2418_v5, %v2410_v37  ;;  %10775 = vst [vmem:[#allocation59_spill] sm:$0xff] %v9530_v30  ;;  %v9535_v8 = vadd.f32 %v9491_v58, %v8807_v9  ;;  %v1708_v37 = vpop.f32.mrf.mxu0  ;;  %v6731_v39 = vld [vmem:[#allocation4 + $0x18c] ss:$16 sps:$4 sm:$0xff]  }
 0x2ab   :  { %v7404_v59 = vpop.eup %7403  ;;  %7429 = vrcp.f32 %v2169_v34  ;;  %v2170_v10 = vadd.f32 1.0, %v7402_v47  ;;  %v2411_v58 = vmul.f32 %v9484_v28, %v9268_v62  ;;  %4578 = vmatpush2.bf16.msra.mxu1 %v6717_v27  ;;  %4689 = vmatpush2.bf16.msra.mxu0 %v6714_v24  ;;  %v1820_v24 = vsub.f32 0.0, %v9547_v48 }
 0x2ac   :  { %10774 = vst [vmem:[#allocation58_spill] sm:$0xff] %v9523_v33  ;;  %v7406_v0 = vpop.eup %7405  ;;  %7431 = vrcp.f32 %v2171_v53  ;;  %v2172_v63 = vadd.f32 1.0, %v7404_v59  ;;  %4395 = vmatprep.mubr.bf16.mxu1 %v9523_v33  ;;  %4579 = vmatprep.subr.bf16.mxu1 %v6725_v46  ;;  %v9553_v53 = vmul.f32 1.442695, %v1817_v22  ;;  %v6729_v46 = vld [vmem:[#allocation4 + $0x188] ss:$16 sps:$4 sm:$0xff]   ;;  %v9563_v22 = vadd.f32 %v9512_v42, %v10710_v50 }
 0x2ad   :  { %v7408_v14 = vpop.eup %7407  ;;  %v2420_v4 = vmul.f32 %v7406_v0, %v9333_v49  ;;  %7433 = vrcp.f32 %v2170_v10  ;;  %4396 = vmatmul.mubr.bf16.gmra.mxu1 %v9530_v30  ;;  %v1595_v49 = vpop.f32.mrf.mxu1  ;;  %v9551_v28 = vpack.c.bf16 %v2419_v18, %v2411_v58  ;;  %4690 = vmatprep.subr.bf16.mxu0 %v6722_v44  ;;  %v9557_v10 = vmul.f32 1.442695, %v1819_v3 }
 0x2ae   :  { %v7410_v31 = vpop.eup %7409  ;;  %7435 = vrcp.f32 %v2172_v63  ;;  %v2177_v36 = vadd.f32 1.0, %v7408_v14  ;;  %v9567_v63 = vadd.f32 %v9514_v40, %v8802_v12  ;;  %v1710_v14 = vpop.f32.mrf.mxu0  ;;  %v9571_v58 = vadd.f32 %v9526_v26, %v8807_v9  ;;  %v6734_v40 = vld [vmem:[#allocation4 + $0x38c] ss:$16 sps:$4 sm:$0xff]  }
 0x2af   :  { %v7412_v13 = vpop.eup %7411  ;;  %v2179_v21 = vadd.f32 1.0, %v7410_v31  ;;  %7437 = vpow2.f32 %v2035_v17  ;;  %v9549_v5 = vpack.c.bf16 %v2420_v4, %v2412_v51  ;;  %10777 = vst [vmem:[#allocation61_spill] sm:$0xff] %v9551_v28  ;;  %v1818_v17 = vsub.f32 0.0, %v9535_v8  ;;  %4580 = vmatpush2.bf16.msra.mxu1 %v6723_v7  ;;  %v1597_v44 = vpop.f32.mrf.mxu1  ;;  %4691 = vmatpush2.bf16.msra.mxu0 %v6720_v2  ;;  %v6726_v51 = vld [vmem:[#allocation4 + $0x3a8] ss:$16 sps:$4 sm:$0xff]  }
 0x2b0   :  { %v7414_v62 = vpop.eup %7413  ;;  %7439 = vrcp.f32 %v2177_v36  ;;  %v2178_v6 = vadd.f32 1.0, %v7412_v13  ;;  %4581 = vmatprep.subr.bf16.mxu1 %v6731_v39  ;;  %v6737_v4 = vld [vmem:[#allocation4 + $0x16c] ss:$16 sps:$4 sm:$0xff]   ;;  %v9575_v42 = vadd.f32 %v9528_v52, %v8818_v11  ;;  %4692 = vmatprep.subr.bf16.mxu0 %v6728_v56  ;;  %v9578_v13 = vadd.f32 %v1595_v49, %v10710_v50 }
 0x2b1   :  { %10776 = vst [vmem:[#allocation60_spill] sm:$0xff] %v9549_v5  ;;  %v7416_v34 = vpop.eup %7415  ;;  %7441 = vrcp.f32 %v2179_v21  ;;  %v2180_v47 = vadd.f32 1.0, %v7414_v62  ;;  %4508 = vmatprep.mubr.bf16.mxu0 %v9549_v5  ;;  %v9581_v21 = vadd.f32 %v1708_v37, %v8802_v12  ;;  %v9584_v26 = vadd.f32 %v1597_v44, %v8807_v9  ;;  %v6732_v62 = vld [vmem:[#allocation4 + $0x388] ss:$16 sps:$4 sm:$0xff]   ;;  %v1712_v44 = vpop.f32.mrf.mxu0 }
 0x2b2   :  { %v7418_v27 = vpop.eup %7417  ;;  %7443 = vrcp.f32 %v2178_v6  ;;  %v2185_v59 = vadd.f32 1.0, %v7416_v34  ;;  %4509 = vmatmul.mubr.bf16.gmra.mxu0 %v9551_v28  ;;  %v9587_v52 = vadd.f32 %v1710_v14, %v8818_v11  ;;  %v6735_v6 = vld [vmem:[#allocation4 + $0x168] ss:$16 sps:$4 sm:$0xff]   ;;  %v1825_v49 = vsub.f32 0.0, %v9563_v22  ;;  %v6740_v14 = vld [vmem:[#allocation4 + $0x36c] ss:$16 sps:$4 sm:$0xff]  }
 0x2b3   :  { %v7420_v0 = vpop.eup %7419  ;;  %7445 = vrcp.f32 %v2180_v47  ;;  %v2187_v18 = vadd.f32 1.0, %v7418_v27  ;;  %4582 = vmatpush2.bf16.msra.mxu1 %v6729_v46  ;;  %v1827_v37 = vsub.f32 0.0, %v9567_v63  ;;  %v1599_v47 = vpop.f32.mrf.mxu1  ;;  %4693 = vmatpush2.bf16.msra.mxu0 %v6726_v51  ;;  %v6743_v27 = vld [vmem:[#allocation4 + $0x14c] ss:$16 sps:$4 sm:$0xff]   ;;  %v1828_v46 = vsub.f32 0.0, %v9575_v42 }
 0x2b4   :  { %v7422_v3 = vpop.eup %7421  ;;  %7447 = vrcp.f32 %v2185_v59  ;;  %v2186_v31 = vadd.f32 1.0, %v7420_v0  ;;  %4583 = vmatprep.subr.bf16.mxu1 %v6737_v4  ;;  %4694 = vmatprep.subr.bf16.mxu0 %v6734_v40  ;;  %v1835_v51 = vsub.f32 0.0, %v9581_v21  ;;  %v6738_v4 = vld [vmem:[#allocation4 + $0x368] ss:$16 sps:$4 sm:$0xff]   ;;  %v2061_v30 = vmul.f32 1.442695, %v1825_v49 }
 0x2b5   :  { %v7424_v36 = vpop.eup %7423  ;;  %7449 = vrcp.f32 %v2187_v18  ;;  %v2188_v7 = vadd.f32 1.0, %v7422_v3  ;;  %v1826_v18 = vsub.f32 0.0, %v9571_v58  ;;  %v6741_v28 = vld [vmem:[#allocation4 + $0x148] ss:$16 sps:$4 sm:$0xff]   ;;  %v1601_v5 = vpop.f32.mrf.mxu1  ;;  %v2067_v1 = vmul.f32 1.442695, %v1828_v46 }
 0x2b6   :  { %v7426_v2 = vpop.eup %7425  ;;  %7451 = vrcp.f32 %v2186_v31  ;;  %v2193_v39 = vadd.f32 1.0, %v7424_v36  ;;  %v2047_v31 = vmul.f32 1.442695, %v1818_v17  ;;  %v1833_v36 = vsub.f32 0.0, %v9578_v13  ;;  %v6755_v46 = vld [vmem:[#allocation4 + $0x10c] ss:$16 sps:$4 sm:$0xff]  }
 0x2b7   :  { %v7428_v56 = vpop.eup %7427  ;;  %7453 = vrcp.f32 %v2188_v7  ;;  %v2195_v34 = vadd.f32 1.0, %v7426_v2  ;;  %v2051_v2 = vmul.f32 1.442695, %v1820_v24  ;;  %4584 = vmatpush2.bf16.msra.mxu1 %v6735_v6  ;;  %v9603_v17 = vadd.f32 %v1599_v47, %v10710_v50  ;;  %4695 = vmatpush2.bf16.msra.mxu0 %v6732_v62  ;;  %v6746_v24 = vld [vmem:[#allocation4 + $0x34c] ss:$16 sps:$4 sm:$0xff]  }
 0x2b8   :  { %v9591_v59 = vpop.eup %7429  ;;  %7455 = vrcp.f32 %v2193_v39  ;;  %v2194_v0 = vadd.f32 1.0, %v7428_v56  ;;  %v1834_v39 = vsub.f32 0.0, %v9584_v26  ;;  %v1836_v56 = vsub.f32 0.0, %v9587_v52  ;;  %4585 = vmatprep.subr.bf16.mxu1 %v6743_v27  ;;  %4696 = vmatprep.subr.bf16.mxu0 %v6740_v14  ;;  %v6747_v27 = vld [vmem:[#allocation4 + $0x128] ss:$16 sps:$4 sm:$0xff]  }
 0x2b9   :  { %v9595_v3 = vpop.eup %7431  ;;  %7457 = vrcp.f32 %v2195_v34  ;;  %v9606_v34 = vadd.f32 %v1712_v44, %v8802_v12  ;;  %v2065_v6 = vmul.f32 1.442695, %v1827_v37  ;;  %v2063_v33 = vmul.f32 1.442695, %v1826_v18  ;;  %v6744_v18 = vld [vmem:[#allocation4 + $0x348] ss:$16 sps:$4 sm:$0xff]  }
 0x2ba   :  { %v7434_v7 = vpop.eup %7433  ;;  %7459 = vrcp.f32 %v2194_v0  ;;  %v6749_v0 = vld [vmem:[#allocation4 + $0x12c] ss:$16 sps:$4 sm:$0xff]   ;;  %v2077_v50 = vmul.f32 1.442695, %v1833_v36  ;;  %v2081_v47 = vmul.f32 1.442695, %v1835_v51  ;;  %v9610_v62 = vadd.f32 %v1601_v5, %v8807_v9 }
 0x2bb   :  { %v7436_v40 = vpop.eup %7435  ;;  %7461 = vpow2.f32 %v9553_v53  ;;  %v2079_v12 = vmul.f32 1.442695, %v1834_v39  ;;  %v2083_v44 = vmul.f32 1.442695, %v1836_v56  ;;  %4586 = vmatpush2.bf16.msra.mxu1 %v6741_v28  ;;  %v1841_v37 = vsub.f32 0.0, %v9603_v17  ;;  %4697 = vmatpush2.bf16.msra.mxu0 %v6738_v4  ;;  %v1714_v28 = vpop.f32.mrf.mxu0 }
 0x2bc   :  { %v7438_v61 = vpop.eup %7437  ;;  %7463 = vpow2.f32 %v9557_v10  ;;  %4587 = vmatprep.subr.bf16.mxu1 %v6749_v0  ;;  %4698 = vmatprep.subr.bf16.mxu0 %v6746_v24  ;;  %v2425_v51 = vmul.f32 %v9591_v59, %v9339_v20  ;;  %v2428_v4 = vmul.f32 %v7436_v40, %v9376_v38  ;;  %v9632_v20 = vadd.f32 %v1714_v28, %v8818_v11 }
 0x2bd   :  { %v7440_v53 = vpop.eup %7439  ;;  %v2196_v49 = vadd.f32 1.0, %v7438_v61  ;;  %7465 = vpow2.f32 %v2047_v31  ;;  %v1843_v61 = vsub.f32 0.0, %v9606_v34  ;;  %v2426_v31 = vmul.f32 %v7434_v7, %v9368_v57  ;;  %v6758_v7 = vld [vmem:[#allocation4 + $0x30c] ss:$16 sps:$4 sm:$0xff]  }
 0x2be   :  { %v7442_v41 = vpop.eup %7441  ;;  %7467 = vpow2.f32 %v2051_v2  ;;  %v2433_v10 = vmul.f32 %v7440_v53, %v9380_v16  ;;  %v6752_v16 = vld [vmem:[#allocation4 + $0x32c] ss:$16 sps:$4 sm:$0xff]   ;;  %v2427_v57 = vmul.f32 %v9595_v3, %v9346_v55  ;;  %v2093_v3 = vmul.f32 1.442695, %v1841_v37  ;;  %v6756_v53 = vld [vmem:[#allocation4 + $0x308] ss:$16 sps:$4 sm:$0xff]  }
 0x2bf   :  { %v7444_v60 = vpop.eup %7443  ;;  %7469 = vrcp.f32 %v2196_v49  ;;  %v2435_v9 = vmul.f32 %v7442_v41, %v9383_v35  ;;  %v1842_v35 = vsub.f32 0.0, %v9610_v62  ;;  %4588 = vmatpush2.bf16.msra.mxu1 %v6747_v27  ;;  %4699 = vmatpush2.bf16.msra.mxu0 %v6744_v18  ;;  %v6761_v55 = vld [vmem:[#allocation4 + $0x4ec] ss:$16 sps:$4 sm:$0xff]  }
 0x2c0   :  { %v7446_v14 = vpop.eup %7445  ;;  %v2434_v5 = vmul.f32 %v7444_v60, %v9396_v29  ;;  %7471 = vpow2.f32 %v2061_v30  ;;  %v6753_v60 = vld [vmem:[#allocation4 + $0x108] ss:$16 sps:$4 sm:$0xff]   ;;  %v9629_v30 = vpack.c.bf16 %v2433_v10, %v2425_v51  ;;  %4589 = vmatprep.subr.bf16.mxu1 %v6755_v46  ;;  %4700 = vmatprep.subr.bf16.mxu0 %v6752_v16 }
 0x2c1   :  { %v7448_v36 = vpop.eup %7447  ;;  %v2436_v2 = vmul.f32 %v7446_v14, %v9399_v15  ;;  %7473 = vpow2.f32 %v2065_v6  ;;  %v6750_v15 = vld [vmem:[#allocation4 + $0x328] ss:$16 sps:$4 sm:$0xff]   ;;  %v9636_v59 = vpack.c.bf16 %v2435_v9, %v2427_v57  ;;  %v2095_v40 = vmul.f32 1.442695, %v1842_v35 }
 0x2c2   :  { %v9622_v39 = vpop.eup %7449  ;;  %7475 = vpow2.f32 %v2063_v33  ;;  %v9627_v29 = vpack.c.bf16 %v2434_v5, %v2426_v31  ;;  %v1844_v6 = vsub.f32 0.0, %v9632_v20  ;;  %v10778_v10 = vld [vmem:[#allocation49_spill] sm:$0xff]  ;;  %v10779_v16 = vld [vmem:[#allocation55_spill] sm:$0xff] }
 0x2c3   :  { %v7452_v41 = vpop.eup %7451  ;;  %7477 = vpow2.f32 %v2067_v1  ;;  %v9634_v38 = vpack.c.bf16 %v2436_v2, %v2428_v4  ;;  %v2097_v1 = vmul.f32 1.442695, %v1843_v61  ;;  %4590 = vmatpush2.bf16.msra.mxu1 %v6753_v60  ;;  %4701 = vmatpush2.bf16.msra.mxu0 %v6750_v15  ;;  %v2441_v37 = vmul.f32 %v7448_v36, %v10778_v10  ;;  %v10780_v2 = vld [vmem:[#allocation50_spill] sm:$0xff] }
 0x2c4   :  { %v7454_v33 = vpop.eup %7453  ;;  %7479 = vpow2.f32 %v2077_v50  ;;  %4405 = vmatprep.mubr.bf16.mxu1 %v9627_v29  ;;  %4785 = vmatprep.subr.bf16.mxu1 %v6761_v55  ;;  %v2442_v50 = vmul.f32 %v7452_v41, %v9429_v45  ;;  %v2099_v31 = vmul.f32 1.442695, %v1844_v6  ;;  %v2443_v57 = vmul.f32 %v9622_v39, %v10780_v2  ;;  %v10782_v10 = vld [vmem:[#allocation10_spill] sm:$0xff] }
 0x2c5   :  { %v7456_v56 = vpop.eup %7455  ;;  %7481 = vpow2.f32 %v2081_v47  ;;  %4518 = vmatprep.mubr.bf16.mxu0 %v9634_v38  ;;  %4406 = vmatmul.mubr.bf16.gmra.mxu1 %v9629_v30  ;;  %v2444_v36 = vmul.f32 %v7454_v33, %v10779_v16 }
 0x2c6   :  { %v7458_v11 = vpop.eup %7457  ;;  %7483 = vpow2.f32 %v2079_v12  ;;  %4519 = vmatmul.mubr.bf16.gmra.mxu0 %v9636_v59  ;;  %v2449_v0 = vmul.f32 %v7456_v56, %v9454_v32  ;;  %4702 = vmatprep.subr.bf16.mxu0 %v6758_v7  ;;  %v6764_v12 = vld [vmem:[#allocation4 + $0x6ec] ss:$16 sps:$4 sm:$0xff]   ;;  %v2805_v56 = vld [vmem:[%s10543_s6] sm:$0xf] }
 0x2c7   :  { %v7460_v24 = vpop.eup %7459  ;;  %7485 = vpow2.f32 %v2083_v44  ;;  %4703 = vmatpush2.bf16.msra.mxu0 %v6756_v53  ;;  %v2451_v9 = vmul.f32 %v7458_v11, %v9462_v43  ;;  %v10781_v53 = vld [vmem:[#allocation9_spill] sm:$0xff] }
 0x2c8   :  { %v7462_v49 = vpop.eup %7461  ;;  %v2450_v47 = vmul.f32 %v7460_v24, %v9468_v23  ;;  %7487 = vpow2.f32 %v2093_v3  ;;  %v9649_v14 = vpack.c.bf16 %v2449_v0, %v2441_v37  ;;  %4898 = vmatprep.subr.bf16.mxu0 %v6764_v12  ;;  %v9671_v37 = vrot.slane %v2805_v56, %v10782_v10 }
 0x2c9   :  { %v7464_v27 = vpop.eup %7463  ;;  %v2201_v61 = vadd.f32 1.0, %v7462_v49  ;;  %7489 = vpow2.f32 %v2097_v1  ;;  %v9660_v55 = vpack.c.bf16 %v2451_v9, %v2443_v57  ;;  %v9668_v49 = vrot.slane %v2805_v56, %v10781_v53 }
 0x2ca   :  { %v7466_v32 = vpop.eup %7465  ;;  %v2203_v44 = vadd.f32 1.0, %v7464_v27  ;;  %7491 = vpow2.f32 %v2095_v40  ;;  %v9647_v18 = vpack.c.bf16 %v2450_v47, %v2442_v50 }
 0x2cb   :  { %v7468_v46 = vpop.eup %7467  ;;  %7493 = vrcp.f32 %v2201_v61  ;;  %v2202_v45 = vadd.f32 1.0, %v7466_v32 }
 0x2cc   :  { %v7470_v23 = vpop.eup %7469  ;;  %7495 = vrcp.f32 %v2203_v44  ;;  %v2204_v5 = vadd.f32 1.0, %v7468_v46  ;;  %4415 = vmatprep.mubr.bf16.mxu1 %v9647_v18 }
 0x2cd   :  { %v7472_v28 = vpop.eup %7471  ;;  %v2452_v51 = vmul.f32 %v7470_v23, %v9473_v54  ;;  %7497 = vrcp.f32 %v2202_v45  ;;  %4416 = vmatmul.mubr.bf16.gmra.mxu1 %v9649_v14 }
 0x2ce   :  { %v7474_v4 = vpop.eup %7473  ;;  %7499 = vrcp.f32 %v2204_v5  ;;  %v2209_v35 = vadd.f32 1.0, %v7472_v28 }
 0x2cf   :  { %v7476_v43 = vpop.eup %7475  ;;  %v2211_v60 = vadd.f32 1.0, %v7474_v4  ;;  %7501 = vpow2.f32 %v2099_v31  ;;  %v9658_v41 = vpack.c.bf16 %v2452_v51, %v2444_v36 }
 0x2d0   :  { %v7478_v15 = vpop.eup %7477  ;;  %7503 = vrcp.f32 %v2209_v35  ;;  %v2210_v33 = vadd.f32 1.0, %v7476_v43 }
 0x2d1   :  { %v7480_v54 = vpop.eup %7479  ;;  %7505 = vrcp.f32 %v2211_v60  ;;  %v2212_v3 = vadd.f32 1.0, %v7478_v15  ;;  %4528 = vmatprep.mubr.bf16.mxu0 %v9658_v41 }
 0x2d2   :  { %v7482_v7 = vpop.eup %7481  ;;  %7507 = vrcp.f32 %v2210_v33  ;;  %4529 = vmatmul.mubr.bf16.gmra.mxu0 %v9660_v55  ;;  %v2217_v24 = vadd.f32 1.0, %v7480_v54 }
 0x2d3   :  { %v7484_v39 = vpop.eup %7483  ;;  %7509 = vrcp.f32 %v2212_v3  ;;  %v2219_v45 = vadd.f32 1.0, %v7482_v7 }
 0x2d4   :  { %v7486_v1 = vpop.eup %7485  ;;  %v2218_v11 = vadd.f32 1.0, %v7484_v39  ;;  %v4141_v44 = vpop.f32.mrf.mxu1 }
 0x2d5   :  { %v7488_v40 = vpop.eup %7487  ;;  %v2220_v32 = vadd.f32 1.0, %v7486_v1  ;;  %v4142_v31 = vadd.f32 %v4141_v44, %v9668_v49 }
 0x2d6   :  { %v7490_v0 = vpop.eup %7489  ;;  %v2225_v6 = vadd.f32 1.0, %v7488_v40  ;;  %7511 = vrcp.f32 %v2218_v11  ;;  %v4254_v23 = vpop.f32.mrf.mxu0 }
 0x2d7   :  { %v7492_v50 = vpop.eup %7491  ;;  %v2227_v12 = vadd.f32 1.0, %v7490_v0  ;;  %v4143_v5 = vpop.f32.mrf.mxu1  ;;  %v9674_v16 = vadd.f32 %v4254_v23, %v4142_v31 }
 0x2d8   :  { %v7494_v47 = vpop.eup %7493  ;;  %7513 = vrcp.f32 %v2225_v6  ;;  %v2226_v27 = vadd.f32 1.0, %v7492_v50  ;;  %v4144_v36 = vadd.f32 %v4143_v5, %v9671_v37  ;;  %v4256_v2 = vpop.f32.mrf.mxu0 }
 0x2d9   :  { %v7496_v61 = vpop.eup %7495  ;;  %7515 = vrcp.f32 %v2217_v24  ;;  %v9683_v7 = vpop.f32.mrf.mxu1  ;;  %v2457_v39 = vmul.f32 %v7494_v47, %v9510_v19 }
 0x2da   :  { %v7498_v46 = vpop.eup %7497  ;;  %7517 = vrcp.f32 %v2226_v27  ;;  %v9677_v35 = vadd.f32 %v4256_v2, %v4144_v36  ;;  %v9688_v11 = vpop.f32.mrf.mxu0  ;;  %v10783_v2 = vld [vmem:[#allocation28_spill] sm:$0xff] }
 0x2db   :  { %v7500_v9 = vpop.eup %7499  ;;  %7519 = vrcp.f32 %v2227_v12  ;;  %v2458_v33 = vmul.f32 %v7498_v46, %v9535_v8  ;;  %v9700_v19 = vpop.f32.mrf.mxu1 }
 0x2dc   :  { %v7502_v28 = vpop.eup %7501  ;;  %7521 = vrcp.f32 %v2220_v32  ;;  %v2460_v56 = vmul.f32 %v7500_v9, %v9547_v48 }
 0x2dd   :  { %v7504_v51 = vpop.eup %7503  ;;  %v2228_v4 = vadd.f32 1.0, %v7502_v28  ;;  %7523 = vrcp.f32 %v2219_v45 }
 0x2de   :  { %v7506_v57 = vpop.eup %7505  ;;  %v2465_v60 = vmul.f32 %v7504_v51, %v9563_v22  ;;  %v2459_v22 = vmul.f32 %v7496_v61, %v9521_v25 }
 0x2df   :  { %v7508_v43 = vpop.eup %7507  ;;  %7525 = vrcp.f32 %v2228_v4  ;;  %v2467_v54 = vmul.f32 %v7506_v57, %v9567_v63 }
 0x2e0   :  { %v7510_v15 = vpop.eup %7509  ;;  %v2466_v3 = vmul.f32 %v7508_v43, %v9571_v58  ;;  %v9693_v24 = vpack.c.bf16 %v2465_v60, %v2457_v39  ;;  %v6765_v39 = vld [vmem:[#allocation4 + $0x4c8] ss:$16 sps:$4 sm:$0xff]  }
 0x2e1   :  { %v2468_v1 = vmul.f32 %v7510_v15, %v9575_v42  ;;  %v9697_v58 = vpack.c.bf16 %v2467_v54, %v2459_v22  ;;  %v9704_v42 = vpop.f32.mrf.mxu0  ;;  %v10784_v15 = vld [vmem:[#allocation29_spill] sm:$0xff] }
 0x2e2   :  { %v9691_v40 = vpack.c.bf16 %v2466_v3, %v2458_v33  ;;  %v6767_v33 = vld [vmem:[#allocation4 + $0x4cc] ss:$16 sps:$4 sm:$0xff]   ;;  %v10786_v3 = vld [vmem:[#allocation36_spill] sm:$0xff] }
 0x2e3   :  { %v9695_v8 = vpack.c.bf16 %v2468_v1, %v2460_v56  ;;  %v7512_v63 = vpop.eup %7511  ;;  %v10785_v54 = vld [vmem:[#allocation25_spill] sm:$0xff] }
 0x2e4   :  { %4425 = vmatprep.mubr.bf16.mxu1 %v9691_v40  ;;  %v2474_v53 = vmul.f32 %v7512_v63, %v9584_v26  ;;  %v6762_v1 = vld [vmem:[#allocation4 + $0x6e8] ss:$16 sps:$4 sm:$0xff]  }
 0x2e5   :  { %v7514_v48 = vpop.eup %7513  ;;  %4538 = vmatprep.mubr.bf16.mxu0 %v9695_v8  ;;  %4426 = vmatmul.mubr.bf16.gmra.mxu1 %v9693_v24 }
 0x2e6   :  { %v7516_v25 = vpop.eup %7515  ;;  %4539 = vmatmul.mubr.bf16.gmra.mxu0 %v9697_v58  ;;  %v2481_v6 = vmul.f32 %v7514_v48, %v9603_v17  ;;  %v4151_v47 = vpop.f32.mrf.mxu1  ;;  %v6770_v48 = vld [vmem:[#allocation4 + $0x6cc] ss:$16 sps:$4 sm:$0xff]  }
 0x2e7   :  { %v7518_v0 = vpop.eup %7517  ;;  %v2473_v27 = vmul.f32 %v7516_v25, %v9578_v13  ;;  %v4152_v10 = vadd.f32 %v4151_v47, %v9668_v49  ;;  %v4264_v61 = vpop.f32.mrf.mxu0  ;;  %v6773_v25 = vld [vmem:[#allocation4 + $0x4ac] ss:$16 sps:$4 sm:$0xff]   ;;  %v10787_v47 = vld [vmem:[#allocation26_spill] sm:$0xff] }
 0x2e8   :  { %v2482_v50 = vmul.f32 %v7518_v0, %v9610_v62  ;;  %v7520_v12 = vpop.eup %7519  ;;  %v4153_v46 = vpop.f32.mrf.mxu1 }
 0x2e9   :  { %v7522_v32 = vpop.eup %7521  ;;  %v9714_v31 = vpack.c.bf16 %v2481_v6, %v2473_v27  ;;  %v9716_v23 = vadd.f32 %v4264_v61, %v4152_v10  ;;  %v4154_v26 = vadd.f32 %v4153_v46, %v9671_v37  ;;  %v4266_v17 = vpop.f32.mrf.mxu0  ;;  %v2483_v9 = vmul.f32 %v7520_v12, %v9606_v34  ;;  %v6771_v12 = vld [vmem:[#allocation4 + $0x4a8] ss:$16 sps:$4 sm:$0xff]  }
 0x2ea   :  { %v9712_v44 = vpack.c.bf16 %v2482_v50, %v2474_v53  ;;  %v7524_v45 = vpop.eup %7523  ;;  %v4155_v13 = vpop.f32.mrf.mxu1  ;;  %v2476_v5 = vmul.f32 %v7522_v32, %v9587_v52  ;;  %v6759_v52 = vld [vmem:[#allocation4 + $0x4e8] ss:$16 sps:$4 sm:$0xff]   ;;  %v6779_v32 = vld [vmem:[#allocation4 + $0x48c] ss:$16 sps:$4 sm:$0xff]  }
 0x2eb   :  { %v9724_v36 = vadd.f32 %v4266_v17, %v4154_v26  ;;  %v4156_v51 = vadd.f32 %v4155_v13, %v9668_v49  ;;  %v2475_v4 = vmul.f32 %v7524_v45, %v9581_v21  ;;  %v4268_v57 = vpop.f32.mrf.mxu0  ;;  %v10788_v10 = vld [vmem:[#allocation37_spill] sm:$0xff]  ;;  %v10790_v13 = vld [vmem:[#allocation14_spill] sm:$0xff] }
 0x2ec   :  { %v7526_v62 = vpop.eup %7525  ;;  %4435 = vmatprep.mubr.bf16.mxu1 %v9712_v44  ;;  %v6768_v61 = vld [vmem:[#allocation4 + $0x6c8] ss:$16 sps:$4 sm:$0xff]   ;;  %v6776_v26 = vld [vmem:[#allocation4 + $0x6ac] ss:$16 sps:$4 sm:$0xff]  }
 0x2ed   :  { %v2484_v28 = vmul.f32 %v7526_v62, %v9632_v20  ;;  %4436 = vmatmul.mubr.bf16.gmra.mxu1 %v9714_v31  ;;  %v9731_v34 = vadd.f32 %v4268_v57, %v4156_v51  ;;  %v9733_v60 = vpack.c.bf16 %v2483_v9, %v2475_v4  ;;  %v9737_v20 = vpop.f32.mrf.mxu1  ;;  %v9740_v21 = vpop.f32.mrf.mxu0  ;;  %v10789_v62 = vld [vmem:[#allocation39_spill] sm:$0xff] }
 0x2ee   :  { %4591 = vmatprep.mubr.bf16.mxu1 %v10783_v2  ;;  %v6782_v51 = vld [vmem:[#allocation4 + $0x68c] ss:$16 sps:$4 sm:$0xff]  }
 0x2ef   :  { %v9729_v43 = vpack.c.bf16 %v2484_v28, %v2476_v5  ;;  %v6777_v5 = vld [vmem:[#allocation4 + $0x488] ss:$16 sps:$4 sm:$0xff]   ;;  %v6785_v4 = vld [vmem:[#allocation4 + $0x46c] ss:$16 sps:$4 sm:$0xff]  }
 0x2f0   :  { %v6774_v28 = vld [vmem:[#allocation4 + $0x6a8] ss:$16 sps:$4 sm:$0xff]  }
 0x2f1   :  { %4548 = vmatprep.mubr.bf16.mxu0 %v9729_v43 }
 0x2f2   :  { %4549 = vmatmul.mubr.bf16.gmra.mxu0 %v9733_v60 }
 0x2f3   :  { %4704 = vmatprep.mubr.bf16.mxu0 %v10784_v15  ;;  %v6783_v15 = vld [vmem:[#allocation4 + $0x468] ss:$16 sps:$4 sm:$0xff]  }
 0x2f4   :  { %v4161_v56 = vpop.f32.mrf.mxu1 }
 0x2f5   :  { %4592 = vmatmul.mubr.bf16.vlgmr.msra.gmra.mxu1 %v10785_v54  ;;  %v4162_v22 = vadd.f32 %v4161_v56, %v9668_v49  ;;  %v4274_v63 = vpop.f32.mrf.mxu0  ;;  %v6780_v54 = vld [vmem:[#allocation4 + $0x688] ss:$16 sps:$4 sm:$0xff]   ;;  %v10793_v56 = vld [vmem:[#allocation12_spill] sm:$0xff] }
 0x2f6   :  { %4786 = vmatpush1.bf16.msra.mxu1 %v6759_v52  ;;  %4601 = vmatprep.mubr.bf16.mxu1 %v10786_v3  ;;  %v4163_v0 = vpop.f32.mrf.mxu1  ;;  %v10791_v52 = vld [vmem:[#allocation40_spill] sm:$0xff]  ;;  %v6791_v3 = vld [vmem:[#allocation4 + $0x44c] ss:$16 sps:$4 sm:$0xff]  }
 0x2f7   :  { %4787 = vmatprep.subr.bf16.mxu1 %v6767_v33  ;;  %v9745_v6 = vadd.f32 %v4274_v63, %v4162_v22  ;;  %v4164_v53 = vadd.f32 %v4163_v0, %v9671_v37  ;;  %v4276_v50 = vpop.f32.mrf.mxu0  ;;  %v10792_v33 = vld [vmem:[#allocation11_spill] sm:$0xff] }
 0x2f8   :  { %v4165_v27 = vpop.f32.mrf.mxu1  ;;  %v10794_v63 = vld [vmem:[#allocation19_spill] sm:$0xff] }
 0x2f9   :  { %v9750_v46 = vadd.f32 %v4276_v50, %v4164_v53  ;;  %v4166_v45 = vadd.f32 %v4165_v27, %v9668_v49  ;;  %v4278_v17 = vpop.f32.mrf.mxu0  ;;  %v6786_v0 = vld [vmem:[#allocation4 + $0x668] ss:$16 sps:$4 sm:$0xff]  }
 0x2fa   :  { %4705 = vmatmul.mubr.bf16.vlgmr.msra.gmra.mxu0 %v10787_v47  ;;  %4788 = vmatpush1.bf16.msra.mxu1 %v6765_v39  ;;  %v9757_v2 = vpop.f32.mrf.mxu1  ;;  %v6788_v39 = vld [vmem:[#allocation4 + $0x66c] ss:$16 sps:$4 sm:$0xff]  }
 0x2fb   :  { %4714 = vmatprep.mubr.bf16.mxu0 %v10788_v10  ;;  %4899 = vmatpush1.bf16.msra.mxu0 %v6762_v1  ;;  %v9754_v9 = vadd.f32 %v4278_v17, %v4166_v45  ;;  %v9759_v57 = vpop.f32.mrf.mxu0  ;;  %v6794_v47 = vld [vmem:[#allocation4 + $0x64c] ss:$16 sps:$4 sm:$0xff]   ;;  %v6795_v45 = vld [vmem:[#allocation4 + $0x428] ss:$16 sps:$4 sm:$0xff]  }
 0x2fc   :  { %4900 = vmatprep.subr.bf16.mxu0 %v6770_v48  ;;  %4789 = vmatprep.subr.bf16.mxu1 %v6773_v25  ;;  %v6789_v48 = vld [vmem:[#allocation4 + $0x448] ss:$16 sps:$4 sm:$0xff]  }
 0x2fd   :  { %4602 = vmatmul.mubr.bf16.gmra.mxu1 %v10789_v62 }
 0x2fe   :  { %4790 = vmatpush1.bf16.msra.mxu1 %v6771_v12  ;;  %4611 = vmatprep.mubr.bf16.mxu1 %v10790_v13  ;;  %v6797_v12 = vld [vmem:[#allocation4 + $0x42c] ss:$16 sps:$4 sm:$0xff]   ;;  %v10796_v13 = vld [vmem:[#allocation20_spill] sm:$0xff] }
 0x2ff   :  { %4901 = vmatpush1.bf16.msra.mxu0 %v6768_v61  ;;  %4791 = vmatprep.subr.bf16.mxu1 %v6779_v32  ;;  %v10795_v32 = vld [vmem:[#allocation41_spill] sm:$0xff] }
 0x300   :  { %4902 = vmatprep.subr.bf16.mxu0 %v6776_v26 }
 0x302   :  { %4715 = vmatmul.mubr.bf16.gmra.mxu0 %v10791_v52  ;;  %4792 = vmatpush1.bf16.msra.mxu1 %v6777_v5  ;;  %v4171_v1 = vpop.f32.mrf.mxu1  ;;  %v6792_v5 = vld [vmem:[#allocation4 + $0x648] ss:$16 sps:$4 sm:$0xff]   ;;  %v10797_v52 = vld [vmem:[#allocation22_spill] sm:$0xff] }
 0x303   :  { %4724 = vmatprep.mubr.bf16.mxu0 %v10792_v33  ;;  %4903 = vmatpush1.bf16.msra.mxu0 %v6774_v28  ;;  %v4172_v25 = vadd.f32 %v4171_v1, %v9668_v49  ;;  %v6803_v28 = vld [vmem:[#allocation4 + $0x40c] ss:$16 sps:$4 sm:$0xff]   ;;  %v6801_v33 = vld [vmem:[#allocation4 + $0x408] ss:$16 sps:$4 sm:$0xff]  }
 0x304   :  { %4904 = vmatprep.subr.bf16.mxu0 %v6782_v51  ;;  %4793 = vmatprep.subr.bf16.mxu1 %v6785_v4  ;;  %v4284_v22 = vpop.f32.mrf.mxu0  ;;  %v4173_v53 = vpop.f32.mrf.mxu1  ;;  %v6800_v51 = vld [vmem:[#allocation4 + $0x62c] ss:$16 sps:$4 sm:$0xff]  }
 0x305   :  { %4612 = vmatmul.mubr.bf16.gmra.mxu1 %v10793_v56  ;;  %v9766_v27 = vadd.f32 %v4284_v22, %v4172_v25  ;;  %v4174_v10 = vadd.f32 %v4173_v53, %v9671_v37  ;;  %v6806_v56 = vld [vmem:[#allocation4 + $0x60c] ss:$16 sps:$4 sm:$0xff]   ;;  %v10800_v25 = vld [vmem:[#allocation24_spill] sm:$0xff] }
 0x306   :  { %4794 = vmatpush1.bf16.msra.mxu1 %v6783_v15  ;;  %4621 = vmatprep.mubr.bf16.mxu1 %v10794_v63  ;;  %v4286_v50 = vpop.f32.mrf.mxu0  ;;  %v4175_v61 = vpop.f32.mrf.mxu1  ;;  %v10798_v15 = vld [vmem:[#allocation27_spill] sm:$0xff] }
 0x307   :  { %4905 = vmatpush1.bf16.msra.mxu0 %v6780_v54  ;;  %4795 = vmatprep.subr.bf16.mxu1 %v6791_v3  ;;  %v9770_v26 = vadd.f32 %v4286_v50, %v4174_v10  ;;  %v4176_v17 = vadd.f32 %v4175_v61, %v9668_v49  ;;  %v6798_v3 = vld [vmem:[#allocation4 + $0x628] ss:$16 sps:$4 sm:$0xff]   ;;  %v6809_v1 = vld [vmem:[#allocation4 + $0x5ec] ss:$16 sps:$4 sm:$0xff]   ;;  %v10801_v61 = vld [vmem:[#allocation44_spill] sm:$0xff] }
 0x308   :  { %4906 = vmatprep.subr.bf16.mxu0 %v6788_v39  ;;  %v4288_v62 = vpop.f32.mrf.mxu0  ;;  %v9780_v39 = vpop.f32.mrf.mxu1  ;;  %v10799_v22 = vld [vmem:[#allocation23_spill] sm:$0xff] }
 0x309   :  { %v9774_v4 = vadd.f32 %v4288_v62, %v4176_v17  ;;  %v6807_v63 = vld [vmem:[#allocation4 + $0x5e8] ss:$16 sps:$4 sm:$0xff]   ;;  %v6815_v53 = vld [vmem:[#allocation4 + $0x5cc] ss:$16 sps:$4 sm:$0xff]  }
 0x30a   :  { %4725 = vmatmul.mubr.bf16.gmra.mxu0 %v10795_v32  ;;  %4796 = vmatpush1.bf16.msra.mxu1 %v6789_v48  ;;  %v9778_v54 = vpop.f32.mrf.mxu0  ;;  %v6813_v17 = vld [vmem:[#allocation4 + $0x5c8] ss:$16 sps:$4 sm:$0xff]  }
 0x30b   :  { %4734 = vmatprep.mubr.bf16.mxu0 %v10796_v13  ;;  %4907 = vmatpush1.bf16.msra.mxu0 %v6786_v0  ;;  %v6804_v0 = vld [vmem:[#allocation4 + $0x608] ss:$16 sps:$4 sm:$0xff]  }
 0x30c   :  { %4908 = vmatprep.subr.bf16.mxu0 %v6794_v47  ;;  %4797 = vmatprep.subr.bf16.mxu1 %v6797_v12  ;;  %v6812_v47 = vld [vmem:[#allocation4 + $0x7ec] ss:$16 sps:$4 sm:$0xff]  }
 0x30d   :  { %4622 = vmatmul.mubr.bf16.gmra.mxu1 %v10797_v52  ;;  %v6821_v52 = vld [vmem:[#allocation4 + $0x5ac] ss:$16 sps:$4 sm:$0xff]  }
 0x30e   :  { %4798 = vmatpush1.bf16.msra.mxu1 %v6795_v45  ;;  %4631 = vmatprep.mubr.bf16.mxu1 %v10798_v15  ;;  %v10802_v45 = vld [vmem:[#allocation30_spill] sm:$0xff] }
 0x30f   :  { %4909 = vmatpush1.bf16.msra.mxu0 %v6792_v5  ;;  %4799 = vmatprep.subr.bf16.mxu1 %v6803_v28  ;;  %v6810_v5 = vld [vmem:[#allocation4 + $0x7e8] ss:$16 sps:$4 sm:$0xff]  }
 0x310   :  { %4910 = vmatprep.subr.bf16.mxu0 %v6800_v51  ;;  %v4294_v48 = vpop.f32.mrf.mxu0  ;;  %v6818_v51 = vld [vmem:[#allocation4 + $0x7cc] ss:$16 sps:$4 sm:$0xff]  }
 0x311   :  { %v4181_v50 = vpop.f32.mrf.mxu1 }
 0x312   :  { %4735 = vmatmul.mubr.bf16.gmra.mxu0 %v10799_v22  ;;  %4800 = vmatpush1.bf16.msra.mxu1 %v6801_v33  ;;  %v4182_v12 = vadd.f32 %v4181_v50, %v9668_v49  ;;  %v4296_v10 = vpop.f32.mrf.mxu0  ;;  %v10805_v50 = vld [vmem:[#allocation33_spill] sm:$0xff] }
 0x313   :  { %4744 = vmatprep.mubr.bf16.mxu0 %v10800_v25  ;;  %4911 = vmatpush1.bf16.msra.mxu0 %v6798_v3  ;;  %v4183_v32 = vpop.f32.mrf.mxu1  ;;  %v6827_v25 = vld [vmem:[#allocation4 + $0x58c] ss:$16 sps:$4 sm:$0xff]  }
 0x314   :  { %4912 = vmatprep.subr.bf16.mxu0 %v6806_v56  ;;  %4801 = vmatprep.subr.bf16.mxu1 %v6809_v1  ;;  %v9787_v62 = vadd.f32 %v4294_v48, %v4182_v12  ;;  %v4184_v13 = vadd.f32 %v4183_v32, %v9671_v37  ;;  %v4298_v3 = vpop.f32.mrf.mxu0  ;;  %v10803_v56 = vld [vmem:[#allocation43_spill] sm:$0xff]  ;;  %v10806_v12 = vld [vmem:[#allocation13_spill] sm:$0xff] }
 0x315   :  { %4632 = vmatmul.mubr.bf16.gmra.mxu1 %v10801_v61  ;;  %v4185_v28 = vpop.f32.mrf.mxu1  ;;  %v6819_v1 = vld [vmem:[#allocation4 + $0x5a8] ss:$16 sps:$4 sm:$0xff]   ;;  %v6830_v32 = vld [vmem:[#allocation4 + $0x78c] ss:$16 sps:$4 sm:$0xff]  }
 0x316   :  { %4802 = vmatpush2.bf16.msra.mxu1 %v6807_v63  ;;  %4641 = vmatprep.mubr.bf16.mxu1 %v10802_v45  ;;  %v9790_v15 = vadd.f32 %v4296_v10, %v4184_v13  ;;  %v4186_v33 = vadd.f32 %v4185_v28, %v9668_v49  ;;  %v10804_v63 = vld [vmem:[#allocation31_spill] sm:$0xff] }
 0x317   :  { %4913 = vmatpush1.bf16.msra.mxu0 %v6804_v0  ;;  %4803 = vmatprep.subr.bf16.mxu1 %v6815_v53  ;;  %v6816_v48 = vld [vmem:[#allocation4 + $0x7c8] ss:$16 sps:$4 sm:$0xff]   ;;  %v6824_v0 = vld [vmem:[#allocation4 + $0x7ac] ss:$16 sps:$4 sm:$0xff]   ;;  %v9797_v53 = vpop.f32.mrf.mxu0 }
 0x318   :  { %4914 = vmatprep.subr.bf16.mxu0 %v6812_v47  ;;  %v9794_v22 = vadd.f32 %v4298_v3, %v4186_v33  ;;  %v9800_v47 = vpop.f32.mrf.mxu1  ;;  %v6825_v10 = vld [vmem:[#allocation4 + $0x588] ss:$16 sps:$4 sm:$0xff]   ;;  %v6833_v45 = vld [vmem:[#allocation4 + $0x56c] ss:$16 sps:$4 sm:$0xff]   ;;  %v10808_v33 = vld [vmem:[#allocation38_spill] sm:$0xff] }
 0x319   :  { %v6822_v61 = vld [vmem:[#allocation4 + $0x7a8] ss:$16 sps:$4 sm:$0xff]  }
 0x31a   :  { %4745 = vmatmul.mubr.bf16.gmra.mxu0 %v10803_v56  ;;  %4804 = vmatpush2.bf16.msra.mxu1 %v6813_v17  ;;  %v6831_v28 = vld [vmem:[#allocation4 + $0x568] ss:$16 sps:$4 sm:$0xff]   ;;  %v6839_v56 = vld [vmem:[#allocation4 + $0x54c] ss:$16 sps:$4 sm:$0xff]  }
 0x31b   :  { %4754 = vmatprep.mubr.bf16.mxu0 %v10804_v63  ;;  %4915 = vmatpush2.bf16.msra.mxu0 %v6810_v5  ;;  %v10807_v5 = vld [vmem:[#allocation32_spill] sm:$0xff]  ;;  %v6828_v3 = vld [vmem:[#allocation4 + $0x788] ss:$16 sps:$4 sm:$0xff]   ;;  %v6836_v63 = vld [vmem:[#allocation4 + $0x76c] ss:$16 sps:$4 sm:$0xff]  }
 0x31c   :  { %4916 = vmatprep.subr.bf16.mxu0 %v6818_v51  ;;  %4805 = vmatprep.subr.bf16.mxu1 %v6821_v52 }
 0x31d   :  { %4642 = vmatmul.mubr.bf16.gmra.mxu1 %v10805_v50 }
 0x31e   :  { %4806 = vmatpush2.bf16.msra.mxu1 %v6819_v1  ;;  %4651 = vmatprep.mubr.bf16.mxu1 %v10806_v12  ;;  %v4304_v17 = vpop.f32.mrf.mxu0  ;;  %v10810_v12 = vld [vmem:[#allocation17_spill] sm:$0xff] }
 0x31f   :  { %4917 = vmatpush2.bf16.msra.mxu0 %v6816_v48  ;;  %4807 = vmatprep.subr.bf16.mxu1 %v6827_v25  ;;  %v4191_v13 = vpop.f32.mrf.mxu1 }
 0x320   :  { %4918 = vmatprep.subr.bf16.mxu0 %v6824_v0  ;;  %v4192_v51 = vadd.f32 %v4191_v13, %v9668_v49  ;;  %v4306_v52 = vpop.f32.mrf.mxu0  ;;  %v10809_v0 = vld [vmem:[#allocation46_spill] sm:$0xff] }
 0x321   :  { %v4193_v1 = vpop.f32.mrf.mxu1 }
 0x322   :  { %4755 = vmatmul.mubr.bf16.gmra.mxu0 %v10807_v5  ;;  %4808 = vmatpush2.bf16.msra.mxu1 %v6825_v10  ;;  %v9806_v48 = vadd.f32 %v4304_v17, %v4192_v51  ;;  %v4194_v25 = vadd.f32 %v4193_v1, %v9671_v37  ;;  %v6837_v10 = vld [vmem:[#allocation4 + $0x548] ss:$16 sps:$4 sm:$0xff]   ;;  %v4308_v5 = vpop.f32.mrf.mxu0  ;;  %v6845_v17 = vld [vmem:[#allocation4 + $0x52c] ss:$16 sps:$4 sm:$0xff]  }
 0x323   :  { %4764 = vmatprep.mubr.bf16.mxu0 %v10808_v33  ;;  %4919 = vmatpush2.bf16.msra.mxu0 %v6822_v61  ;;  %v4195_v50 = vpop.f32.mrf.mxu1  ;;  %v10812_v33 = vld [vmem:[#allocation35_spill] sm:$0xff] }
 0x324   :  { %4920 = vmatprep.subr.bf16.mxu0 %v6830_v32  ;;  %4809 = vmatprep.subr.bf16.mxu1 %v6833_v45  ;;  %v9811_v13 = vadd.f32 %v4306_v52, %v4194_v25  ;;  %v4196_v61 = vadd.f32 %v4195_v50, %v9668_v49  ;;  %v6834_v32 = vld [vmem:[#allocation4 + $0x768] ss:$16 sps:$4 sm:$0xff]   ;;  %v6842_v45 = vld [vmem:[#allocation4 + $0x74c] ss:$16 sps:$4 sm:$0xff]   ;;  %v9817_v1 = vpop.f32.mrf.mxu0 }
 0x325   :  { %4652 = vmatmul.mubr.bf16.gmra.mxu1 %v10809_v0  ;;  %10813 = vst [vmem:[#allocation55_spill] sm:$0xff] %v9817_v1  ;;  %v10814_v0 = vld [vmem:[#allocation18_spill] sm:$0xff]  ;;  %v6840_v52 = vld [vmem:[#allocation4 + $0x748] ss:$16 sps:$4 sm:$0xff]   ;;  %v6851_v25 = vld [vmem:[#allocation4 + $0x50c] ss:$16 sps:$4 sm:$0xff]   ;;  %v9820_v50 = vpop.f32.mrf.mxu1 }
 0x326   :  { %4810 = vmatpush2.bf16.msra.mxu1 %v6831_v28  ;;  %4661 = vmatprep.mubr.bf16.mxu1 %v10810_v12  ;;  %v9814_v51 = vadd.f32 %v4308_v5, %v4196_v61  ;;  %v6843_v28 = vld [vmem:[#allocation4 + $0x528] ss:$16 sps:$4 sm:$0xff]  }
 0x327   :  { %4921 = vmatpush2.bf16.msra.mxu0 %v6828_v3  ;;  %4811 = vmatprep.subr.bf16.mxu1 %v6839_v56  ;;  %v6848_v3 = vld [vmem:[#allocation4 + $0x72c] ss:$16 sps:$4 sm:$0xff]   ;;  %v6849_v12 = vld [vmem:[#allocation4 + $0x508] ss:$16 sps:$4 sm:$0xff]  }
 0x328   :  { %4922 = vmatprep.subr.bf16.mxu0 %v6836_v63  ;;  %10811 = vst [vmem:[#allocation49_spill] sm:$0xff] %v9814_v51  ;;  %v10815_v56 = vld [vmem:[#allocation47_spill] sm:$0xff]  ;;  %v10816_v63 = vld [vmem:[#allocation21_spill] sm:$0xff]  ;;  %v6857_v51 = vld [vmem:[%s10544_s7 + $0x70] sm:$0xff]  }
 0x329   :  { %v6846_v61 = vld [vmem:[#allocation4 + $0x728] ss:$16 sps:$4 sm:$0xff]  }
 0x32a   :  { %4765 = vmatmul.mubr.bf16.gmra.mxu0 %v10812_v33  ;;  %4812 = vmatpush2.bf16.msra.mxu1 %v6837_v10 }
 0x32b   :  { %4774 = vmatprep.mubr.bf16.mxu0 %v10814_v0  ;;  %4923 = vmatpush2.bf16.msra.mxu0 %v6834_v32  ;;  %v4314_v10 = vpop.f32.mrf.mxu0  ;;  %v4201_v5 = vpop.f32.mrf.mxu1  ;;  %v6854_v32 = vld [vmem:[#allocation4 + $0x70c] ss:$16 sps:$4 sm:$0xff]  }
 0x32c   :  { %4924 = vmatprep.subr.bf16.mxu0 %v6842_v45  ;;  %4813 = vmatprep.subr.bf16.mxu1 %v6845_v17  ;;  %v4202_v33 = vadd.f32 %v4201_v5, %v9668_v49  ;;  %v6855_v45 = vld [vmem:[%s10544_s7 + $0x78] sm:$0xff]  }
 0x32d   :  { %4662 = vmatmul.mubr.bf16.gmra.mxu1 %v10815_v56  ;;  %v4316_v0 = vpop.f32.mrf.mxu0  ;;  %v4203_v17 = vpop.f32.mrf.mxu1  ;;  %v10817_v56 = vld [vmem:[#allocation15_spill] sm:$0xff] }
 0x32e   :  { %4814 = vmatpush2.bf16.msra.mxu1 %v6843_v28  ;;  %4817 = vmatprep.mubr.bf16.mxu1 %v10816_v63  ;;  %v9829_v28 = vadd.f32 %v4314_v10, %v4202_v33  ;;  %v6852_v63 = vld [vmem:[#allocation4 + $0x708] ss:$16 sps:$4 sm:$0xff]   ;;  %v10820_v33 = vld [vmem:[#allocation42_spill] sm:$0xff] }
 0x32f   :  { %4925 = vmatpush2.bf16.msra.mxu0 %v6840_v52  ;;  %4815 = vmatprep.subr.bf16.mxu1 %v6851_v25  ;;  %v4204_v52 = vadd.f32 %v4203_v17, %v9671_v37  ;;  %v6856_v25 = vld [vmem:[%s10544_s7 + $0x38] sm:$0xff]   ;;  %v4205_v5 = vpop.f32.mrf.mxu1  ;;  %v4318_v1 = vpop.f32.mrf.mxu0 }
 0x330   :  { %4926 = vmatprep.subr.bf16.mxu0 %v6848_v3  ;;  %v10818_v3 = vld [vmem:[#allocation16_spill] sm:$0xff]  ;;  %v4206_v10 = vadd.f32 %v4205_v5, %v9668_v49  ;;  %v10821_v17 = vld [vmem:[#allocation51_spill] sm:$0xff] }
 0x332   :  { %4775 = vmatmul.mubr.bf16.gmra.mxu0 %v10817_v56  ;;  %4816 = vmatpush2.bf16.msra.mxu1 %v6849_v12  ;;  %v9839_v12 = vadd.f32 %v4316_v0, %v4204_v52  ;;  %v6858_v56 = vld [vmem:[%s10544_s7 + $0x30] sm:$0xff]   ;;  %v9854_v0 = vpop.f32.mrf.mxu1  ;;  %v10825_v52 = vld [vmem:[#allocation52_spill] sm:$0xff] }
 0x333   :  { %4927 = vmatpush2.bf16.msra.mxu0 %v6846_v61  ;;  %4930 = vmatprep.mubr.bf16.mxu0 %v10818_v3  ;;  %v9844_v61 = vadd.f32 %v4318_v1, %v4206_v10  ;;  %v9849_v3 = vpop.f32.mrf.mxu0  ;;  %v6860_v1 = vld [vmem:[%s10544_s7 + $0x28] sm:$0xff]   ;;  %v10827_v10 = vld [vmem:[#allocation34_spill] sm:$0xff] }
 0x334   :  { %4928 = vmatprep.subr.bf16.mxu0 %v6854_v32  ;;  %10819 = vst [vmem:[#allocation50_spill] sm:$0xff] %v9839_v12  ;;  %6333 = vmatprep.subr.bf16.mxu1 %v6855_v45  ;;  %10823 = vst [vmem:[#allocation10_spill] sm:$0xff] %v9849_v3  ;;  %v6859_v32 = vld [vmem:[%s10544_s7 + $0x68] sm:$0xff]   ;;  %v10824_v45 = vld [vmem:[#allocation48_spill] sm:$0xff] }
 0x335   :  { %4818 = vmatmul.mubr.bf16.vlgmr.msra.gmra.mxu1 %v10820_v33  ;;  %10822 = vst [vmem:[#allocation9_spill] sm:$0xff] %v9844_v61  ;;  %v10830_v61 = vld [vmem:[#allocation45_spill] sm:$0xff] }
 0x336   :  { %4827 = vmatprep.mubr.bf16.mxu1 %v10821_v17  ;;  %6334 = vmatpush3.bf16.msra.mxu1 %v6856_v25  ;;  %v6862_v17 = vld [vmem:[%s10544_s7 + $0x20] sm:$0xff]  }
 0x337   :  { %4929 = vmatpush2.bf16.msra.mxu0 %v6852_v63  ;;  %6335 = vmatprep.subr.bf16.mxu1 %v6857_v51  ;;  %v6861_v51 = vld [vmem:[%s10544_s7 + $0x60] sm:$0xff]   ;;  %v10826_v63 = vld [vmem:[#allocation54_spill] sm:$0xff] }
 0x338   :  { %v4324_v25 = vpop.f32.mrf.mxu0 }
 0x33a   :  { %4931 = vmatmul.mubr.bf16.vlgmr.msra.gmra.mxu0 %v10824_v45  ;;  %6336 = vmatpush3.bf16.msra.mxu1 %v6858_v56  ;;  %v4326_v45 = vpop.f32.mrf.mxu0 }
 0x33b   :  { %4940 = vmatprep.mubr.bf16.mxu0 %v10825_v52  ;;  %6337 = vmatprep.subr.bf16.mxu1 %v6859_v32  ;;  %v4211_v5 = vpop.f32.mrf.mxu1  ;;  %v6863_v32 = vld [vmem:[%s10544_s7 + $0x58] sm:$0xff]  }
 0x33c   :  { %v4212_v33 = vadd.f32 %v4211_v5, %v9668_v49  ;;  %v4328_v12 = vpop.f32.mrf.mxu0 }
 0x33d   :  { %4828 = vmatmul.mubr.bf16.gmra.mxu1 %v10826_v63  ;;  %v4213_v56 = vpop.f32.mrf.mxu1 }
 0x33e   :  { %4837 = vmatprep.mubr.bf16.mxu1 %v10827_v10  ;;  %6338 = vmatpush3.bf16.msra.mxu1 %v6860_v1  ;;  %v9873_v52 = vadd.f32 %v4324_v25, %v4212_v33  ;;  %v4214_v63 = vadd.f32 %v4213_v56, %v9671_v37  ;;  %v10828_v10 = vld [vmem:[#allocation53_spill] sm:$0xff]  ;;  %v6865_v25 = vld [vmem:[%s10544_s7 + $0x50] sm:$0xff]   ;;  %v10832_v56 = vld [vmem:[#allocation56_spill] sm:$0xff] }
 0x33f   :  { %6339 = vmatprep.subr.bf16.mxu1 %v6861_v51  ;;  %v4215_v3 = vpop.f32.mrf.mxu1  ;;  %v6864_v51 = vld [vmem:[%s10544_s7 + $0x18] sm:$0xff]  }
 0x340   :  { %v9877_v5 = vadd.f32 %v4326_v45, %v4214_v63  ;;  %v4216_v1 = vadd.f32 %v4215_v3, %v9668_v49  ;;  %v10833_v3 = vld [vmem:[#allocation58_spill] sm:$0xff] }
 0x341   :  { %v9890_v45 = vpop.f32.mrf.mxu1 }
 0x342   :  { %4941 = vmatmul.mubr.bf16.gmra.mxu0 %v10828_v10  ;;  %10829 = vst [vmem:[#allocation28_spill] sm:$0xff] %v9877_v5  ;;  %6340 = vmatpush3.bf16.msra.mxu1 %v6862_v17  ;;  %v9887_v33 = vadd.f32 %v4328_v12, %v4216_v1  ;;  %v6866_v17 = vld [vmem:[%s10544_s7 + $0x10] sm:$0xff]   ;;  %v4146_v12 = vadd.f32 %v9683_v7, %v9668_v49  ;;  %v10835_v1 = vld [vmem:[#allocation57_spill] sm:$0xff]  ;;  %v6869_v49 = vld [vmem:[%s10544_s7 + $0x40] sm:$0xff]  }
 0x343   :  { %4950 = vmatprep.mubr.bf16.mxu0 %v10830_v61  ;;  %6341 = vmatprep.subr.bf16.mxu1 %v6863_v32  ;;  %v9896_v61 = vpop.f32.mrf.mxu0  ;;  %v6867_v32 = vld [vmem:[%s10544_s7 + $0x48] sm:$0xff]   ;;  %v4148_v10 = vadd.f32 %v9700_v19, %v9671_v37 }
 0x344   :  { %10831 = vst [vmem:[#allocation29_spill] sm:$0xff] %v9887_v33  ;;  %10834 = vst [vmem:[#allocation25_spill] sm:$0xff] %v9896_v61  ;;  %v4259_v7 = vadd.f32 %v9688_v11, %v4146_v12  ;;  %v6870_v11 = vld [vmem:[%s10544_s7] sm:$0xff]  }
 0x345   :  { %4838 = vmatmul.mubr.bf16.gmra.mxu1 %v10832_v56  ;;  %v10836_v56 = vld [vmem:[#allocation60_spill] sm:$0xff]  ;;  %v4261_v33 = vadd.f32 %v9704_v42, %v4148_v10  ;;  %v10838_v10 = vld [vmem:[#allocation61_spill] sm:$0xff] }
 0x346   :  { %4847 = vmatprep.mubr.bf16.mxu1 %v10833_v3  ;;  %6342 = vmatpush3.bf16.msra.mxu1 %v6864_v51  ;;  %v4367_v63 = vpop.f32.mrf.mxu1 }
 0x347   :  { %6343 = vmatprep.subr.bf16.mxu1 %v6865_v25  ;;  %v4368_v51 = vadd.f32 %v4367_v63, %v9674_v16  ;;  %v6868_v25 = vld [vmem:[%s10544_s7 + $0x8] sm:$0xff]   ;;  %v4480_v3 = vpop.f32.mrf.mxu0 }
 0x348   :  { %v4369_v61 = vpop.f32.mrf.mxu1 }
 0x349   :  { %v9915_v19 = vadd.f32 %v4480_v3, %v4368_v51  ;;  %v4370_v16 = vadd.f32 %v4369_v61, %v9677_v35  ;;  %v4482_v63 = vpop.f32.mrf.mxu0 }
 0x34a   :  { %4951 = vmatmul.mubr.bf16.gmra.mxu0 %v10835_v1  ;;  %6344 = vmatpush3.bf16.msra.mxu1 %v6866_v17  ;;  %v10837_v17 = vld [vmem:[#allocation59_spill] sm:$0xff]  ;;  %v4371_v1 = vpop.f32.mrf.mxu1 }
 0x34b   :  { %4960 = vmatprep.mubr.bf16.mxu0 %v10836_v56  ;;  %6345 = vmatprep.subr.bf16.mxu1 %v6867_v32  ;;  %v5011_v32 = vsub.f32 0.0, %v9915_v19  ;;  %v9922_v56 = vadd.f32 %v4482_v63, %v4370_v16  ;;  %v4372_v5 = vadd.f32 %v4371_v1, %v4259_v7  ;;  %v4484_v12 = vpop.f32.mrf.mxu0 }
 0x34c   :  { %v4373_v35 = vpop.f32.mrf.mxu1 }
 0x34d   :  { %4848 = vmatmul.mubr.bf16.gmra.mxu1 %v10837_v17  ;;  %v5075_v61 = vmul.f32 1.442695, %v5011_v32  ;;  %v5012_v51 = vsub.f32 0.0, %v9922_v56  ;;  %v9928_v3 = vadd.f32 %v4484_v12, %v4372_v5  ;;  %v4374_v42 = vadd.f32 %v4373_v35, %v4261_v33 }
 0x34e   :  { %4857 = vmatprep.mubr.bf16.mxu1 %v9627_v29  ;;  %6346 = vmatpush3.bf16.msra.mxu1 %v6868_v25  ;;  %v4486_v29 = vpop.f32.mrf.mxu0 }
 0x34f   :  { %6347 = vmatprep.subr.bf16.mxu1 %v6869_v49  ;;  %7527 = vpow2.f32 %v5075_v61  ;;  %v5077_v16 = vmul.f32 1.442695, %v5012_v51  ;;  %v5015_v25 = vsub.f32 0.0, %v9928_v3  ;;  %v9932_v7 = vadd.f32 %v4486_v29, %v4374_v42 }
 0x351   :  { %7529 = vpow2.f32 %v5077_v16  ;;  %v5083_v49 = vmul.f32 1.442695, %v5015_v25  ;;  %v5016_v17 = vsub.f32 0.0, %v9932_v7 }
 0x352   :  { %4961 = vmatmul.mubr.bf16.gmra.mxu0 %v10838_v10  ;;  %6348 = vmatpush3.bf16.msra.mxu1 %v6870_v11 }
 0x353   :  { %4970 = vmatprep.mubr.bf16.mxu0 %v9634_v38  ;;  %7531 = vpow2.f32 %v5083_v49  ;;  %v5085_v5 = vmul.f32 1.442695, %v5016_v17  ;;  %v4158_v38 = vadd.f32 %v9737_v20, %v9671_v37 }
 0x355   :  { %4858 = vmatmul.mubr.bf16.gmra.mxu1 %v9629_v30  ;;  %7533 = vpow2.f32 %v5085_v5  ;;  %v4490_v33 = vpop.f32.mrf.mxu0  ;;  %v4377_v63 = vpop.f32.mrf.mxu1 }
 0x356   :  { %4867 = vmatprep.mubr.bf16.mxu1 %v9647_v18  ;;  %v4378_v1 = vadd.f32 %v4377_v63, %v9716_v23 }
 0x357   :  { %v4492_v32 = vpop.f32.mrf.mxu0  ;;  %v4379_v11 = vpop.f32.mrf.mxu1 }
 0x358   :  { %v9943_v12 = vadd.f32 %v4490_v33, %v4378_v1  ;;  %v4380_v30 = vadd.f32 %v4379_v11, %v9724_v36 }
 0x359   :  { %v4381_v18 = vpop.f32.mrf.mxu1  ;;  %v4494_v61 = vpop.f32.mrf.mxu0 }
 0x35a   :  { %4971 = vmatmul.mubr.bf16.gmra.mxu0 %v9636_v59  ;;  %v5019_v59 = vsub.f32 0.0, %v9943_v12  ;;  %v9949_v35 = vadd.f32 %v4492_v32, %v4380_v30  ;;  %v4382_v23 = vadd.f32 %v4381_v18, %v9731_v34  ;;  %v4168_v32 = vadd.f32 %v9757_v2, %v9671_v37 }
 0x35b   :  { %4980 = vmatprep.mubr.bf16.mxu0 %v9658_v41  ;;  %v4271_v41 = vadd.f32 %v9740_v21, %v4158_v38  ;;  %v4383_v51 = vpop.f32.mrf.mxu1  ;;  %v4496_v49 = vpop.f32.mrf.mxu0 }
 0x35c   :  { %v7528_v20 = vpop.eup %7527  ;;  %v5091_v29 = vmul.f32 1.442695, %v5019_v59  ;;  %v5020_v36 = vsub.f32 0.0, %v9949_v35  ;;  %v9954_v10 = vadd.f32 %v4494_v61, %v4382_v23  ;;  %v4281_v2 = vadd.f32 %v9759_v57, %v4168_v32 }
 0x35d   :  { %4868 = vmatmul.mubr.bf16.gmra.mxu1 %v9649_v14  ;;  %v5203_v42 = vadd.f32 1.0, %v7528_v20  ;;  %v4384_v16 = vadd.f32 %v4383_v51, %v4271_v41 }
 0x35e   :  { %4877 = vmatprep.mubr.bf16.mxu1 %v9691_v40  ;;  %v7530_v14 = vpop.eup %7529  ;;  %v5093_v25 = vmul.f32 1.442695, %v5020_v36  ;;  %v5023_v34 = vsub.f32 0.0, %v9954_v10 }
 0x35f   :  { %7535 = vrcp.f32 %v5203_v42  ;;  %v5204_v40 = vadd.f32 1.0, %v7530_v14  ;;  %v9959_v21 = vadd.f32 %v4496_v49, %v4384_v16 }
 0x360   :  { %v7532_v17 = vpop.eup %7531  ;;  %7537 = vpow2.f32 %v5091_v29  ;;  %v5099_v33 = vmul.f32 1.442695, %v5023_v34  ;;  %v4178_v34 = vadd.f32 %v9780_v39, %v9671_v37 }
 0x361   :  { %7539 = vrcp.f32 %v5204_v40  ;;  %v5207_v5 = vadd.f32 1.0, %v7532_v17 }
 0x362   :  { %4981 = vmatmul.mubr.bf16.gmra.mxu0 %v9660_v55  ;;  %v7534_v63 = vpop.eup %7533  ;;  %7541 = vpow2.f32 %v5093_v25  ;;  %v5024_v55 = vsub.f32 0.0, %v9959_v21 }
 0x363   :  { %4990 = vmatprep.mubr.bf16.mxu0 %v9695_v8  ;;  %7543 = vrcp.f32 %v5207_v5  ;;  %v5208_v8 = vadd.f32 1.0, %v7534_v63 }
 0x364   :  { %7545 = vpow2.f32 %v5099_v33  ;;  %v5101_v30 = vmul.f32 1.442695, %v5024_v55 }
 0x365   :  { %4878 = vmatmul.mubr.bf16.gmra.mxu1 %v9693_v24  ;;  %v4387_v1 = vpop.f32.mrf.mxu1  ;;  %7547 = vrcp.f32 %v5208_v8 }
 0x366   :  { %4887 = vmatprep.mubr.bf16.mxu1 %v9712_v44  ;;  %v4388_v38 = vadd.f32 %v4387_v1, %v9745_v6  ;;  %v4500_v11 = vpop.f32.mrf.mxu0  ;;  %7549 = vpow2.f32 %v5101_v30 }
 0x367   :  { %v4389_v18 = vpop.f32.mrf.mxu1 }
 0x368   :  { %v9967_v59 = vadd.f32 %v4500_v11, %v4388_v38  ;;  %v4390_v24 = vadd.f32 %v4389_v18, %v9750_v46  ;;  %v4502_v23 = vpop.f32.mrf.mxu0  ;;  %v6871_v46 = vld [vmem:[%s10544_s7 + $0xf8] sm:$0xff]  }
 0x369   :  { %v4391_v61 = vpop.f32.mrf.mxu1  ;;  %6397 = vmatprep.subr.bf16.mxu0 %v6871_v46  ;;  %v6874_v46 = vld [vmem:[%s10544_s7 + $0xb0] sm:$0xff]  }
 0x36a   :  { %4991 = vmatmul.mubr.bf16.gmra.mxu0 %v9697_v58  ;;  %v5027_v44 = vsub.f32 0.0, %v9967_v59  ;;  %v9973_v20 = vadd.f32 %v4502_v23, %v4390_v24  ;;  %v4392_v6 = vadd.f32 %v4391_v61, %v9754_v9  ;;  %v4504_v41 = vpop.f32.mrf.mxu0  ;;  %v6873_v23 = vld [vmem:[%s10544_s7 + $0xf0] sm:$0xff]  }
 0x36b   :  { %5000 = vmatprep.mubr.bf16.mxu0 %v9729_v43  ;;  %v4393_v51 = vpop.f32.mrf.mxu1  ;;  %v6872_v43 = vld [vmem:[%s10544_s7 + $0xb8] sm:$0xff]  }
 0x36c   :  { %v5107_v42 = vmul.f32 1.442695, %v5027_v44  ;;  %v5028_v29 = vsub.f32 0.0, %v9973_v20  ;;  %v9981_v57 = vadd.f32 %v4504_v41, %v4392_v6  ;;  %v4394_v58 = vadd.f32 %v4393_v51, %v4281_v2  ;;  %v4506_v36 = vpop.f32.mrf.mxu0  ;;  %v7536_v25 = vpop.eup %7535  ;;  %6398 = vmatpush3.bf16.msra.mxu0 %v6872_v43 }
 0x36d   :  { %4888 = vmatmul.mubr.bf16.gmra.mxu1 %v9714_v31  ;;  %v4397_v14 = vpop.f32.mrf.mxu1  ;;  %v7538_v17 = vpop.eup %7537  ;;  %6399 = vmatprep.subr.bf16.mxu0 %v6873_v23 }
 0x36e   :  { %7551 = vpow2.f32 %v5107_v42  ;;  %v5109_v9 = vmul.f32 1.442695, %v5028_v29  ;;  %v5031_v16 = vsub.f32 0.0, %v9981_v57  ;;  %v9988_v40 = vadd.f32 %v4506_v36, %v4394_v58  ;;  %v7540_v63 = vpop.eup %7539 }
 0x36f   :  { %v4398_v49 = vadd.f32 %v4397_v14, %v9766_v27  ;;  %v4399_v31 = vpop.f32.mrf.mxu1  ;;  %v5211_v55 = vadd.f32 1.0, %v7538_v17  ;;  %v7542_v8 = vpop.eup %7541  ;;  %v4291_v27 = vadd.f32 %v9778_v54, %v4178_v34  ;;  %v5331_v29 = vmul.f32 %v7536_v25, %v9915_v19 }
 0x370   :  { %7553 = vpow2.f32 %v5109_v9  ;;  %v5115_v5 = vmul.f32 1.442695, %v5031_v16  ;;  %v5032_v33 = vsub.f32 0.0, %v9988_v40  ;;  %v4400_v1 = vadd.f32 %v4399_v31, %v9770_v26  ;;  %v7544_v11 = vpop.eup %7543  ;;  %6400 = vmatpush3.bf16.msra.mxu0 %v6874_v46 }
 0x371   :  { %v4401_v32 = vpop.f32.mrf.mxu1  ;;  %v5212_v30 = vadd.f32 1.0, %v7542_v8  ;;  %v7546_v26 = vpop.eup %7545  ;;  %v5335_v61 = vmul.f32 %v7544_v11, %v9928_v3  ;;  %v5332_v3 = vmul.f32 %v7540_v63, %v9922_v56 }
 0x372   :  { %5001 = vmatmul.mubr.bf16.gmra.mxu0 %v9733_v60  ;;  %7555 = vpow2.f32 %v5115_v5  ;;  %v5117_v38 = vmul.f32 1.442695, %v5032_v33  ;;  %v4510_v39 = vpop.f32.mrf.mxu0  ;;  %v4402_v2 = vadd.f32 %v4401_v32, %v9774_v4  ;;  %v7548_v44 = vpop.eup %7547  ;;  %v5215_v6 = vadd.f32 1.0, %v7546_v26 }
 0x373   :  { %7557 = vrcp.f32 %v5211_v55  ;;  %v9997_v18 = vadd.f32 %v4510_v39, %v4398_v49  ;;  %v4403_v24 = vpop.f32.mrf.mxu1  ;;  %v7550_v42 = vpop.eup %7549  ;;  %v5336_v58 = vmul.f32 %v7548_v44, %v9932_v7  ;;  %v5395_v49 = vpack.c.bf16 %v5335_v61, %v5331_v29 }
 0x374   :  { %7559 = vpow2.f32 %v5117_v38  ;;  %v4512_v60 = vpop.f32.mrf.mxu0  ;;  %v4404_v51 = vadd.f32 %v4403_v24, %v4291_v27  ;;  %v5216_v36 = vadd.f32 1.0, %v7550_v42  ;;  %v4188_v44 = vadd.f32 %v9800_v47, %v9671_v37 }
 0x375   :  { %v5035_v54 = vsub.f32 0.0, %v9997_v18  ;;  %v10005_v41 = vadd.f32 %v4512_v60, %v4400_v1  ;;  %7561 = vrcp.f32 %v5212_v30  ;;  %v5396_v34 = vpack.c.bf16 %v5336_v58, %v5332_v3 }
 0x376   :  { %v4514_v4 = vpop.f32.mrf.mxu0  ;;  %7563 = vrcp.f32 %v5215_v6 }
 0x377   :  { %v5123_v14 = vmul.f32 1.442695, %v5035_v54  ;;  %v5036_v43 = vsub.f32 0.0, %v10005_v41  ;;  %v10014_v9 = vadd.f32 %v4514_v4, %v4402_v2  ;;  %7565 = vrcp.f32 %v5216_v36  ;;  %5722 = vmatprep.mubr.bf16.mxu1 %v5396_v34 }
 0x378   :  { %v4516_v16 = vpop.f32.mrf.mxu0  ;;  %5723 = vmatmul.mubr.bf16.vlgmr.msra.gmra.mxu1 %v5395_v49 }
 0x379   :  { %v5125_v31 = vmul.f32 1.442695, %v5036_v43  ;;  %v10016_v19 = vadd.f32 %v4516_v16, %v4404_v51  ;;  %7567 = vpow2.f32 %v5123_v14  ;;  %v5039_v56 = vsub.f32 0.0, %v10014_v9 }
 0x37b   :  { %v7552_v7 = vpop.eup %7551  ;;  %7569 = vpow2.f32 %v5125_v31  ;;  %v5040_v25 = vsub.f32 0.0, %v10016_v19  ;;  %v5131_v5 = vmul.f32 1.442695, %v5039_v56 }
 0x37c   :  { %v5219_v17 = vadd.f32 1.0, %v7552_v7 }
 0x37d   :  { %v7554_v33 = vpop.eup %7553  ;;  %v5133_v63 = vmul.f32 1.442695, %v5040_v25 }
 0x37e   :  { %7571 = vrcp.f32 %v5219_v17  ;;  %v5220_v55 = vadd.f32 1.0, %v7554_v33 }
 0x37f   :  { %v7556_v1 = vpop.eup %7555  ;;  %7573 = vpow2.f32 %v5131_v5  ;;  %v4198_v5 = vadd.f32 %v9820_v50, %v9671_v37 }
 0x380   :  { %v7558_v32 = vpop.eup %7557  ;;  %7575 = vrcp.f32 %v5220_v55  ;;  %v5223_v8 = vadd.f32 1.0, %v7556_v1 }
 0x381   :  { %v7560_v38 = vpop.eup %7559  ;;  %7577 = vpow2.f32 %v5133_v63  ;;  %v5339_v30 = vmul.f32 %v7558_v32, %v9943_v12 }
 0x382   :  { %7579 = vrcp.f32 %v5223_v8  ;;  %v5224_v39 = vadd.f32 1.0, %v7560_v38  ;;  %v7562_v11 = vpop.eup %7561 }
 0x383   :  { %v7564_v27 = vpop.eup %7563  ;;  %v5340_v6 = vmul.f32 %v7562_v11, %v9949_v35 }
 0x384   :  { %7581 = vrcp.f32 %v5224_v39  ;;  %v5343_v24 = vmul.f32 %v7564_v27, %v9954_v10  ;;  %v7566_v26 = vpop.eup %7565 }
 0x385   :  { %v4407_v23 = vpop.f32.mrf.mxu1  ;;  %v5344_v51 = vmul.f32 %v7566_v26, %v9959_v21  ;;  %v4301_v21 = vadd.f32 %v9797_v53, %v4188_v44  ;;  %v10839_v44 = vld [vmem:[#allocation49_spill] sm:$0xff] }
 0x386   :  { %v4408_v61 = vadd.f32 %v4407_v23, %v9787_v62  ;;  %v4520_v60 = vpop.f32.mrf.mxu0  ;;  %v7568_v2 = vpop.eup %7567  ;;  %v5399_v54 = vpack.c.bf16 %v5343_v24, %v5339_v30 }
 0x387   :  { %v4409_v46 = vpop.f32.mrf.mxu1  ;;  %v5227_v29 = vadd.f32 1.0, %v7568_v2  ;;  %v5400_v4 = vpack.c.bf16 %v5344_v51, %v5340_v6 }
 0x388   :  { %v7570_v42 = vpop.eup %7569  ;;  %v10027_v12 = vadd.f32 %v4520_v60, %v4408_v61  ;;  %v4410_v10 = vadd.f32 %v4409_v46, %v9790_v15  ;;  %v4522_v3 = vpop.f32.mrf.mxu0 }
 0x389   :  { %v5228_v58 = vadd.f32 1.0, %v7570_v42  ;;  %v4411_v62 = vpop.f32.mrf.mxu1  ;;  %5730 = vmatprep.mubr.bf16.mxu1 %v5400_v4  ;;  %7583 = vrcp.f32 %v5227_v29 }
 0x38a   :  { %v5043_v36 = vsub.f32 0.0, %v10027_v12  ;;  %v10031_v14 = vadd.f32 %v4522_v3, %v4410_v10  ;;  %v4412_v47 = vadd.f32 %v4411_v62, %v9794_v22  ;;  %v4524_v35 = vpop.f32.mrf.mxu0  ;;  %5731 = vmatmul.mubr.bf16.gmra.mxu1 %v5399_v54 }
 0x38b   :  { %v7572_v43 = vpop.eup %7571  ;;  %v4413_v16 = vpop.f32.mrf.mxu1  ;;  %7585 = vrcp.f32 %v5228_v58  ;;  %v6877_v58 = vld [vmem:[%s10544_s7 + $0xe0] sm:$0xff]  }
 0x38c   :  { %v7574_v34 = vpop.eup %7573  ;;  %v5139_v49 = vmul.f32 1.442695, %v5043_v36  ;;  %v5044_v15 = vsub.f32 0.0, %v10031_v14  ;;  %v10036_v31 = vadd.f32 %v4524_v35, %v4412_v47  ;;  %v4414_v25 = vadd.f32 %v4413_v16, %v4301_v21  ;;  %v4526_v63 = vpop.f32.mrf.mxu0  ;;  %v6878_v47 = vld [vmem:[%s10544_s7 + $0xa0] sm:$0xff]  }
 0x38d   :  { %v7576_v56 = vpop.eup %7575  ;;  %v5231_v7 = vadd.f32 1.0, %v7574_v34  ;;  %v4417_v17 = vpop.f32.mrf.mxu1  ;;  %v5347_v39 = vmul.f32 %v7572_v43, %v9967_v59  ;;  %v6875_v59 = vld [vmem:[%s10544_s7 + $0xe8] sm:$0xff]  }
 0x38e   :  { %v7578_v22 = vpop.eup %7577  ;;  %7587 = vpow2.f32 %v5139_v49  ;;  %v5141_v53 = vmul.f32 1.442695, %v5044_v15  ;;  %v5047_v33 = vsub.f32 0.0, %v10036_v31  ;;  %v10041_v32 = vadd.f32 %v4526_v63, %v4414_v25  ;;  %6401 = vmatprep.subr.bf16.mxu0 %v6875_v59  ;;  %v6879_v15 = vld [vmem:[%s10544_s7 + $0xd8] sm:$0xff]   ;;  %v6885_v59 = vld [vmem:[%s10544_s7 + $0xc0] sm:$0xff]  }
 0x38f   :  { %v7580_v55 = vpop.eup %7579  ;;  %7589 = vrcp.f32 %v5231_v7  ;;  %v5232_v1 = vadd.f32 1.0, %v7578_v22  ;;  %v4418_v8 = vadd.f32 %v4417_v17, %v9806_v48  ;;  %v4419_v38 = vpop.f32.mrf.mxu1  ;;  %v5348_v26 = vmul.f32 %v7576_v56, %v9973_v20  ;;  %v10840_v20 = vld [vmem:[#allocation55_spill] sm:$0xff] }
 0x390   :  { %v5351_v11 = vmul.f32 %v7580_v55, %v9981_v57  ;;  %7591 = vpow2.f32 %v5141_v53  ;;  %v5147_v27 = vmul.f32 1.442695, %v5047_v33  ;;  %v5048_v30 = vsub.f32 0.0, %v10041_v32  ;;  %v6880_v25 = vld [vmem:[%s10544_s7 + $0x98] sm:$0xff]  }
 0x391   :  { %v7582_v50 = vpop.eup %7581  ;;  %7593 = vrcp.f32 %v5232_v1  ;;  %v4420_v24 = vadd.f32 %v4419_v38, %v9811_v13  ;;  %v4421_v23 = vpop.f32.mrf.mxu1  ;;  %v6876_v13 = vld [vmem:[%s10544_s7 + $0xa8] sm:$0xff]   ;;  %v4311_v51 = vadd.f32 %v10840_v20, %v4198_v5  ;;  %v6881_v38 = vld [vmem:[%s10544_s7 + $0xd0] sm:$0xff]  }
 0x392   :  { %v5403_v61 = vpack.c.bf16 %v5351_v11, %v5347_v39  ;;  %v5352_v60 = vmul.f32 %v7582_v50, %v9988_v40  ;;  %7595 = vpow2.f32 %v5147_v27  ;;  %v4530_v48 = vpop.f32.mrf.mxu0  ;;  %v5149_v57 = vmul.f32 1.442695, %v5048_v30  ;;  %6402 = vmatpush3.bf16.msra.mxu0 %v6876_v13 }
 0x393   :  { %v10053_v2 = vadd.f32 %v4530_v48, %v4418_v8  ;;  %v4422_v6 = vadd.f32 %v4421_v23, %v10839_v44  ;;  %v4423_v54 = vpop.f32.mrf.mxu1  ;;  %6403 = vmatprep.subr.bf16.mxu0 %v6877_v58  ;;  %v10842_v58 = vld [vmem:[#allocation9_spill] sm:$0xff] }
 0x394   :  { %v4532_v46 = vpop.f32.mrf.mxu0  ;;  %v5404_v40 = vpack.c.bf16 %v5352_v60, %v5348_v26  ;;  %7597 = vpow2.f32 %v5149_v57  ;;  %v4424_v3 = vadd.f32 %v4423_v54, %v4311_v51  ;;  %v4208_v57 = vadd.f32 %v9854_v0, %v9671_v37  ;;  %v6886_v54 = vld [vmem:[%s10544_s7 + $0x80] sm:$0xff]   ;;  %v10841_v51 = vld [vmem:[#allocation50_spill] sm:$0xff] }
 0x395   :  { %v5051_v42 = vsub.f32 0.0, %v10053_v2  ;;  %v10061_v29 = vadd.f32 %v4532_v46, %v4420_v24 }
 0x396   :  { %v4534_v10 = vpop.f32.mrf.mxu0  ;;  %5738 = vmatprep.mubr.bf16.mxu1 %v5404_v40  ;;  %v7584_v35 = vpop.eup %7583  ;;  %6404 = vmatpush3.bf16.msra.mxu0 %v6878_v47  ;;  %v10843_v47 = vld [vmem:[#allocation10_spill] sm:$0xff] }
 0x397   :  { %v5155_v62 = vmul.f32 1.442695, %v5051_v42  ;;  %v5052_v4 = vsub.f32 0.0, %v10061_v29  ;;  %v10067_v36 = vadd.f32 %v4534_v10, %v4422_v6  ;;  %5739 = vmatmul.mubr.bf16.gmra.mxu1 %v5403_v61  ;;  %6405 = vmatprep.subr.bf16.mxu0 %v6879_v15  ;;  %v5355_v33 = vmul.f32 %v7584_v35, %v9997_v18  ;;  %v6882_v18 = vld [vmem:[%s10544_s7 + $0x90] sm:$0xff]  }
 0x398   :  { %v4536_v16 = vpop.f32.mrf.mxu0  ;;  %v7586_v34 = vpop.eup %7585  ;;  %v4321_v35 = vadd.f32 %v10843_v47, %v4208_v57 }
 0x399   :  { %7599 = vpow2.f32 %v5155_v62  ;;  %v5157_v43 = vmul.f32 1.442695, %v5052_v4  ;;  %v5055_v21 = vsub.f32 0.0, %v10067_v36  ;;  %v10073_v49 = vadd.f32 %v4536_v16, %v4424_v3 }
 0x39a   :  { %6406 = vmatpush3.bf16.msra.mxu0 %v6880_v25  ;;  %v5356_v11 = vmul.f32 %v7586_v34, %v10005_v41  ;;  %v6883_v41 = vld [vmem:[%s10544_s7 + $0xc8] sm:$0xff]  }
 0x39b   :  { %v7588_v56 = vpop.eup %7587  ;;  %7601 = vpow2.f32 %v5157_v43  ;;  %v5163_v7 = vmul.f32 1.442695, %v5055_v21  ;;  %v5056_v5 = vsub.f32 0.0, %v10073_v49  ;;  %6407 = vmatprep.subr.bf16.mxu0 %v6881_v38 }
 0x39c   :  { %v7590_v17 = vpop.eup %7589  ;;  %v5235_v22 = vadd.f32 1.0, %v7588_v56 }
 0x39d   :  { %v7592_v53 = vpop.eup %7591  ;;  %v5359_v63 = vmul.f32 %v7590_v17, %v10014_v9  ;;  %7603 = vpow2.f32 %v5163_v7  ;;  %v5165_v8 = vmul.f32 1.442695, %v5056_v5 }
 0x39e   :  { %v7594_v55 = vpop.eup %7593  ;;  %v5236_v1 = vadd.f32 1.0, %v7592_v53  ;;  %7605 = vrcp.f32 %v5235_v22  ;;  %6408 = vmatpush3.bf16.msra.mxu0 %v6882_v18 }
 0x39f   :  { %v7596_v39 = vpop.eup %7595  ;;  %v5407_v27 = vpack.c.bf16 %v5359_v63, %v5355_v33  ;;  %v5360_v50 = vmul.f32 %v7594_v55, %v10016_v19  ;;  %v6884_v19 = vld [vmem:[%s10544_s7 + $0x88] sm:$0xff]   ;;  %6409 = vmatprep.subr.bf16.mxu0 %v6883_v41  ;;  %v4218_v55 = vadd.f32 %v9890_v45, %v9671_v37 }
 0x3a0   :  { %7607 = vrcp.f32 %v5236_v1  ;;  %v5239_v9 = vadd.f32 1.0, %v7596_v39 }
 0x3a1   :  { %7609 = vpow2.f32 %v5165_v8  ;;  %v5408_v30 = vpack.c.bf16 %v5360_v50, %v5356_v11  ;;  %v7598_v24 = vpop.eup %7597 }
 0x3a2   :  { %7611 = vrcp.f32 %v5239_v9  ;;  %v5240_v23 = vadd.f32 1.0, %v7598_v24  ;;  %6410 = vmatpush3.bf16.msra.mxu0 %v6884_v19  ;;  %v10844_v9 = vld [vmem:[#allocation28_spill] sm:$0xff] }
 0x3a3   :  { %5746 = vmatprep.mubr.bf16.mxu1 %v5408_v30  ;;  %6411 = vmatprep.subr.bf16.mxu0 %v6885_v59 }
 0x3a4   :  { %5747 = vmatmul.mubr.bf16.gmra.mxu1 %v5407_v27  ;;  %7613 = vrcp.f32 %v5240_v23 }
 0x3a5   :  { %v4427_v26 = vpop.f32.mrf.mxu1 }
 0x3a6   :  { %v7600_v61 = vpop.eup %7599  ;;  %v4428_v60 = vadd.f32 %v4427_v26, %v9829_v28  ;;  %v4540_v48 = vpop.f32.mrf.mxu0  ;;  %6412 = vmatpush3.bf16.msra.mxu0 %v6886_v54 }
 0x3a7   :  { %v5243_v44 = vadd.f32 1.0, %v7600_v61  ;;  %v4429_v6 = vpop.f32.mrf.mxu1 }
 0x3a8   :  { %v7602_v13 = vpop.eup %7601  ;;  %v10107_v20 = vadd.f32 %v4540_v48, %v4428_v60  ;;  %v4430_v46 = vadd.f32 %v4429_v6, %v10841_v51  ;;  %v4542_v28 = vpop.f32.mrf.mxu0  ;;  %v10847_v48 = vld [vmem:[#allocation29_spill] sm:$0xff] }
 0x3a9   :  { %v5244_v40 = vadd.f32 1.0, %v7602_v13  ;;  %v4431_v42 = vpop.f32.mrf.mxu1  ;;  %7615 = vrcp.f32 %v5243_v44 }
 0x3aa   :  { %v7604_v10 = vpop.eup %7603  ;;  %v5059_v0 = vsub.f32 0.0, %v10107_v20  ;;  %v10111_v3 = vadd.f32 %v4542_v28, %v4430_v46  ;;  %v4432_v62 = vadd.f32 %v4431_v42, %v10842_v58  ;;  %v4544_v4 = vpop.f32.mrf.mxu0 }
 0x3ab   :  { %v5247_v43 = vadd.f32 1.0, %v7604_v10  ;;  %v4433_v21 = vpop.f32.mrf.mxu1  ;;  %v7606_v16 = vpop.eup %7605  ;;  %7617 = vrcp.f32 %v5244_v40 }
 0x3ac   :  { %v5171_v34 = vmul.f32 1.442695, %v5059_v0  ;;  %v5060_v15 = vsub.f32 0.0, %v10111_v3  ;;  %v10116_v56 = vadd.f32 %v4544_v4, %v4432_v62  ;;  %v4434_v25 = vadd.f32 %v4433_v21, %v4321_v35  ;;  %v4546_v33 = vpop.f32.mrf.mxu0 }
 0x3ad   :  { %v7608_v7 = vpop.eup %7607  ;;  %7619 = vrcp.f32 %v5247_v43  ;;  %v4437_v17 = vpop.f32.mrf.mxu1  ;;  %v5363_v11 = vmul.f32 %v7606_v16, %v10027_v12  ;;  %v10845_v12 = vld [vmem:[#allocation8_spill] sm:$0xff] }
 0x3ae   :  { %v7610_v22 = vpop.eup %7609  ;;  %7621 = vpow2.f32 %v5171_v34  ;;  %v5173_v5 = vmul.f32 1.442695, %v5060_v15  ;;  %v5063_v53 = vsub.f32 0.0, %v10116_v56  ;;  %v10121_v8 = vadd.f32 %v4546_v33, %v4434_v25 }
 0x3af   :  { %v7612_v63 = vpop.eup %7611  ;;  %v5248_v1 = vadd.f32 1.0, %v7610_v22  ;;  %v4438_v38 = vadd.f32 %v4437_v17, %v9873_v52  ;;  %v4439_v39 = vpop.f32.mrf.mxu1  ;;  %v5364_v37 = vmul.f32 %v7608_v7, %v10031_v14  ;;  %v7783_v52 = vld [vmem:[%s10543_s6] sm:$0xf]  ;;  %v10848_v14 = vld [vmem:[#allocation25_spill] sm:$0xff]  ;;  %v10849_v54 = vsub.s32 3, %v10845_v12 }
 0x3b0   :  { %v5367_v27 = vmul.f32 %v7612_v63, %v10036_v31  ;;  %7623 = vpow2.f32 %v5173_v5  ;;  %v5179_v50 = vmul.f32 1.442695, %v5063_v53  ;;  %v5064_v18 = vsub.f32 0.0, %v10121_v8 }
 0x3b1   :  { %7625 = vrcp.f32 %v5248_v1  ;;  %v4440_v30 = vadd.f32 %v4439_v39, %v10844_v9  ;;  %v4441_v24 = vpop.f32.mrf.mxu1  ;;  %v7614_v41 = vpop.eup %7613  ;;  %v10846_v31 = vsub.s32 2, %v10845_v12  ;;  %v4331_v44 = vadd.f32 %v10848_v14, %v4218_v55 }
 0x3b2   :  { %v5411_v45 = vpack.c.bf16 %v5367_v27, %v5363_v11  ;;  %7627 = vpow2.f32 %v5179_v50  ;;  %v4550_v23 = vpop.f32.mrf.mxu0  ;;  %v5368_v26 = vmul.f32 %v7614_v41, %v10041_v32  ;;  %v5181_v61 = vmul.f32 1.442695, %v5064_v18 }
 0x3b3   :  { %v10134_v19 = vrot.slane %v7783_v52, %v10846_v31  ;;  %v10137_v60 = vadd.f32 %v4550_v23, %v4438_v38  ;;  %v4442_v59 = vadd.f32 %v4441_v24, %v10847_v48  ;;  %v4443_v57 = vpop.f32.mrf.mxu1  ;;  %v10143_v13 = vrot.slane %v7783_v52, %v10849_v54 }
 0x3b4   :  { %v4552_v6 = vpop.f32.mrf.mxu0  ;;  %7629 = vpow2.f32 %v5181_v61  ;;  %v5412_v32 = vpack.c.bf16 %v5368_v26, %v5364_v37  ;;  %v4444_v42 = vadd.f32 %v4443_v57, %v4331_v44 }
 0x3b5   :  { %v5067_v51 = vsub.f32 0.0, %v10137_v60  ;;  %v10146_v46 = vadd.f32 %v4552_v6, %v4440_v30  ;;  %v4593_v28 = vpop.f32.mrf.mxu1 }
 0x3b6   :  { %v4554_v40 = vpop.f32.mrf.mxu0  ;;  %v7616_v10 = vpop.eup %7615  ;;  %v4594_v4 = vadd.f32 %v4593_v28, %v10134_v19  ;;  %5754 = vmatprep.mubr.bf16.mxu1 %v5412_v32 }
 0x3b7   :  { %v5187_v0 = vmul.f32 1.442695, %v5067_v51  ;;  %v5068_v58 = vsub.f32 0.0, %v10146_v46  ;;  %v10149_v62 = vadd.f32 %v4554_v40, %v4442_v59  ;;  %v4595_v47 = vpop.f32.mrf.mxu1  ;;  %5755 = vmatmul.mubr.bf16.gmra.mxu1 %v5411_v45  ;;  %v5371_v25 = vmul.f32 %v7616_v10, %v10053_v2 }
 0x3b8   :  { %v4556_v35 = vpop.f32.mrf.mxu0  ;;  %v7618_v43 = vpop.eup %7617  ;;  %v4596_v34 = vadd.f32 %v4595_v47, %v10143_v13 }
 0x3b9   :  { %7631 = vpow2.f32 %v5187_v0  ;;  %v5189_v21 = vmul.f32 1.442695, %v5068_v58  ;;  %v5071_v16 = vsub.f32 0.0, %v10149_v62  ;;  %v4597_v15 = vpop.f32.mrf.mxu1  ;;  %v10155_v17 = vadd.f32 %v4556_v35, %v4444_v42 }
 0x3ba   :  { %v7620_v7 = vpop.eup %7619  ;;  %v4706_v22 = vpop.f32.mrf.mxu0  ;;  %v4598_v5 = vadd.f32 %v4597_v15, %v10134_v19  ;;  %v5372_v30 = vmul.f32 %v7618_v43, %v10061_v29 }
 0x3bb   :  { %v7622_v53 = vpop.eup %7621  ;;  %v5375_v33 = vmul.f32 %v7620_v7, %v10067_v36  ;;  %7633 = vpow2.f32 %v5189_v21  ;;  %v5195_v63 = vmul.f32 1.442695, %v5071_v16  ;;  %v10159_v55 = vadd.f32 %v4706_v22, %v4594_v4  ;;  %v10161_v1 = vpop.f32.mrf.mxu1 }
 0x3bc   :  { %v5251_v38 = vadd.f32 1.0, %v7622_v53  ;;  %v5072_v39 = vsub.f32 0.0, %v10155_v17  ;;  %v4708_v11 = vpop.f32.mrf.mxu0 }
 0x3bd   :  { %v7624_v27 = vpop.eup %7623  ;;  %v5415_v2 = vpack.c.bf16 %v5375_v33, %v5371_v25  ;;  %7635 = vpow2.f32 %v5195_v63  ;;  %v10164_v50 = vadd.f32 %v4708_v11, %v4596_v34  ;;  %v4603_v18 = vpop.f32.mrf.mxu1 }
 0x3be   :  { %v7626_v9 = vpop.eup %7625  ;;  %v5197_v36 = vmul.f32 1.442695, %v5072_v39  ;;  %v4710_v24 = vpop.f32.mrf.mxu0  ;;  %v5252_v45 = vadd.f32 1.0, %v7624_v27  ;;  %v4604_v52 = vadd.f32 %v4603_v18, %v10134_v19  ;;  %7637 = vrcp.f32 %v5251_v38 }
 0x3bf   :  { %v7628_v41 = vpop.eup %7627  ;;  %v5376_v37 = vmul.f32 %v7626_v9, %v10073_v49  ;;  %v10168_v23 = vadd.f32 %v4710_v24, %v4598_v5  ;;  %v4605_v12 = vpop.f32.mrf.mxu1 }
 0x3c0   :  { %v5255_v31 = vadd.f32 1.0, %v7628_v41  ;;  %v10171_v26 = vpop.f32.mrf.mxu0  ;;  %7639 = vpow2.f32 %v5197_v36  ;;  %v4606_v61 = vadd.f32 %v4605_v12, %v10143_v13 }
 0x3c1   :  { %v4607_v48 = vpop.f32.mrf.mxu1  ;;  %v5416_v29 = vpack.c.bf16 %v5376_v37, %v5372_v30  ;;  %v7630_v59 = vpop.eup %7629 }
 0x3c2   :  { %7641 = vrcp.f32 %v5255_v31  ;;  %v4716_v57 = vpop.f32.mrf.mxu0  ;;  %v5256_v49 = vadd.f32 1.0, %v7630_v59  ;;  %v4608_v44 = vadd.f32 %v4607_v48, %v10134_v19 }
 0x3c3   :  { %7643 = vrcp.f32 %v5252_v45  ;;  %v10174_v14 = vadd.f32 %v4716_v57, %v4604_v52  ;;  %v10177_v6 = vpop.f32.mrf.mxu1  ;;  %5762 = vmatprep.mubr.bf16.mxu1 %v5416_v29 }
 0x3c4   :  { %v4718_v54 = vpop.f32.mrf.mxu0  ;;  %5763 = vmatmul.mubr.bf16.gmra.mxu1 %v5415_v2  ;;  %7645 = vrcp.f32 %v5256_v49 }
 0x3c5   :  { %v10179_v51 = vadd.f32 %v4718_v54, %v4606_v61  ;;  %v4613_v28 = vpop.f32.mrf.mxu1 }
 0x3c6   :  { %v7632_v32 = vpop.eup %7631  ;;  %v4720_v40 = vpop.f32.mrf.mxu0  ;;  %v4614_v0 = vadd.f32 %v4613_v28, %v10134_v19 }
 0x3c7   :  { %v5259_v42 = vadd.f32 1.0, %v7632_v32  ;;  %v10181_v10 = vadd.f32 %v4720_v40, %v4608_v44  ;;  %v4615_v58 = vpop.f32.mrf.mxu1 }
 0x3c8   :  { %v7634_v4 = vpop.eup %7633  ;;  %v10184_v47 = vpop.f32.mrf.mxu0  ;;  %v4616_v35 = vadd.f32 %v4615_v58, %v10143_v13 }
 0x3c9   :  { %v4617_v43 = vpop.f32.mrf.mxu1  ;;  %7647 = vrcp.f32 %v5259_v42  ;;  %v5260_v34 = vadd.f32 1.0, %v7634_v4 }
 0x3ca   :  { %v7636_v21 = vpop.eup %7635  ;;  %v4726_v16 = vpop.f32.mrf.mxu0  ;;  %v4618_v25 = vadd.f32 %v4617_v43, %v10134_v19 }
 0x3cb   :  { %v5263_v15 = vadd.f32 1.0, %v7636_v21  ;;  %v10187_v7 = vadd.f32 %v4726_v16, %v4614_v0  ;;  %v10190_v22 = vpop.f32.mrf.mxu1  ;;  %v7638_v53 = vpop.eup %7637 }
 0x3cc   :  { %v4728_v5 = vpop.f32.mrf.mxu0  ;;  %v5379_v36 = vmul.f32 %v7638_v53, %v10107_v20 }
 0x3cd   :  { %7649 = vrcp.f32 %v5263_v15  ;;  %v10192_v33 = vadd.f32 %v4728_v5, %v4616_v35  ;;  %v4623_v63 = vpop.f32.mrf.mxu1  ;;  %v7640_v38 = vpop.eup %7639 }
 0x3ce   :  { %v4730_v39 = vpop.f32.mrf.mxu0  ;;  %7651 = vrcp.f32 %v5260_v34  ;;  %v5264_v27 = vadd.f32 1.0, %v7640_v38  ;;  %v4624_v18 = vadd.f32 %v4623_v63, %v10134_v19 }
 0x3cf   :  { %v7642_v11 = vpop.eup %7641  ;;  %v10194_v2 = vadd.f32 %v4730_v39, %v4618_v25  ;;  %v4625_v9 = vpop.f32.mrf.mxu1 }
 0x3d0   :  { %v7644_v30 = vpop.eup %7643  ;;  %v5383_v24 = vmul.f32 %v7642_v11, %v10116_v56  ;;  %v10199_v41 = vpop.f32.mrf.mxu0  ;;  %7653 = vrcp.f32 %v5264_v27  ;;  %v4626_v37 = vadd.f32 %v4625_v9, %v10143_v13 }
 0x3d1   :  { %v4627_v45 = vpop.f32.mrf.mxu1  ;;  %v7646_v52 = vpop.eup %7645  ;;  %v5380_v61 = vmul.f32 %v7644_v30, %v10111_v3 }
 0x3d2   :  { %v5419_v12 = vpack.c.bf16 %v5383_v24, %v5379_v36  ;;  %v4736_v31 = vpop.f32.mrf.mxu0  ;;  %v5384_v48 = vmul.f32 %v7646_v52, %v10121_v8  ;;  %v4628_v59 = vadd.f32 %v4627_v45, %v10134_v19 }
 0x3d3   :  { %v10204_v29 = vadd.f32 %v4736_v31, %v4624_v18  ;;  %v10207_v20 = vpop.f32.mrf.mxu1 }
 0x3d4   :  { %v4738_v56 = vpop.f32.mrf.mxu0  ;;  %v5420_v44 = vpack.c.bf16 %v5384_v48, %v5380_v61 }
 0x3d5   :  { %v10209_v57 = vadd.f32 %v4738_v56, %v4626_v37  ;;  %v4633_v49 = vpop.f32.mrf.mxu1 }
 0x3d6   :  { %v4740_v54 = vpop.f32.mrf.mxu0  ;;  %v7648_v28 = vpop.eup %7647  ;;  %v4634_v40 = vadd.f32 %v4633_v49, %v10134_v19  ;;  %5770 = vmatprep.mubr.bf16.mxu1 %v5420_v44 }
 0x3d7   :  { %v10211_v32 = vadd.f32 %v4740_v54, %v4628_v59  ;;  %v4635_v3 = vpop.f32.mrf.mxu1  ;;  %5771 = vmatmul.mubr.bf16.gmra.mxu1 %v5419_v12  ;;  %v5387_v35 = vmul.f32 %v7648_v28, %v10137_v60 }
 0x3d8   :  { %v10214_v8 = vpop.f32.mrf.mxu0  ;;  %v4636_v42 = vadd.f32 %v4635_v3, %v10143_v13 }
 0x3d9   :  { %v4637_v0 = vpop.f32.mrf.mxu1 }
 0x3da   :  { %v7650_v58 = vpop.eup %7649  ;;  %v4746_v4 = vpop.f32.mrf.mxu0  ;;  %v4638_v16 = vadd.f32 %v4637_v0, %v10134_v19 }
 0x3db   :  { %v5391_v43 = vmul.f32 %v7650_v58, %v10149_v62  ;;  %v10219_v21 = vadd.f32 %v4746_v4, %v4634_v40  ;;  %v10222_v34 = vpop.f32.mrf.mxu1  ;;  %v7652_v15 = vpop.eup %7651 }
 0x3dc   :  { %v4748_v25 = vpop.f32.mrf.mxu0  ;;  %v5388_v11 = vmul.f32 %v7652_v15, %v10146_v46 }
 0x3dd   :  { %v5423_v5 = vpack.c.bf16 %v5391_v43, %v5387_v35  ;;  %v10224_v53 = vadd.f32 %v4748_v25, %v4636_v42  ;;  %v4643_v63 = vpop.f32.mrf.mxu1  ;;  %v7654_v38 = vpop.eup %7653 }
 0x3de   :  { %v4750_v39 = vpop.f32.mrf.mxu0  ;;  %v5392_v60 = vmul.f32 %v7654_v38, %v10155_v17  ;;  %v4644_v62 = vadd.f32 %v4643_v63, %v10134_v19 }
 0x3df   :  { %v10228_v27 = vadd.f32 %v4750_v39, %v4638_v16  ;;  %v4645_v18 = vpop.f32.mrf.mxu1 }
 0x3e0   :  { %v10231_v9 = vpop.f32.mrf.mxu0  ;;  %v5424_v30 = vpack.c.bf16 %v5392_v60, %v5388_v11  ;;  %v4646_v36 = vadd.f32 %v4645_v18, %v10143_v13 }
 0x3e1   :  { %v4647_v24 = vpop.f32.mrf.mxu1 }
 0x3e2   :  { %v4756_v37 = vpop.f32.mrf.mxu0  ;;  %5778 = vmatprep.mubr.bf16.mxu1 %v5424_v30  ;;  %v4648_v52 = vadd.f32 %v4647_v24, %v10134_v19  ;;  %v4600_v24 = vadd.f32 %v10161_v1, %v10143_v13 }
 0x3e3   :  { %v10234_v45 = vadd.f32 %v4756_v37, %v4644_v62  ;;  %v10237_v46 = vpop.f32.mrf.mxu1  ;;  %5779 = vmatmul.mubr.bf16.gmra.mxu1 %v5423_v5 }
 0x3e4   :  { %v4758_v17 = vpop.f32.mrf.mxu0 }
 0x3e5   :  { %v10239_v12 = vadd.f32 %v4758_v17, %v4646_v36  ;;  %v4653_v31 = vpop.f32.mrf.mxu1 }
 0x3e6   :  { %v4760_v61 = vpop.f32.mrf.mxu0  ;;  %v4654_v59 = vadd.f32 %v4653_v31, %v10134_v19 }
 0x3e7   :  { %v10241_v48 = vadd.f32 %v4760_v61, %v4648_v52  ;;  %v4655_v56 = vpop.f32.mrf.mxu1 }
 0x3e8   :  { %v10244_v49 = vpop.f32.mrf.mxu0  ;;  %v4656_v44 = vadd.f32 %v4655_v56, %v10143_v13  ;;  %v4713_v56 = vadd.f32 %v10171_v26, %v4600_v24 }
 0x3e9   :  { %v4657_v54 = vpop.f32.mrf.mxu1 }
 0x3ea   :  { %v4766_v28 = vpop.f32.mrf.mxu0  ;;  %v4658_v3 = vadd.f32 %v4657_v54, %v10134_v19 }
 0x3eb   :  { %v10247_v40 = vadd.f32 %v4766_v28, %v4654_v59  ;;  %v10250_v42 = vpop.f32.mrf.mxu1 }
 0x3ec   :  { %v4768_v0 = vpop.f32.mrf.mxu0 }
 0x3ed   :  { %v10252_v58 = vadd.f32 %v4768_v0, %v4656_v44  ;;  %v4663_v4 = vpop.f32.mrf.mxu1 }
 0x3ee   :  { %v4770_v35 = vpop.f32.mrf.mxu0  ;;  %v4664_v16 = vadd.f32 %v4663_v4, %v10134_v19 }
 0x3ef   :  { %v10254_v43 = vadd.f32 %v4770_v35, %v4658_v3  ;;  %v4665_v15 = vpop.f32.mrf.mxu1  ;;  %v4610_v35 = vadd.f32 %v10177_v6, %v10143_v13 }
 0x3f0   :  { %v10257_v25 = vpop.f32.mrf.mxu0  ;;  %v4666_v5 = vadd.f32 %v4665_v15, %v10143_v13 }
 0x3f1   :  { %v4667_v63 = vpop.f32.mrf.mxu1  ;;  %v4723_v6 = vadd.f32 %v10184_v47, %v4610_v35  ;;  %v4620_v47 = vadd.f32 %v10190_v22, %v10143_v13 }
 0x3f2   :  { %v4776_v38 = vpop.f32.mrf.mxu0  ;;  %v4668_v11 = vadd.f32 %v4667_v63, %v10134_v19 }
 0x3f3   :  { %v10260_v39 = vadd.f32 %v4776_v38, %v4664_v16  ;;  %v10263_v60 = vpop.f32.mrf.mxu1 }
 0x3f4   :  { %v4778_v62 = vpop.f32.mrf.mxu0 }
 0x3f5   :  { %v10265_v18 = vadd.f32 %v4778_v62, %v4666_v5  ;;  %v4819_v30 = vpop.f32.mrf.mxu1 }
 0x3f6   :  { %v4780_v36 = vpop.f32.mrf.mxu0  ;;  %v4820_v52 = vadd.f32 %v4819_v30, %v10159_v55 }
 0x3f7   :  { %v10269_v37 = vadd.f32 %v4780_v36, %v4668_v11  ;;  %v4821_v17 = vpop.f32.mrf.mxu1 }
 0x3f8   :  { %v10272_v31 = vpop.f32.mrf.mxu0  ;;  %v4822_v61 = vadd.f32 %v4821_v17, %v10164_v50 }
 0x3f9   :  { %v4823_v19 = vpop.f32.mrf.mxu1 }
 0x3fa   :  { %v4932_v59 = vpop.f32.mrf.mxu0  ;;  %v4824_v54 = vadd.f32 %v4823_v19, %v10168_v23 }
 0x3fb   :  { %v10276_v44 = vadd.f32 %v4932_v59, %v4820_v52  ;;  %v4825_v28 = vpop.f32.mrf.mxu1 }
 0x3fc   :  { %v4934_v3 = vpop.f32.mrf.mxu0  ;;  %v4826_v55 = vadd.f32 %v4825_v28, %v4713_v56 }
 0x3fd   :  { %v5013_v1 = vsub.f32 0.0, %v10276_v44  ;;  %v10280_v0 = vadd.f32 %v4934_v3, %v4822_v61  ;;  %v4829_v4 = vpop.f32.mrf.mxu1 }
 0x3fe   :  { %v4936_v50 = vpop.f32.mrf.mxu0  ;;  %v4830_v5 = vadd.f32 %v4829_v4, %v10174_v14 }
 0x3ff   :  { %v5079_v16 = vmul.f32 1.442695, %v5013_v1  ;;  %v5014_v15 = vsub.f32 0.0, %v10280_v0  ;;  %v10285_v26 = vadd.f32 %v4936_v50, %v4824_v54  ;;  %v4831_v23 = vpop.f32.mrf.mxu1 }
 0x400   :  { %v4938_v63 = vpop.f32.mrf.mxu0  ;;  %v4832_v38 = vadd.f32 %v4831_v23, %v10179_v51 }
 0x401   :  { %7655 = vpow2.f32 %v5079_v16  ;;  %v5081_v11 = vmul.f32 1.442695, %v5014_v15  ;;  %v5017_v62 = vsub.f32 0.0, %v10285_v26  ;;  %v10290_v30 = vadd.f32 %v4938_v63, %v4826_v55  ;;  %v4833_v36 = vpop.f32.mrf.mxu1 }
 0x402   :  { %v4942_v24 = vpop.f32.mrf.mxu0  ;;  %v4834_v52 = vadd.f32 %v4833_v36, %v10181_v10 }
 0x403   :  { %7657 = vpow2.f32 %v5081_v11  ;;  %v5087_v17 = vmul.f32 1.442695, %v5017_v62  ;;  %v5018_v14 = vsub.f32 0.0, %v10290_v30  ;;  %v10295_v61 = vadd.f32 %v4942_v24, %v4830_v5  ;;  %v4835_v19 = vpop.f32.mrf.mxu1 }
 0x404   :  { %v4944_v51 = vpop.f32.mrf.mxu0  ;;  %v4836_v59 = vadd.f32 %v4835_v19, %v4723_v6 }
 0x405   :  { %7659 = vpow2.f32 %v5087_v17  ;;  %v5089_v56 = vmul.f32 1.442695, %v5018_v14  ;;  %v5021_v54 = vsub.f32 0.0, %v10295_v61  ;;  %v10298_v28 = vadd.f32 %v4944_v51, %v4832_v38  ;;  %v4839_v3 = vpop.f32.mrf.mxu1 }
 0x406   :  { %v4946_v10 = vpop.f32.mrf.mxu0  ;;  %v4840_v1 = vadd.f32 %v4839_v3, %v10187_v7  ;;  %v4733_v38 = vadd.f32 %v10199_v41, %v4620_v47 }
 0x407   :  { %7661 = vpow2.f32 %v5089_v56  ;;  %v5095_v55 = vmul.f32 1.442695, %v5021_v54  ;;  %v5022_v4 = vsub.f32 0.0, %v10298_v28  ;;  %v10304_v35 = vadd.f32 %v4946_v10, %v4834_v52  ;;  %v4841_v50 = vpop.f32.mrf.mxu1 }
 0x408   :  { %v4948_v16 = vpop.f32.mrf.mxu0  ;;  %v4842_v15 = vadd.f32 %v4841_v50, %v10192_v33  ;;  %v4630_v33 = vadd.f32 %v10207_v20, %v10143_v13 }
 0x409   :  { %7663 = vpow2.f32 %v5095_v55  ;;  %v5097_v5 = vmul.f32 1.442695, %v5022_v4  ;;  %v5025_v23 = vsub.f32 0.0, %v10304_v35  ;;  %v10308_v63 = vadd.f32 %v4948_v16, %v4836_v59  ;;  %v4843_v22 = vpop.f32.mrf.mxu1 }
 0x40a   :  { %v4952_v7 = vpop.f32.mrf.mxu0  ;;  %v4844_v52 = vadd.f32 %v4843_v22, %v10194_v2  ;;  %v4743_v2 = vadd.f32 %v10214_v8, %v4630_v33  ;;  %v4640_v55 = vadd.f32 %v10222_v34, %v10143_v13 }
 0x40b   :  { %7665 = vpow2.f32 %v5097_v5  ;;  %v5103_v11 = vmul.f32 1.442695, %v5025_v23  ;;  %v5026_v62 = vsub.f32 0.0, %v10308_v63  ;;  %v10312_v36 = vadd.f32 %v4952_v7, %v4840_v1  ;;  %v4845_v6 = vpop.f32.mrf.mxu1 }
 0x40c   :  { %v4954_v24 = vpop.f32.mrf.mxu0  ;;  %v4846_v17 = vadd.f32 %v4845_v6, %v4733_v38 }
 0x40d   :  { %7667 = vpow2.f32 %v5103_v11  ;;  %v5105_v14 = vmul.f32 1.442695, %v5026_v62  ;;  %v5029_v19 = vsub.f32 0.0, %v10312_v36  ;;  %v10318_v41 = vadd.f32 %v4954_v24, %v4842_v15  ;;  %v4849_v51 = vpop.f32.mrf.mxu1 }
 0x40e   :  { %v7656_v59 = vpop.eup %7655  ;;  %v4956_v56 = vpop.f32.mrf.mxu0  ;;  %v4850_v54 = vadd.f32 %v4849_v51, %v10204_v29  ;;  %v4753_v24 = vadd.f32 %v10231_v9, %v4640_v55 }
 0x40f   :  { %v5205_v3 = vadd.f32 1.0, %v7656_v59  ;;  %7669 = vpow2.f32 %v5105_v14  ;;  %v5111_v47 = vmul.f32 1.442695, %v5029_v19  ;;  %v5030_v20 = vsub.f32 0.0, %v10318_v41  ;;  %v4851_v10 = vpop.f32.mrf.mxu1 }
 0x410   :  { %v7658_v1 = vpop.eup %7657  ;;  %v10325_v4 = vadd.f32 %v4956_v56, %v4844_v52  ;;  %v4958_v50 = vpop.f32.mrf.mxu0  ;;  %v4852_v7 = vadd.f32 %v4851_v10, %v10209_v57  ;;  %v4650_v56 = vadd.f32 %v10237_v46, %v10143_v13 }
 0x411   :  { %7671 = vrcp.f32 %v5205_v3  ;;  %v5206_v16 = vadd.f32 1.0, %v7658_v1  ;;  %v5113_v15 = vmul.f32 1.442695, %v5030_v20  ;;  %v10327_v5 = vadd.f32 %v4958_v50, %v4846_v17  ;;  %v4853_v29 = vpop.f32.mrf.mxu1 }
 0x412   :  { %v7660_v23 = vpop.eup %7659  ;;  %7673 = vpow2.f32 %v5111_v47  ;;  %v5033_v22 = vsub.f32 0.0, %v10325_v4  ;;  %v4962_v38 = vpop.f32.mrf.mxu0  ;;  %v4854_v8 = vadd.f32 %v4853_v29, %v10211_v32 }
 0x413   :  { %7675 = vrcp.f32 %v5206_v16  ;;  %v5209_v34 = vadd.f32 1.0, %v7660_v23  ;;  %v5034_v11 = vsub.f32 0.0, %v10327_v5  ;;  %v10333_v62 = vadd.f32 %v4962_v38, %v4850_v54  ;;  %v4855_v6 = vpop.f32.mrf.mxu1 }
 0x414   :  { %v7662_v33 = vpop.eup %7661  ;;  %7677 = vpow2.f32 %v5113_v15  ;;  %v5119_v52 = vmul.f32 1.442695, %v5033_v22  ;;  %v4964_v17 = vpop.f32.mrf.mxu0  ;;  %v4856_v14 = vadd.f32 %v4855_v6, %v4743_v2  ;;  %v4660_v54 = vadd.f32 %v10250_v42, %v10143_v13 }
 0x415   :  { %7679 = vrcp.f32 %v5209_v34  ;;  %v5210_v19 = vadd.f32 1.0, %v7662_v33  ;;  %v5121_v51 = vmul.f32 1.442695, %v5034_v11  ;;  %v5037_v57 = vsub.f32 0.0, %v10333_v62  ;;  %v4859_v32 = vpop.f32.mrf.mxu1 }
 0x416   :  { %v7664_v59 = vpop.eup %7663  ;;  %7681 = vpow2.f32 %v5119_v52  ;;  %v10341_v3 = vadd.f32 %v4964_v17, %v4852_v7  ;;  %v4966_v9 = vpop.f32.mrf.mxu0  ;;  %v4860_v46 = vadd.f32 %v4859_v32, %v10219_v21  ;;  %v4670_v38 = vadd.f32 %v10263_v60, %v10143_v13 }
 0x417   :  { %7683 = vrcp.f32 %v5210_v19  ;;  %v5213_v47 = vadd.f32 1.0, %v7664_v59  ;;  %v5127_v20 = vmul.f32 1.442695, %v5037_v57  ;;  %v10343_v10 = vadd.f32 %v4966_v9, %v4854_v8  ;;  %v4861_v1 = vpop.f32.mrf.mxu1 }
 0x418   :  { %v7666_v2 = vpop.eup %7665  ;;  %7685 = vpow2.f32 %v5121_v51  ;;  %v5038_v55 = vsub.f32 0.0, %v10341_v3  ;;  %v4968_v50 = vpop.f32.mrf.mxu0  ;;  %v4862_v16 = vadd.f32 %v4861_v1, %v10224_v53  ;;  %v10361_v32 = vadd.f32 %v10257_v25, %v4660_v54 }
 0x419   :  { %7687 = vrcp.f32 %v5213_v47  ;;  %v5214_v42 = vadd.f32 1.0, %v7666_v2  ;;  %v5041_v15 = vsub.f32 0.0, %v10343_v10  ;;  %v10349_v29 = vadd.f32 %v4968_v50, %v4856_v14  ;;  %v4863_v23 = vpop.f32.mrf.mxu1 }
 0x41a   :  { %v7668_v22 = vpop.eup %7667  ;;  %7689 = vpow2.f32 %v5127_v20  ;;  %v5129_v7 = vmul.f32 1.442695, %v5038_v55  ;;  %v4972_v8 = vpop.f32.mrf.mxu0  ;;  %v4864_v34 = vadd.f32 %v4863_v23, %v10228_v27  ;;  %v4763_v27 = vadd.f32 %v10244_v49, %v4650_v56 }
 0x41b   :  { %7691 = vrcp.f32 %v5214_v42  ;;  %v5217_v21 = vadd.f32 1.0, %v7668_v22  ;;  %v5135_v11 = vmul.f32 1.442695, %v5041_v15  ;;  %v5042_v53 = vsub.f32 0.0, %v10349_v29  ;;  %v4865_v6 = vpop.f32.mrf.mxu1 }
 0x41c   :  { %v7670_v33 = vpop.eup %7669  ;;  %7693 = vpow2.f32 %v5129_v7  ;;  %v10355_v52 = vadd.f32 %v4972_v8, %v4860_v46  ;;  %v4974_v17 = vpop.f32.mrf.mxu0  ;;  %v4866_v14 = vadd.f32 %v4865_v6, %v4753_v24  ;;  %v10365_v20 = vadd.f32 %v10272_v31, %v4670_v38 }
 0x41d   :  { %7695 = vrcp.f32 %v5217_v21  ;;  %v5218_v19 = vadd.f32 1.0, %v7670_v33  ;;  %v5137_v13 = vmul.f32 1.442695, %v5042_v53  ;;  %v10357_v60 = vadd.f32 %v4974_v17, %v4862_v16  ;;  %v4869_v51 = vpop.f32.mrf.mxu1 }
 0x41e   :  { %v7672_v57 = vpop.eup %7671  ;;  %7697 = vpow2.f32 %v5135_v11  ;;  %v5045_v59 = vsub.f32 0.0, %v10355_v52  ;;  %v4976_v9 = vpop.f32.mrf.mxu0  ;;  %v4870_v56 = vadd.f32 %v4869_v51, %v10234_v45 }
 0x41f   :  { %v7674_v47 = vpop.eup %7673  ;;  %7699 = vrcp.f32 %v5218_v19  ;;  %v5046_v24 = vsub.f32 0.0, %v10357_v60  ;;  %v10368_v1 = vadd.f32 %v4976_v9, %v4864_v34  ;;  %v4871_v2 = vpop.f32.mrf.mxu1  ;;  %v10372_v46 = vmul.f32 %v7672_v57, %v10276_v44 }
 0x420   :  { %v7676_v55 = vpop.eup %7675  ;;  %v5221_v50 = vadd.f32 1.0, %v7674_v47  ;;  %7701 = vpow2.f32 %v5137_v13  ;;  %v5143_v49 = vmul.f32 1.442695, %v5045_v59  ;;  %v4978_v25 = vpop.f32.mrf.mxu0  ;;  %v4872_v7 = vadd.f32 %v4871_v2, %v10239_v12 }
 0x421   :  { %v7678_v54 = vpop.eup %7677  ;;  %v5145_v16 = vmul.f32 1.442695, %v5046_v24  ;;  %v5049_v31 = vsub.f32 0.0, %v10368_v1  ;;  %v10375_v42 = vadd.f32 %v4978_v25, %v4866_v14  ;;  %v4873_v15 = vpop.f32.mrf.mxu1 }
 0x422   :  { %v7680_v23 = vpop.eup %7679  ;;  %7703 = vrcp.f32 %v5221_v50  ;;  %v5222_v22 = vadd.f32 1.0, %v7678_v54  ;;  %v4982_v38 = vpop.f32.mrf.mxu0  ;;  %v4874_v8 = vadd.f32 %v4873_v15, %v10241_v48 }
 0x423   :  { %v7682_v34 = vpop.eup %7681  ;;  %v10380_v45 = vmul.f32 %v7680_v23, %v10285_v26  ;;  %7705 = vpow2.f32 %v5143_v49  ;;  %v5151_v44 = vmul.f32 1.442695, %v5049_v31  ;;  %v5050_v21 = vsub.f32 0.0, %v10375_v42  ;;  %v4875_v11 = vpop.f32.mrf.mxu1 }
 0x424   :  { %v7684_v53 = vpop.eup %7683  ;;  %7707 = vrcp.f32 %v5222_v22  ;;  %v5225_v6 = vadd.f32 1.0, %v7682_v34  ;;  %v10383_v33 = vadd.f32 %v4982_v38, %v4870_v56  ;;  %v4984_v17 = vpop.f32.mrf.mxu0  ;;  %v4876_v14 = vadd.f32 %v4875_v11, %v4763_v27 }
 0x425   :  { %v7686_v19 = vpop.eup %7685  ;;  %v5397_v12 = vpack.c.bf16 %v10380_v45, %v10372_v46  ;;  %v5338_v48 = vmul.f32 %v7684_v53, %v10290_v30  ;;  %7709 = vpow2.f32 %v5145_v16  ;;  %v5153_v26 = vmul.f32 1.442695, %v5050_v21  ;;  %v4879_v13 = vpop.f32.mrf.mxu1 }
 0x426   :  { %v7688_v51 = vpop.eup %7687  ;;  %7711 = vrcp.f32 %v5225_v6  ;;  %v5226_v57 = vadd.f32 1.0, %v7686_v19  ;;  %v5053_v59 = vsub.f32 0.0, %v10383_v33  ;;  %v10389_v9 = vadd.f32 %v4984_v17, %v4872_v7  ;;  %v4986_v47 = vpop.f32.mrf.mxu0 }
 0x427   :  { %v7690_v24 = vpop.eup %7689  ;;  %v5334_v27 = vmul.f32 %v7676_v55, %v10280_v0  ;;  %7713 = vpow2.f32 %v5151_v44  ;;  %v10392_v2 = vadd.f32 %v4986_v47, %v4874_v8  ;;  %v4880_v50 = vadd.f32 %v4879_v13, %v10247_v40  ;;  %v4881_v30 = vpop.f32.mrf.mxu1 }
 0x428   :  { %v7692_v49 = vpop.eup %7691  ;;  %7715 = vrcp.f32 %v5226_v57  ;;  %v5229_v25 = vadd.f32 1.0, %v7690_v24  ;;  %v5159_v56 = vmul.f32 1.442695, %v5053_v59  ;;  %v5054_v54 = vsub.f32 0.0, %v10389_v9  ;;  %v4988_v46 = vpop.f32.mrf.mxu0 }
 0x429   :  { %v7694_v16 = vpop.eup %7693  ;;  %v10397_v31 = vmul.f32 %v7688_v51, %v10295_v61  ;;  %7717 = vpow2.f32 %v5153_v26  ;;  %v5057_v0 = vsub.f32 0.0, %v10392_v2  ;;  %v10400_v55 = vadd.f32 %v4988_v46, %v4876_v14  ;;  %v4883_v15 = vpop.f32.mrf.mxu1 }
 0x42a   :  { %v7696_v23 = vpop.eup %7695  ;;  %7719 = vrcp.f32 %v5229_v25  ;;  %v5230_v40 = vadd.f32 1.0, %v7694_v16  ;;  %v5161_v22 = vmul.f32 1.442695, %v5054_v54  ;;  %v4992_v38 = vpop.f32.mrf.mxu0  ;;  %v5398_v7 = vpack.c.bf16 %v5338_v48, %v5334_v27 }
 0x42b   :  { %v7698_v8 = vpop.eup %7697  ;;  %v10403_v34 = vmul.f32 %v7696_v23, %v10304_v35  ;;  %7721 = vpow2.f32 %v5159_v56  ;;  %v5167_v45 = vmul.f32 1.442695, %v5057_v0  ;;  %v5058_v61 = vsub.f32 0.0, %v10400_v55  ;;  %v4885_v44 = vpop.f32.mrf.mxu1 }
 0x42c   :  { %v7700_v21 = vpop.eup %7699  ;;  %7723 = vrcp.f32 %v5230_v40  ;;  %v5233_v11 = vadd.f32 1.0, %v7698_v8  ;;  %v10406_v53 = vadd.f32 %v4992_v38, %v4880_v50  ;;  %5819 = vmatprep.mubr.bf16.mxu0 %v5398_v7  ;;  %v4882_v6 = vadd.f32 %v4881_v30, %v10252_v58  ;;  %v4994_v17 = vpop.f32.mrf.mxu0 }
 0x42d   :  { %v7702_v14 = vpop.eup %7701  ;;  %v5401_v19 = vpack.c.bf16 %v10403_v34, %v10397_v31  ;;  %v5346_v35 = vmul.f32 %v7700_v21, %v10308_v63  ;;  %7725 = vpow2.f32 %v5161_v22  ;;  %v5169_v48 = vmul.f32 1.442695, %v5058_v61  ;;  %5820 = vmatmul.mubr.bf16.vlgmr.msra.gmra.mxu0 %v5397_v12  ;;  %v4889_v26 = vpop.f32.mrf.mxu1 }
 0x42e   :  { %7727 = vrcp.f32 %v5233_v11  ;;  %v5234_v13 = vadd.f32 1.0, %v7702_v14  ;;  %v5061_v51 = vsub.f32 0.0, %v10406_v53  ;;  %v10413_v57 = vadd.f32 %v4994_v17, %v4882_v6  ;;  %v4996_v59 = vpop.f32.mrf.mxu0 }
 0x42f   :  { %v7704_v47 = vpop.eup %7703  ;;  %v5342_v58 = vmul.f32 %v7692_v49, %v10298_v28  ;;  %7729 = vpow2.f32 %v5167_v45  ;;  %v4884_v24 = vadd.f32 %v4883_v15, %v10254_v43  ;;  %v4886_v27 = vadd.f32 %v4885_v44, %v10361_v32  ;;  %v4891_v63 = vpop.f32.mrf.mxu1 }
 0x430   :  { %v7706_v50 = vpop.eup %7705  ;;  %7731 = vrcp.f32 %v5234_v13  ;;  %v5175_v12 = vmul.f32 1.442695, %v5061_v51  ;;  %v5062_v30 = vsub.f32 0.0, %v10413_v57  ;;  %v4998_v25 = vpop.f32.mrf.mxu0  ;;  %v4890_v56 = vadd.f32 %v4889_v26, %v10260_v39 }
 0x431   :  { %v7708_v54 = vpop.eup %7707  ;;  %v5237_v46 = vadd.f32 1.0, %v7706_v50  ;;  %7733 = vpow2.f32 %v5169_v48  ;;  %v10420_v16 = vadd.f32 %v4996_v59, %v4884_v24  ;;  %v10422_v28 = vadd.f32 %v4998_v25, %v4886_v27  ;;  %v4893_v49 = vpop.f32.mrf.mxu1 }
 0x432   :  { %v7710_v43 = vpop.eup %7709  ;;  %v10425_v32 = vmul.f32 %v7704_v47, %v10312_v36  ;;  %7735 = vpow2.f32 %v5175_v12  ;;  %v5177_v31 = vmul.f32 1.442695, %v5062_v30  ;;  %v5002_v0 = vpop.f32.mrf.mxu0  ;;  %v5402_v15 = vpack.c.bf16 %v5346_v35, %v5342_v58 }
 0x433   :  { %v7712_v23 = vpop.eup %7711  ;;  %7737 = vrcp.f32 %v5237_v46  ;;  %v5238_v40 = vadd.f32 1.0, %v7710_v43  ;;  %v5065_v39 = vsub.f32 0.0, %v10420_v16  ;;  %v5066_v22 = vsub.f32 0.0, %v10422_v28  ;;  %v4895_v45 = vpop.f32.mrf.mxu1 }
 0x434   :  { %v7714_v38 = vpop.eup %7713  ;;  %v5353_v7 = vmul.f32 %v7712_v23, %v10325_v4  ;;  %7739 = vpow2.f32 %v5177_v31  ;;  %v10430_v8 = vadd.f32 %v5002_v0, %v4890_v56  ;;  %5827 = vmatprep.mubr.bf16.mxu0 %v5402_v15  ;;  %v4892_v36 = vadd.f32 %v4891_v63, %v10265_v18  ;;  %v5004_v34 = vpop.f32.mrf.mxu0 }
 0x435   :  { %v7716_v61 = vpop.eup %7715  ;;  %7741 = vrcp.f32 %v5238_v40  ;;  %v5241_v44 = vadd.f32 1.0, %v7714_v38  ;;  %v5183_v21 = vmul.f32 1.442695, %v5065_v39  ;;  %v5185_v11 = vmul.f32 1.442695, %v5066_v22  ;;  %5828 = vmatmul.mubr.bf16.gmra.mxu0 %v5401_v19 }
 0x436   :  { %v7718_v6 = vpop.eup %7717  ;;  %v5405_v17 = vpack.c.bf16 %v5353_v7, %v10425_v32  ;;  %v5354_v14 = vmul.f32 %v7716_v61, %v10327_v5  ;;  %v5069_v4 = vsub.f32 0.0, %v10430_v8  ;;  %v10436_v35 = vadd.f32 %v5004_v34, %v4892_v36  ;;  %v5006_v48 = vpop.f32.mrf.mxu0 }
 0x437   :  { %v7720_v26 = vpop.eup %7719  ;;  %7743 = vrcp.f32 %v5241_v44  ;;  %v5242_v18 = vadd.f32 1.0, %v7718_v6  ;;  %v4894_v13 = vadd.f32 %v4893_v49, %v10269_v37  ;;  %v4896_v51 = vadd.f32 %v4895_v45, %v10365_v20 }
 0x438   :  { %v7722_v59 = vpop.eup %7721  ;;  %v5350_v19 = vmul.f32 %v7708_v54, %v10318_v41  ;;  %7745 = vpow2.f32 %v5183_v21  ;;  %v5191_v47 = vmul.f32 1.442695, %v5069_v4  ;;  %v5070_v58 = vsub.f32 0.0, %v10436_v35  ;;  %v5008_v5 = vpop.f32.mrf.mxu0 }
 0x439   :  { %v7724_v24 = vpop.eup %7723  ;;  %7747 = vrcp.f32 %v5242_v18  ;;  %v5245_v27 = vadd.f32 1.0, %v7722_v59  ;;  %v10442_v63 = vadd.f32 %v5006_v48, %v4894_v13  ;;  %v10444_v50 = vadd.f32 %v5008_v5, %v4896_v51 }
 0x43a   :  { %v7726_v12 = vpop.eup %7725  ;;  %7749 = vpow2.f32 %v5185_v11  ;;  %v5193_v37 = vmul.f32 1.442695, %v5070_v58  ;;  %v5406_v30 = vpack.c.bf16 %v5354_v14, %v5350_v19  ;;  %v5357_v46 = vmul.f32 %v7720_v26, %v10333_v62 }
 0x43b   :  { %v7728_v20 = vpop.eup %7727  ;;  %7751 = vrcp.f32 %v5245_v27  ;;  %v5246_v25 = vadd.f32 1.0, %v7726_v12  ;;  %v5073_v41 = vsub.f32 0.0, %v10442_v63  ;;  %v5074_v56 = vsub.f32 0.0, %v10444_v50 }
 0x43c   :  { %v7730_v54 = vpop.eup %7729  ;;  %v5361_v49 = vmul.f32 %v7728_v20, %v10343_v10  ;;  %7753 = vpow2.f32 %v5191_v47  ;;  %5835 = vmatprep.mubr.bf16.mxu0 %v5406_v30  ;;  %v5358_v15 = vmul.f32 %v7724_v24, %v10341_v3 }
 0x43d   :  { %v7732_v43 = vpop.eup %7731  ;;  %7755 = vrcp.f32 %v5246_v25  ;;  %v5249_v32 = vadd.f32 1.0, %v7730_v54  ;;  %v5199_v31 = vmul.f32 1.442695, %v5073_v41  ;;  %5836 = vmatmul.mubr.bf16.gmra.mxu0 %v5405_v17  ;;  %v5201_v62 = vmul.f32 1.442695, %v5074_v56 }
 0x43e   :  { %v7734_v0 = vpop.eup %7733  ;;  %v5409_v23 = vpack.c.bf16 %v5361_v49, %v5357_v46  ;;  %v5362_v40 = vmul.f32 %v7732_v43, %v10349_v29  ;;  %7757 = vpow2.f32 %v5193_v37 }
 0x43f   :  { %v7736_v39 = vpop.eup %7735  ;;  %7759 = vrcp.f32 %v5249_v32  ;;  %v5250_v22 = vadd.f32 1.0, %v7734_v0 }
 0x440   :  { %v7738_v38 = vpop.eup %7737  ;;  %7761 = vpow2.f32 %v5199_v31  ;;  %v5410_v10 = vpack.c.bf16 %v5362_v40, %v5358_v15  ;;  %v5253_v34 = vadd.f32 1.0, %v7736_v39 }
 0x441   :  { %v7740_v7 = vpop.eup %7739  ;;  %7763 = vrcp.f32 %v5250_v22  ;;  %v5365_v44 = vmul.f32 %v7738_v38, %v10355_v52 }
 0x442   :  { %v7742_v36 = vpop.eup %7741  ;;  %5843 = vmatprep.mubr.bf16.mxu0 %v5410_v10  ;;  %v5254_v45 = vadd.f32 1.0, %v7740_v7  ;;  %7765 = vpow2.f32 %v5201_v62 }
 0x443   :  { %7767 = vrcp.f32 %v5253_v34  ;;  %v5366_v17 = vmul.f32 %v7742_v36, %v10357_v60 }
 0x444   :  { %v7744_v61 = vpop.eup %7743  ;;  %7769 = vrcp.f32 %v5254_v45 }
 0x445   :  { %v7746_v3 = vpop.eup %7745  ;;  %v5369_v29 = vmul.f32 %v7744_v61, %v10368_v1  ;;  %5844 = vmatmul.mubr.bf16.gmra.mxu0 %v5409_v23 }
 0x446   :  { %v7748_v21 = vpop.eup %7747  ;;  %v5257_v11 = vadd.f32 1.0, %v7746_v3 }
 0x447   :  { %v7750_v6 = vpop.eup %7749  ;;  %v5413_v14 = vpack.c.bf16 %v5369_v29, %v5365_v44  ;;  %v5370_v4 = vmul.f32 %v7748_v21, %v10375_v42  ;;  %v10471_v21 = vld [vmem:[%s10545_s8] ss:$0 sm:$0xff] }
 0x448   :  { %v7752_v48 = vpop.eup %7751  ;;  %7771 = vrcp.f32 %v5257_v11  ;;  %v5258_v26 = vadd.f32 1.0, %v7750_v6 }
 0x449   :  { %v7754_v18 = vpop.eup %7753  ;;  %v5414_v13 = vpack.c.bf16 %v5370_v4, %v5366_v17  ;;  %v5373_v47 = vmul.f32 %v7752_v48, %v10383_v33 }
 0x44a   :  { %v7756_v51 = vpop.eup %7755  ;;  %7773 = vrcp.f32 %v5258_v26  ;;  %v5261_v52 = vadd.f32 1.0, %v7754_v18 }
 0x44b   :  { %v7758_v1 = vpop.eup %7757  ;;  %5851 = vmatprep.mubr.bf16.mxu0 %v5414_v13  ;;  %v5374_v24 = vmul.f32 %v7756_v51, %v10389_v9 }
 0x44c   :  { %v7760_v59 = vpop.eup %7759  ;;  %v5262_v58 = vadd.f32 1.0, %v7758_v1  ;;  %7775 = vrcp.f32 %v5261_v52 }
 0x44d   :  { %v7762_v19 = vpop.eup %7761  ;;  %v5377_v60 = vmul.f32 %v7760_v59, %v10392_v2  ;;  %5852 = vmatmul.mubr.bf16.gmra.mxu0 %v5413_v14 }
 0x44e   :  { %v7764_v42 = vpop.eup %7763  ;;  %v5265_v5 = vadd.f32 1.0, %v7762_v19 }
 0x44f   :  { %v5417_v27 = vpack.c.bf16 %v5377_v60, %v5373_v47  ;;  %v5378_v12 = vmul.f32 %v7764_v42, %v10400_v55  ;;  %v7766_v37 = vpop.eup %7765 }
 0x450   :  { %7777 = vrcp.f32 %v5265_v5  ;;  %v5266_v30 = vadd.f32 1.0, %v7766_v37  ;;  %v7768_v25 = vpop.eup %7767 }
 0x451   :  { %7779 = vrcp.f32 %v5262_v58  ;;  %v5418_v20 = vpack.c.bf16 %v5378_v12, %v5374_v24  ;;  %v7770_v33 = vpop.eup %7769  ;;  %v5381_v41 = vmul.f32 %v7768_v25, %v10406_v53 }
 0x452   :  { %7781 = vrcp.f32 %v5266_v30  ;;  %v5382_v9 = vmul.f32 %v7770_v33, %v10413_v57 }
 0x453   :  { %5859 = vmatprep.mubr.bf16.mxu0 %v5418_v20 }
 0x455   :  { %v7772_v2 = vpop.eup %7771  ;;  %5860 = vmatmul.mubr.bf16.gmra.mxu0 %v5417_v27 }
 0x456   :  { %v5385_v56 = vmul.f32 %v7772_v2, %v10420_v16 }
 0x457   :  { %v7774_v54 = vpop.eup %7773 }
 0x458   :  { %v5421_v46 = vpack.c.bf16 %v5385_v56, %v5381_v41  ;;  %v5386_v55 = vmul.f32 %v7774_v54, %v10422_v28  ;;  %v6349_v28 = vpop.f32.mrf.mxu1 }
 0x459   :  { %v7776_v43 = vpop.eup %7775 }
 0x45a   :  { %v5422_v49 = vpack.c.bf16 %v5386_v55, %v5382_v9  ;;  %v5389_v0 = vmul.f32 %v7776_v43, %v10430_v8  ;;  %v6350_v39 = vpop.f32.mrf.mxu1 }
 0x45b   :  { %v6351_v29 = vadd.f32 %v6350_v39, %v6349_v28 }
 0x45c   :  { %5867 = vmatprep.mubr.bf16.mxu0 %v5422_v49  ;;  %v6352_v22 = vpop.f32.mrf.mxu1 }
 0x45d   :  { %v7778_v32 = vpop.eup %7777  ;;  %5868 = vmatmul.mubr.bf16.gmra.mxu0 %v5421_v46  ;;  %v5725_v14 = vadd.f32 %v6351_v29, %v10471_v21 }
 0x45e   :  { %v7780_v31 = vpop.eup %7779  ;;  %v5393_v15 = vmul.f32 %v7778_v32, %v10442_v63  ;;  %v6353_v62 = vpop.f32.mrf.mxu1 }
 0x45f   :  { %v7782_v23 = vpop.eup %7781  ;;  %v5390_v16 = vmul.f32 %v7780_v31, %v10436_v35  ;;  %v6354_v4 = vadd.f32 %v6353_v62, %v6352_v22 }
 0x460   :  { %v5425_v53 = vpack.c.bf16 %v5393_v15, %v5389_v0  ;;  %v5394_v40 = vmul.f32 %v7782_v23, %v10444_v50  ;;  %v6355_v38 = vpop.f32.mrf.mxu1 }
 0x461   :  { %v5728_v52 = vadd.f32 %v6354_v4, %v10471_v21 }
 0x462   :  { %v5426_v57 = vpack.c.bf16 %v5394_v40, %v5390_v16  ;;  %v6356_v10 = vpop.f32.mrf.mxu1 }
 0x463   :  { %v6357_v1 = vadd.f32 %v6356_v10, %v6355_v38 }
 0x464   :  { %5875 = vmatprep.mubr.bf16.mxu0 %v5426_v57  ;;  %v6358_v7 = vpop.f32.mrf.mxu1 }
 0x465   :  { %5876 = vmatmul.mubr.bf16.gmra.mxu0 %v5425_v53  ;;  %v5733_v42 = vadd.f32 %v6357_v1, %v10471_v21 }
 0x466   :  { %v6359_v36 = vpop.f32.mrf.mxu1 }
 0x467   :  { %v6360_v5 = vadd.f32 %v6359_v36, %v6358_v7 }
 0x468   :  { %v6361_v8 = vpop.f32.mrf.mxu1 }
 0x469   :  { %v5736_v20 = vadd.f32 %v6360_v5, %v10471_v21 }
 0x46a   :  { %v6362_v34 = vpop.f32.mrf.mxu1 }
 0x46b   :  { %v6363_v25 = vadd.f32 %v6362_v34, %v6361_v8 }
 0x46c   :  { %v6364_v63 = vpop.f32.mrf.mxu1 }
 0x46d   :  { %v5741_v9 = vadd.f32 %v6363_v25, %v10471_v21 }
 0x46e   :  { %v6365_v45 = vpop.f32.mrf.mxu1 }
 0x46f   :  { %v6366_v46 = vadd.f32 %v6365_v45, %v6364_v63 }
 0x470   :  { %v6367_v61 = vpop.f32.mrf.mxu1 }
 0x471   :  { %v5744_v0 = vadd.f32 %v6366_v46, %v10471_v21 }
 0x472   :  { %v6368_v3 = vpop.f32.mrf.mxu1 }
 0x473   :  { %v6369_v15 = vadd.f32 %v6368_v3, %v6367_v61 }
 0x474   :  { %v6370_v35 = vpop.f32.mrf.mxu1 }
 0x475   :  { %v5749_v28 = vadd.f32 %v6369_v15, %v10471_v21 }
 0x476   :  { %v6371_v44 = vpop.f32.mrf.mxu1 }
 0x477   :  { %v6372_v39 = vadd.f32 %v6371_v44, %v6370_v35 }
 0x478   :  { %v6373_v50 = vpop.f32.mrf.mxu1 }
 0x479   :  { %v5752_v36 = vadd.f32 %v6372_v39, %v10471_v21 }
 0x47a   :  { %v6374_v6 = vpop.f32.mrf.mxu1 }
 0x47b   :  { %v6375_v8 = vadd.f32 %v6374_v6, %v6373_v50 }
 0x47c   :  { %v6376_v18 = vpop.f32.mrf.mxu1 }
 0x47d   :  { %v5757_v35 = vadd.f32 %v6375_v8, %v10471_v21 }
 0x47e   :  { %v6377_v47 = vpop.f32.mrf.mxu1 }
 0x47f   :  { %v6378_v44 = vadd.f32 %v6377_v47, %v6376_v18 }
 0x484   :  { %v6379_v12 = vpop.f32.mrf.mxu1 }
 0x486   :  { %v6380_v41 = vpop.f32.mrf.mxu1 }
 0x487   :  { %v6381_v4 = vadd.f32 %v6380_v41, %v6379_v12 }
 0x488   :  { %v6382_v43 = vpop.f32.mrf.mxu1 }
 0x48a   :  { %v6383_v16 = vpop.f32.mrf.mxu1 }
 0x48b   :  { %v6384_v1 = vadd.f32 %v6383_v16, %v6382_v43 }
 0x497   :  { %v6385_v38 = vpop.f32.mrf.mxu1 }
 0x499   :  { %v6386_v45 = vpop.f32.mrf.mxu1 }
 0x49a   :  { %v6387_v5 = vadd.f32 %v6386_v45, %v6385_v38 }
 0x4ed   :  { %v6413_v11 = vpop.f32.mrf.mxu0 }
 0x4ef   :  { %v6414_v17 = vpop.f32.mrf.mxu0 }
 0x4f0   :  { %v6415_v48 = vadd.f32 %v6414_v17, %v6413_v11  ;;  %v6388_v17 = vpop.f32.mrf.mxu1 }
 0x4f1   :  { %v6416_v26 = vpop.f32.mrf.mxu0 }
 0x4f2   :  { %v5822_v13 = vadd.f32 %v6415_v48, %v5725_v14  ;;  %v5760_v14 = vadd.f32 %v6378_v44, %v10471_v21 }
 0x4f3   :  { %v6417_v51 = vpop.f32.mrf.mxu0 }
 0x4f4   :  { %5884 = vst [vmem:[%s10546_s9] sm:$0xff] %v5822_v13  ;;  %v6418_v59 = vadd.f32 %v6417_v51, %v6416_v26  ;;  %v6389_v13 = vpop.f32.mrf.mxu1 }
 0x4f5   :  { %v6419_v19 = vpop.f32.mrf.mxu0  ;;  %v6390_v25 = vadd.f32 %v6389_v13, %v6388_v17 }
 0x4f6   :  { %v5825_v60 = vadd.f32 %v6418_v59, %v5728_v52  ;;  %v5765_v52 = vadd.f32 %v6381_v4, %v10471_v21  ;;  %v6391_v47 = vpop.f32.mrf.mxu1 }
 0x4f7   :  { %v6420_v58 = vpop.f32.mrf.mxu0 }
 0x4f8   :  { %5885 = vst [vmem:[%s10546_s9 + $0x8] sm:$0xff] %v5825_v60  ;;  %v6421_v24 = vadd.f32 %v6420_v58, %v6419_v19  ;;  %v6392_v12 = vpop.f32.mrf.mxu1 }
 0x4f9   :  { %v6422_v27 = vpop.f32.mrf.mxu0 }
 0x4fa   :  { %v5830_v37 = vadd.f32 %v6421_v24, %v5733_v42  ;;  %v5768_v42 = vadd.f32 %v6384_v1, %v10471_v21  ;;  %v6394_v41 = vpop.f32.mrf.mxu1 }
 0x4fb   :  { %v6423_v30 = vpop.f32.mrf.mxu0 }
 0x4fc   :  { %5886 = vst [vmem:[%s10546_s9 + $0x10] sm:$0xff] %v5830_v37  ;;  %v6424_v33 = vadd.f32 %v6423_v30, %v6422_v27 }
 0x4fd   :  { %v6425_v2 = vpop.f32.mrf.mxu0 }
 0x4fe   :  { %v5833_v56 = vadd.f32 %v6424_v33, %v5736_v20  ;;  %v5773_v20 = vadd.f32 %v6387_v5, %v10471_v21 }
 0x4ff   :  { %v6426_v54 = vpop.f32.mrf.mxu0 }
 0x500   :  { %5887 = vst [vmem:[%s10546_s9 + $0x18] sm:$0xff] %v5833_v56  ;;  %v6427_v55 = vadd.f32 %v6426_v54, %v6425_v2 }
 0x501   :  { %v6428_v49 = vpop.f32.mrf.mxu0 }
 0x502   :  { %v5838_v32 = vadd.f32 %v6427_v55, %v5741_v9  ;;  %v5776_v9 = vadd.f32 %v6390_v25, %v10471_v21  ;;  %v6393_v55 = vadd.f32 %v6392_v12, %v6391_v47 }
 0x503   :  { %v6429_v31 = vpop.f32.mrf.mxu0 }
 0x504   :  { %5888 = vst [vmem:[%s10546_s9 + $0x20] sm:$0xff] %v5838_v32  ;;  %v6430_v23 = vadd.f32 %v6429_v31, %v6428_v49  ;;  %v6395_v49 = vpop.f32.mrf.mxu1 }
 0x505   :  { %v6431_v53 = vpop.f32.mrf.mxu0  ;;  %v6396_v15 = vadd.f32 %v6395_v49, %v6394_v41 }
 0x506   :  { %v5841_v40 = vadd.f32 %v6430_v23, %v5744_v0  ;;  %v5781_v0 = vadd.f32 %v6393_v55, %v10471_v21 }
 0x507   :  { %v6432_v57 = vpop.f32.mrf.mxu0 }
 0x508   :  { %5889 = vst [vmem:[%s10546_s9 + $0x28] sm:$0xff] %v5841_v40  ;;  %v6433_v22 = vadd.f32 %v6432_v57, %v6431_v53  ;;  %v5784_v57 = vadd.f32 %v6396_v15, %v10471_v21 }
 0x509   :  { %v6434_v62 = vpop.f32.mrf.mxu0 }
 0x50a   :  { %v5846_v10 = vadd.f32 %v6433_v22, %v5749_v28 }
 0x50b   :  { %v6435_v7 = vpop.f32.mrf.mxu0 }
 0x50c   :  { %5890 = vst [vmem:[%s10546_s9 + $0x30] sm:$0xff] %v5846_v10  ;;  %v6436_v34 = vadd.f32 %v6435_v7, %v6434_v62 }
 0x50d   :  { %v6437_v63 = vpop.f32.mrf.mxu0 }
 0x50e   :  { %v5849_v61 = vadd.f32 %v6436_v34, %v5752_v36 }
 0x50f   :  { %v6438_v3 = vpop.f32.mrf.mxu0 }
 0x510   :  { %5891 = vst [vmem:[%s10546_s9 + $0x38] sm:$0xff] %v5849_v61  ;;  %v6439_v29 = vadd.f32 %v6438_v3, %v6437_v63 }
 0x511   :  { %v6440_v11 = vpop.f32.mrf.mxu0 }
 0x512   :  { %v5854_v50 = vadd.f32 %v6439_v29, %v5757_v35 }
 0x513   :  { %v6441_v6 = vpop.f32.mrf.mxu0 }
 0x514   :  { %5892 = vst [vmem:[%s10546_s9 + $0x40] sm:$0xff] %v5854_v50  ;;  %v6442_v48 = vadd.f32 %v6441_v6, %v6440_v11 }
 0x515   :  { %v6443_v26 = vpop.f32.mrf.mxu0 }
 0x516   :  { %v5857_v18 = vadd.f32 %v6442_v48, %v5760_v14 }
 0x517   :  { %v6444_v51 = vpop.f32.mrf.mxu0 }
 0x518   :  { %5893 = vst [vmem:[%s10546_s9 + $0x48] sm:$0xff] %v5857_v18  ;;  %v6445_v59 = vadd.f32 %v6444_v51, %v6443_v26 }
 0x519   :  { %v6446_v19 = vpop.f32.mrf.mxu0 }
 0x51a   :  { %v5862_v60 = vadd.f32 %v6445_v59, %v5765_v52 }
 0x51b   :  { %v6447_v58 = vpop.f32.mrf.mxu0 }
 0x51c   :  { %5894 = vst [vmem:[%s10546_s9 + $0x50] sm:$0xff] %v5862_v60  ;;  %v6448_v24 = vadd.f32 %v6447_v58, %v6446_v19 }
 0x51d   :  { %v6449_v27 = vpop.f32.mrf.mxu0 }
 0x51e   :  { %v5865_v37 = vadd.f32 %v6448_v24, %v5768_v42 }
 0x51f   :  { %v6450_v30 = vpop.f32.mrf.mxu0 }
 0x520   :  { %5895 = vst [vmem:[%s10546_s9 + $0x58] sm:$0xff] %v5865_v37  ;;  %v6451_v33 = vadd.f32 %v6450_v30, %v6449_v27 }
 0x521   :  { %v6452_v2 = vpop.f32.mrf.mxu0 }
 0x522   :  { %v5870_v56 = vadd.f32 %v6451_v33, %v5773_v20 }
 0x523   :  { %v6453_v54 = vpop.f32.mrf.mxu0 }
 0x524   :  { %5896 = vst [vmem:[%s10546_s9 + $0x60] sm:$0xff] %v5870_v56  ;;  %v6454_v46 = vadd.f32 %v6453_v54, %v6452_v2 }
 0x525   :  { %v6455_v32 = vpop.f32.mrf.mxu0 }
 0x526   :  { %v5873_v43 = vadd.f32 %v6454_v46, %v5776_v9 }
 0x527   :  { %v6456_v31 = vpop.f32.mrf.mxu0 }
 0x528   :  { %5897 = vst [vmem:[%s10546_s9 + $0x68] sm:$0xff] %v5873_v43  ;;  %v6457_v23 = vadd.f32 %v6456_v31, %v6455_v32 }
 0x529   :  { %v6458_v53 = vpop.f32.mrf.mxu0 }
 0x52a   :  { %v5878_v16 = vadd.f32 %v6457_v23, %v5781_v0 }
 0x52b   :  { %v6459_v40 = vpop.f32.mrf.mxu0 }
 0x52c   :  { %5898 = vst [vmem:[%s10546_s9 + $0x70] sm:$0xff] %v5878_v16  ;;  %v6460_v28 = vadd.f32 %v6459_v40, %v6458_v53 }
 0x52e   :  { %v5881_v39 = vadd.f32 %v6460_v28, %v5784_v57 }
 0x530   :  { %5899 = vst [vmem:[%s10546_s9 + $0x78] sm:$0xff] %v5881_v39 }
 0x531   :  { %5904 = vsyncpa [#allocation3], 1 }
 0x532   :  { %5905 = vsyncpa [#allocation5], 1 }

</bundles_post_ra>
